<compile_context>
chip_gen: v6e
topology: v6e:2x2x1
jax: 0.10.0
libtpu: 0.0.40
codegen_flags: <defaults>
</compile_context>

<pallas_src>
import functools

import jax
import jax.numpy as jnp
from jax.experimental import pallas as pl
from jax.experimental.pallas import tpu as pltpu

# Full f32 precision for the pure-JAX f32 reference so it matches the
# in-kernel f32 MXU matmuls when compute_dtype=float32.
jax.config.update("jax_default_matmul_precision", "highest")


# --------------------------------------------------------------------------- #
# Pallas kernel: Nb images per grid step, everything fused in VMEM.
# Activations live as (C, H*W): sublane = channel, lane = flattened spatial.
# --------------------------------------------------------------------------- #
def _dbl_kernel(*refs, H, W, proj_identity, compute_dtype):
    if proj_identity:
        (x_ref, s1_ref, b1_ref, w1_ref,
         s2_ref, b2_ref, w2_ref,
         s3_ref, b3_ref, w3_ref,
         sid_ref, bid_ref, wid_ref, o_ref) = refs
    else:
        (x_ref, s1_ref, b1_ref, w1_ref,
         s2_ref, b2_ref, w2_ref,
         s3_ref, b3_ref, w3_ref, o_ref) = refs

    Nb = x_ref.shape[0]
    HW = x_ref.shape[2]
    Chid = w1_ref.shape[0]

    # Hoist weight / scale loads out of the per-image loop (loaded once).
    w1 = w1_ref[...]            # (Chid, Cin)      compute_dtype
    w2 = w2_ref[...]            # (Chid, 9*Chid)   compute_dtype
    w3 = w3_ref[...]            # (Cdown, Chid)    compute_dtype
    s1 = s1_ref[...]; b1 = b1_ref[...]            # (Cin, 1)  f32
    s2 = s2_ref[...]; b2 = b2_ref[...]            # (Chid, 1) f32
    s3 = s3_ref[...]; b3 = b3_ref[...]            # (Chid, 1) f32
    if proj_identity:
        wid = wid_ref[...]                         # (Cdown, Cin)
        sid = sid_ref[...]; bid = bid_ref[...]     # (Cin, 1)

    # 3x3 conv taps: spatial shift (in flattened lane space) + validity mask.
    # Computed once per grid step (independent of image / channel values),
    # shared by all Nb images in the block.
    lane = jax.lax.broadcasted_iota(jnp.int32, (Chid, HW), 1)
    colpos = lane % W
    taps = []
    for dy in (-1, 0, 1):
        for dx in (-1, 0, 1):
            conds = []
            if dy == -1:
                conds.append(lane >= W)                   # source row h-1 >= 0
            elif dy == 1:
                conds.append(lane < (H - 1) * W)          # source row h+1 <= H-1
            if dx == -1:
                conds.append(colpos != 0)                 # source col w-1 >= 0
            elif dx == 1:
                conds.append(colpos != (W - 1))           # source col w+1 <= W-1
            mask = None
            for c in conds:
                mask = c if mask is None else (mask & c)
            taps.append((dy * W + dx, mask))

    for n in range(Nb):                                    # static unroll, Nb small
        x = x_ref[n].astype(jnp.float32)                   # (Cin, HW)

        # ---- weight_layer1: BN -> ReLU -> 1x1 conv (channel matmul, MXU) ----
        a1 = jnp.maximum(x * s1 + b1, 0.0).astype(compute_dtype)
        y1 = jnp.dot(w1, a1, preferred_element_type=jnp.float32)      # (Chid, HW)

        # ---- weight_layer2: BN -> ReLU -> 3x3 conv (pad=1) ----
        # im2col via XLU lane rolls + edge masks, single fused MXU matmul.
        a2 = jnp.maximum(y1 * s2 + b2, 0.0)                            # (Chid, HW) f32
        cols = []
        for shift, mask in taps:
            v = a2 if shift == 0 else pltpu.roll(a2, (-shift) % HW, axis=1)
            if mask is not None:
                v = jnp.where(mask, v, 0.0)
            cols.append(v)
        col = jnp.concatenate(cols, axis=0).astype(compute_dtype)     # (9*Chid, HW)
        y2 = jnp.dot(w2, col, preferred_element_type=jnp.float32)     # (Chid, HW)

        # ---- weight_layer3: BN -> ReLU -> 1x1 conv ----
        a3 = jnp.maximum(y2 * s3 + b3, 0.0).astype(compute_dtype)
        y3 = jnp.dot(w3, a3, preferred_element_type=jnp.float32)      # (Cdown, HW)

        # ---- identity branch ----
        if proj_identity:   # down_scale (or the 1x1 part of the upsample ConvT)
            aid = jnp.maximum(x * sid + bid, 0.0).astype(compute_dtype)
            idn = jnp.dot(wid, aid, preferred_element_type=jnp.float32)
        else:               # in_channels == down_channels: passthrough
            idn = x

        o_ref[n] = (y3 + idn).astype(o_ref.dtype)                     # lane-dense store


# --------------------------------------------------------------------------- #
# Nb selection: amortize grid-step overhead while staying well inside the
# smallest per-generation VMEM (v7x: 64 MiB physical / 32 MiB scoped default).
# --------------------------------------------------------------------------- #
def _pick_nb(N, Cin, Chid, Cdown, HW, *, nb_cap=8, vmem_budget_bytes=16 << 20):
    per_img = 4 * HW * 2 * (Cin + Cdown)                     # double-buffered in/out DMA
    per_img += 4 * HW * (Cin + 3 * Chid + Cdown)             # fused f32 working set
    per_img += 4 * HW * 9 * Chid                             # im2col column
    nb = max(1, min(nb_cap, N, vmem_budget_bytes // max(per_img, 1)))
    while N % nb:
        nb -= 1
    return nb


# --------------------------------------------------------------------------- #
# Wrapper
# --------------------------------------------------------------------------- #
def decoder_bottleneck_forward(x_nchw, p, *, upsample, proj_identity,
                               compute_dtype=jnp.bfloat16, nb_cap=8):
    """x_nchw: (N, Cin, H, W) float32, PyTorch layout.  Returns NCHW output."""
    N, Cin, H, W = x_nchw.shape
    HW = H * W
    Chid = p["w1t"].shape[0]
    Cdown = p["w3t"].shape[0]

    x = x_nchw.reshape(N, Cin, HW)               # channels-first, spatial -> lanes
    Nb = _pick_nb(N, Cin, Chid, Cdown, HW, nb_cap=nb_cap)
    cd = compute_dtype

    kernel = functools.partial(_dbl_kernel, H=H, W=W,
                               proj_identity=proj_identity, compute_dtype=cd)

    in_specs = [
        pl.BlockSpec((Nb, Cin, HW), lambda n: (n, 0, 0)),      # x
        pl.BlockSpec((Cin, 1), lambda n: (0, 0)),              # s1
        pl.BlockSpec((Cin, 1), lambda n: (0, 0)),              # b1
        pl.BlockSpec((Chid, Cin), lambda n: (0, 0)),           # w1^T
        pl.BlockSpec((Chid, 1), lambda n: (0, 0)),             # s2
        pl.BlockSpec((Chid, 1), lambda n: (0, 0)),             # b2
        pl.BlockSpec((Chid, 9 * Chid), lambda n: (0, 0)),      # w2 (O, 9*I)
        pl.BlockSpec((Chid, 1), lambda n: (0, 0)),             # s3
        pl.BlockSpec((Chid, 1), lambda n: (0, 0)),             # b3
        pl.BlockSpec((Cdown, Chid), lambda n: (0, 0)),         # w3^T
    ]
    args = [x, p["s1"], p["b1"], p["w1t"].astype(cd),
            p["s2"], p["b2"], p["w2t"].astype(cd),
            p["s3"], p["b3"], p["w3t"].astype(cd)]
    if proj_identity:
        # Identity-projection operands only exist (and only cost VMEM / DMA)
        # when the branch actually projects.
        in_specs += [
            pl.BlockSpec((Cin, 1), lambda n: (0, 0)),          # sid
            pl.BlockSpec((Cin, 1), lambda n: (0, 0)),          # bid
            pl.BlockSpec((Cdown, Cin), lambda n: (0, 0)),      # wid^T
        ]
        args += [p["sid"], p["bid"], p["widt"].astype(cd)]

    grid_spec = pltpu.PrefetchScalarGridSpec(
        num_scalar_prefetch=0,
        grid=(N // Nb,),
        in_specs=in_specs,
        out_specs=pl.BlockSpec((Nb, Cdown, HW), lambda n: (n, 0, 0)),
    )

    out = pl.pallas_call(
        kernel,
        out_shape=jax.ShapeDtypeStruct((N, Cdown, HW), x_nchw.dtype),
        grid_spec=grid_spec,
        # Batch axis is fully independent -> "parallel" (shards across the two
        # TensorCores on v7x; no-op on single-TC v5e/v6e).
        compiler_params=pltpu.CompilerParams(dimension_semantics=("parallel",)),
    )(*args)

    out = out.reshape(N, Cdown, H, W)

    if upsample:
        # ConvTranspose2d(k=1, s=2, output_padding=1) == the 1x1 matmuls above
        # (both branches dilate identically) followed by zero-interleave at even
        # spatial indices.  A single fused lax.pad (interior padding) does the
        # placement -- no zeros materialization + strided scatter.
        out = jax.lax.pad(out, jnp.array(0, out.dtype),
                          ((0, 0, 0), (0, 0, 0), (0, 1, 1), (0, 1, 1)))
    return out


# --------------------------------------------------------------------------- #
# Pure-JAX reference (same cast points as the kernel so the check is tight)
# --------------------------------------------------------------------------- #
def _reference(x_nchw, p, *, upsample, proj_identity, compute_dtype):
    cdt = compute_dtype
    x = x_nchw.astype(jnp.float32)

    def bnrelu(v, s, b):
        C = s.shape[0]
        return jnp.maximum(v * s.reshape(1, C, 1, 1) + b.reshape(1, C, 1, 1), 0.0)

    a1 = bnrelu(x, p["s1"], p["b1"])
    y1 = jnp.einsum("nchw,dc->ndhw", a1.astype(cdt), p["w1t"].astype(cdt),
                    preferred_element_type=jnp.float32)
    a2 = bnrelu(y1, p["s2"], p["b2"])
    y2 = jax.lax.conv_general_dilated(
        a2.astype(cdt), p["w2"].astype(cdt), (1, 1), "SAME",
        dimension_numbers=("NCHW", "OIHW", "NCHW"),
        preferred_element_type=jnp.float32)
    a3 = bnrelu(y2, p["s3"], p["b3"])
    y3 = jnp.einsum("nchw,dc->ndhw", a3.astype(cdt), p["w3t"].astype(cdt),
                    preferred_element_type=jnp.float32)
    if proj_identity:
        aid = bnrelu(x, p["sid"], p["bid"])
        idn = jnp.einsum("nchw,dc->ndhw", aid.astype(cdt), p["widt"].astype(cdt),
                         preferred_element_type=jnp.float32)
    else:
        idn = x
    out = y3 + idn
    if upsample:
        out = jax.lax.pad(out, jnp.array(0, out.dtype),
                          ((0, 0, 0), (0, 0, 0), (0, 1, 1), (0, 1, 1)))
    return out


# --------------------------------------------------------------------------- #
# Deterministic parameter init (shapes match the PyTorch module __init__)
# --------------------------------------------------------------------------- #
def _fold_bn(kg, kb, km, kv, c, eps=1e-5):
    gamma = jax.random.uniform(kg, (c,), jnp.float32, 0.5, 1.5)
    beta = jax.random.normal(kb, (c,), jnp.float32) * 0.1
    mean = jax.random.normal(km, (c,), jnp.float32) * 0.1
    var = jax.random.uniform(kv, (c,), jnp.float32, 0.5, 1.5)
    s = gamma / jnp.sqrt(var + eps)
    b = beta - mean * s
    return s.reshape(c, 1), b.reshape(c, 1)                 # channels-first (C, 1)


def make_params(key, cin, chid, cdown):
    ks = jax.random.split(key, 20)
    s1, b1 = _fold_bn(ks[0], ks[1], ks[2], ks[3], cin)
    s2, b2 = _fold_bn(ks[4], ks[5], ks[6], ks[7], chid)
    s3, b3 = _fold_bn(ks[8], ks[9], ks[10], ks[11], chid)
    sid, bid = _fold_bn(ks[12], ks[13], ks[14], ks[15], cin)
    w1t = jax.random.normal(ks[16], (chid, cin), jnp.float32) / jnp.sqrt(cin)
    w2 = jax.random.normal(ks[17], (chid, chid, 3, 3), jnp.float32) / jnp.sqrt(9 * chid)  # OIHW
    # (O, I, KY, KX) -> (O, KY, KX, I) -> (O, 9*I): row k*I+i matches the im2col
    # column ordering (tap k = ky*3+kx block of Chid channels).
    w2t = jnp.transpose(w2, (0, 2, 3, 1)).reshape(chid, 9 * chid)
    w3t = jax.random.normal(ks[18], (cdown, chid), jnp.float32) / jnp.sqrt(chid)
    widt = jax.random.normal(ks[19], (cdown, cin), jnp.float32) / jnp.sqrt(cin)
    return dict(s1=s1, b1=b1, w1t=w1t,
                s2=s2, b2=b2, w2=w2, w2t=w2t,
                s3=s3, b3=b3, w3t=w3t,
                sid=sid, bid=bid, widt=widt)


# --------------------------------------------------------------------------- #
if __name__ == "__main__":
    key = jax.random.PRNGKey(0)
    N, Cin, Chid, Cdown, H, W = 2, 16, 8, 32, 16, 16
    kx, kp, kp2 = jax.random.split(key, 3)
    x = jax.random.normal(kx, (N, Cin, H, W), jnp.float32)

    p = make_params(kp, Cin, Chid, Cdown)

    # Case 0: f32 MXU operands, tight tolerance (numerics / structure sanity).
    out0 = decoder_bottleneck_forward(x, p, upsample=False, proj_identity=True,
                                      compute_dtype=jnp.float32)
    jax.block_until_ready(out0)
    ref0 = _reference(x, p, upsample=False, proj_identity=True,
                      compute_dtype=jnp.float32)
    assert out0.shape == (N, Cdown, H, W)
    assert jnp.allclose(out0, ref0, atol=1e-3, rtol=1e-3), "f32 down_scale mismatch"

    # Case 1: bf16 MXU operands (default), down_scale branch.
    out1 = decoder_bottleneck_forward(x, p, upsample=False, proj_identity=True)
    jax.block_until_ready(out1)
    ref1 = _reference(x, p, upsample=False, proj_identity=True,
                      compute_dtype=jnp.bfloat16)
    assert jnp.allclose(out1, ref1, atol=2e-2, rtol=2e-2), "bf16 down_scale mismatch"

    # Case 2: upsample=True (ConvTranspose2d k=1 s=2 output_padding=1 branches).
    out_u = decoder_bottleneck_forward(x, p, upsample=True, proj_identity=True)
    jax.block_until_ready(out_u)
    ref_u = _reference(x, p, upsample=True, proj_identity=True,
                       compute_dtype=jnp.bfloat16)
    assert out_u.shape == (N, Cdown, 2 * H, 2 * W)
    assert jnp.allclose(out_u, ref_u, atol=2e-2, rtol=2e-2), "upsample mismatch"

    # Case 3: upsample=False, in_channels == down_channels (identity passthrough,
    # identity-branch operands are not passed to / held by the kernel at all).
    p_eq = make_params(kp2, Cin, Chid, Cin)
    out_i = decoder_bottleneck_forward(x, p_eq, upsample=False, proj_identity=False)
    jax.block_until_ready(out_i)
    ref_i = _reference(x, p_eq, upsample=False, proj_identity=False,
                       compute_dtype=jnp.bfloat16)
    assert out_i.shape == (N, Cin, H, W)
    assert jnp.allclose(out_i, ref_i, atol=2e-2, rtol=2e-2), "identity mismatch"

    print("KERNEL_OK")
</pallas_src>

<mosaic_0001>
module attributes {stable_mosaic.version = 11 : i64} {
  func.func @_dbl_kernel(%arg0: i32, %arg1: memref<2x16x256xf32, #tpu.memory_space<vmem>>, %arg2: memref<16x1xf32, #tpu.memory_space<vmem>>, %arg3: memref<16x1xf32, #tpu.memory_space<vmem>>, %arg4: memref<8x16xf32, #tpu.memory_space<vmem>>, %arg5: memref<8x1xf32, #tpu.memory_space<vmem>>, %arg6: memref<8x1xf32, #tpu.memory_space<vmem>>, %arg7: memref<8x72xf32, #tpu.memory_space<vmem>>, %arg8: memref<8x1xf32, #tpu.memory_space<vmem>>, %arg9: memref<8x1xf32, #tpu.memory_space<vmem>>, %arg10: memref<32x8xf32, #tpu.memory_space<vmem>>, %arg11: memref<16x1xf32, #tpu.memory_space<vmem>>, %arg12: memref<16x1xf32, #tpu.memory_space<vmem>>, %arg13: memref<32x16xf32, #tpu.memory_space<vmem>>, %arg14: memref<2x32x256xf32, #tpu.memory_space<vmem>>) attributes {dimension_semantics = [#tpu.dimension_semantics<parallel>], iteration_bounds = array<i64: 1>, scalar_prefetch = 0 : i64, scratch_operands = 0 : i64, tpu.core_type = #tpu.core_type<tc>, window_params = [{transform_indices = @transform_0, window_bounds = array<i64: 2, 16, 256>}, {pipeline_mode = #tpu.pipeline_mode<synchronous>, transform_indices = @transform_1, window_bounds = array<i64: 16, 1>}, {pipeline_mode = #tpu.pipeline_mode<synchronous>, transform_indices = @transform_2, window_bounds = array<i64: 16, 1>}, {pipeline_mode = #tpu.pipeline_mode<synchronous>, transform_indices = @transform_3, window_bounds = array<i64: 8, 16>}, {pipeline_mode = #tpu.pipeline_mode<synchronous>, transform_indices = @transform_4, window_bounds = array<i64: 8, 1>}, {pipeline_mode = #tpu.pipeline_mode<synchronous>, transform_indices = @transform_5, window_bounds = array<i64: 8, 1>}, {pipeline_mode = #tpu.pipeline_mode<synchronous>, transform_indices = @transform_6, window_bounds = array<i64: 8, 72>}, {pipeline_mode = #tpu.pipeline_mode<synchronous>, transform_indices = @transform_7, window_bounds = array<i64: 8, 1>}, {pipeline_mode = #tpu.pipeline_mode<synchronous>, transform_indices = @transform_8, window_bounds = array<i64: 8, 1>}, {pipeline_mode = #tpu.pipeline_mode<synchronous>, transform_indices = @transform_9, window_bounds = array<i64: 32, 8>}, {pipeline_mode = #tpu.pipeline_mode<synchronous>, transform_indices = @transform_10, window_bounds = array<i64: 16, 1>}, {pipeline_mode = #tpu.pipeline_mode<synchronous>, transform_indices = @transform_11, window_bounds = array<i64: 16, 1>}, {pipeline_mode = #tpu.pipeline_mode<synchronous>, transform_indices = @transform_12, window_bounds = array<i64: 32, 16>}, {transform_indices = @transform_13, window_bounds = array<i64: 2, 32, 256>}]} {
    %c0 = arith.constant 0 : index
    %c0_0 = arith.constant 0 : index
    %0 = vector.load %arg4[%c0, %c0_0] : memref<8x16xf32, #tpu.memory_space<vmem>>, vector<8x16xf32>
    %c0_1 = arith.constant 0 : index
    %c0_2 = arith.constant 0 : index
    %1 = vector.load %arg7[%c0_1, %c0_2] : memref<8x72xf32, #tpu.memory_space<vmem>>, vector<8x72xf32>
    %c0_3 = arith.constant 0 : index
    %c0_4 = arith.constant 0 : index
    %2 = vector.load %arg10[%c0_3, %c0_4] : memref<32x8xf32, #tpu.memory_space<vmem>>, vector<32x8xf32>
    %c0_5 = arith.constant 0 : index
    %c0_6 = arith.constant 0 : index
    %3 = vector.load %arg2[%c0_5, %c0_6] : memref<16x1xf32, #tpu.memory_space<vmem>>, vector<16x1xf32>
    %c0_7 = arith.constant 0 : index
    %c0_8 = arith.constant 0 : index
    %4 = vector.load %arg3[%c0_7, %c0_8] : memref<16x1xf32, #tpu.memory_space<vmem>>, vector<16x1xf32>
    %c0_9 = arith.constant 0 : index
    %c0_10 = arith.constant 0 : index
    %5 = vector.load %arg5[%c0_9, %c0_10] : memref<8x1xf32, #tpu.memory_space<vmem>>, vector<8x1xf32>
    %c0_11 = arith.constant 0 : index
    %c0_12 = arith.constant 0 : index
    %6 = vector.load %arg6[%c0_11, %c0_12] : memref<8x1xf32, #tpu.memory_space<vmem>>, vector<8x1xf32>
    %c0_13 = arith.constant 0 : index
    %c0_14 = arith.constant 0 : index
    %7 = vector.load %arg8[%c0_13, %c0_14] : memref<8x1xf32, #tpu.memory_space<vmem>>, vector<8x1xf32>
    %c0_15 = arith.constant 0 : index
    %c0_16 = arith.constant 0 : index
    %8 = vector.load %arg9[%c0_15, %c0_16] : memref<8x1xf32, #tpu.memory_space<vmem>>, vector<8x1xf32>
    %c0_17 = arith.constant 0 : index
    %c0_18 = arith.constant 0 : index
    %9 = vector.load %arg13[%c0_17, %c0_18] : memref<32x16xf32, #tpu.memory_space<vmem>>, vector<32x16xf32>
    %c0_19 = arith.constant 0 : index
    %c0_20 = arith.constant 0 : index
    %10 = vector.load %arg11[%c0_19, %c0_20] : memref<16x1xf32, #tpu.memory_space<vmem>>, vector<16x1xf32>
    %c0_21 = arith.constant 0 : index
    %c0_22 = arith.constant 0 : index
    %11 = vector.load %arg12[%c0_21, %c0_22] : memref<16x1xf32, #tpu.memory_space<vmem>>, vector<16x1xf32>
    %12 = tpu.iota {dimensions = array<i32: 1>} : vector<8x256xi32>
    %c16_i32 = arith.constant 16 : i32
    %c0_i32 = arith.constant 0 : i32
    %13 = arith.cmpi eq, %c16_i32, %c0_i32 : i32
    %c1_i32 = arith.constant 1 : i32
    %14 = arith.select %13, %c1_i32, %c16_i32 : i32
    %15 = vector.broadcast %14 : i32 to vector<8x256xi32>
    %16 = arith.remsi %12, %15 : vector<8x256xi32>
    %c0_i32_23 = arith.constant 0 : i32
    %17 = vector.broadcast %c0_i32_23 : i32 to vector<8x256xi32>
    %18 = arith.cmpi ne, %16, %17 : vector<8x256xi32>
    %c0_i32_24 = arith.constant 0 : i32
    %19 = vector.broadcast %c0_i32_24 : i32 to vector<8x256xi32>
    %20 = arith.cmpi slt, %16, %19 : vector<8x256xi32>
    %c0_i32_25 = arith.constant 0 : i32
    %21 = arith.cmpi slt, %14, %c0_i32_25 : i32
    %22 = vector.broadcast %21 : i1 to vector<8x256xi1>
    %23 = vector.broadcast %22 : vector<8x256xi1> to vector<8x256xi1>
    %24 = arith.xori %20, %23 : vector<8x256xi1>
    %25 = arith.andi %24, %18 : vector<8x256xi1>
    %26 = vector.broadcast %14 : i32 to vector<8x256xi32>
    %27 = arith.addi %16, %26 : vector<8x256xi32>
    %28 = arith.select %25, %27, %16 : vector<8x256xi1>, vector<8x256xi32>
    %c16_i32_26 = arith.constant 16 : i32
    %29 = vector.broadcast %c16_i32_26 : i32 to vector<8x256xi32>
    %30 = arith.cmpi sge, %12, %29 : vector<8x256xi32>
    %c0_i32_27 = arith.constant 0 : i32
    %31 = vector.broadcast %c0_i32_27 : i32 to vector<8x256xi32>
    %32 = arith.cmpi ne, %28, %31 : vector<8x256xi32>
    %33 = arith.andi %30, %32 : vector<8x256xi1>
    %c16_i32_28 = arith.constant 16 : i32
    %34 = vector.broadcast %c16_i32_28 : i32 to vector<8x256xi32>
    %35 = arith.cmpi sge, %12, %34 : vector<8x256xi32>
    %c16_i32_29 = arith.constant 16 : i32
    %36 = vector.broadcast %c16_i32_29 : i32 to vector<8x256xi32>
    %37 = arith.cmpi sge, %12, %36 : vector<8x256xi32>
    %c15_i32 = arith.constant 15 : i32
    %38 = vector.broadcast %c15_i32 : i32 to vector<8x256xi32>
    %39 = arith.cmpi ne, %28, %38 : vector<8x256xi32>
    %40 = arith.andi %37, %39 : vector<8x256xi1>
    %c0_i32_30 = arith.constant 0 : i32
    %41 = vector.broadcast %c0_i32_30 : i32 to vector<8x256xi32>
    %42 = arith.cmpi ne, %28, %41 : vector<8x256xi32>
    %c15_i32_31 = arith.constant 15 : i32
    %43 = vector.broadcast %c15_i32_31 : i32 to vector<8x256xi32>
    %44 = arith.cmpi ne, %28, %43 : vector<8x256xi32>
    %c240_i32 = arith.constant 240 : i32
    %45 = vector.broadcast %c240_i32 : i32 to vector<8x256xi32>
    %46 = arith.cmpi slt, %12, %45 : vector<8x256xi32>
    %c0_i32_32 = arith.constant 0 : i32
    %47 = vector.broadcast %c0_i32_32 : i32 to vector<8x256xi32>
    %48 = arith.cmpi ne, %28, %47 : vector<8x256xi32>
    %49 = arith.andi %46, %48 : vector<8x256xi1>
    %c240_i32_33 = arith.constant 240 : i32
    %50 = vector.broadcast %c240_i32_33 : i32 to vector<8x256xi32>
    %51 = arith.cmpi slt, %12, %50 : vector<8x256xi32>
    %c240_i32_34 = arith.constant 240 : i32
    %52 = vector.broadcast %c240_i32_34 : i32 to vector<8x256xi32>
    %53 = arith.cmpi slt, %12, %52 : vector<8x256xi32>
    %c15_i32_35 = arith.constant 15 : i32
    %54 = vector.broadcast %c15_i32_35 : i32 to vector<8x256xi32>
    %55 = arith.cmpi ne, %28, %54 : vector<8x256xi32>
    %56 = arith.andi %53, %55 : vector<8x256xi1>
    %c0_36 = arith.constant 0 : index
    %c0_37 = arith.constant 0 : index
    %c0_38 = arith.constant 0 : index
    %57 = vector.load %arg1[%c0_36, %c0_37, %c0_38] : memref<2x16x256xf32, #tpu.memory_space<vmem>>, vector<1x16x256xf32>
    %58 = vector.shape_cast %57 : vector<1x16x256xf32> to vector<16x256xf32>
    %59 = vector.broadcast %3 : vector<16x1xf32> to vector<16x256xf32>
    %60 = arith.mulf %58, %59 : vector<16x256xf32>
    %61 = vector.broadcast %4 : vector<16x1xf32> to vector<16x256xf32>
    %62 = arith.addf %60, %61 : vector<16x256xf32>
    %cst = arith.constant 0.000000e+00 : f32
    %63 = vector.broadcast %cst : f32 to vector<16x256xf32>
    %64 = arith.maximumf %62, %63 : vector<16x256xf32>
    %cst_39 = arith.constant dense<0.000000e+00> : vector<8x256xf32>
    %65 = tpu.matmul %0, %64, %cst_39 {dimension_numbers = #tpu.dot_dimension_numbers<[1], [0], [0], [1], [0, 0, 1, 1], [], []>, precision = #tpu.contract_precision<fp32>} : vector<8x16xf32>, vector<16x256xf32>, vector<8x256xf32> -> vector<8x256xf32>
    %66 = vector.broadcast %5 : vector<8x1xf32> to vector<8x256xf32>
    %67 = arith.mulf %65, %66 : vector<8x256xf32>
    %68 = vector.broadcast %6 : vector<8x1xf32> to vector<8x256xf32>
    %69 = arith.addf %67, %68 : vector<8x256xf32>
    %cst_40 = arith.constant 0.000000e+00 : f32
    %70 = vector.broadcast %cst_40 : f32 to vector<8x256xf32>
    %71 = arith.maximumf %69, %70 : vector<8x256xf32>
    %c17_i32 = arith.constant 17 : i32
    %72 = tpu.dynamic_rotate %71 by %c17_i32 dim 1 : vector<8x256xf32>, i32 -> vector<8x256xf32>
    %cst_41 = arith.constant 0.000000e+00 : f32
    %73 = vector.broadcast %cst_41 : f32 to vector<8x256xf32>
    %74 = arith.select %33, %72, %73 : vector<8x256xi1>, vector<8x256xf32>
    %c16_i32_42 = arith.constant 16 : i32
    %75 = tpu.dynamic_rotate %71 by %c16_i32_42 dim 1 : vector<8x256xf32>, i32 -> vector<8x256xf32>
    %cst_43 = arith.constant 0.000000e+00 : f32
    %76 = vector.broadcast %cst_43 : f32 to vector<8x256xf32>
    %77 = arith.select %35, %75, %76 : vector<8x256xi1>, vector<8x256xf32>
    %c15_i32_44 = arith.constant 15 : i32
    %78 = tpu.dynamic_rotate %71 by %c15_i32_44 dim 1 : vector<8x256xf32>, i32 -> vector<8x256xf32>
    %cst_45 = arith.constant 0.000000e+00 : f32
    %79 = vector.broadcast %cst_45 : f32 to vector<8x256xf32>
    %80 = arith.select %40, %78, %79 : vector<8x256xi1>, vector<8x256xf32>
    %c1_i32_46 = arith.constant 1 : i32
    %81 = tpu.dynamic_rotate %71 by %c1_i32_46 dim 1 : vector<8x256xf32>, i32 -> vector<8x256xf32>
    %cst_47 = arith.constant 0.000000e+00 : f32
    %82 = vector.broadcast %cst_47 : f32 to vector<8x256xf32>
    %83 = arith.select %42, %81, %82 : vector<8x256xi1>, vector<8x256xf32>
    %c255_i32 = arith.constant 255 : i32
    %84 = tpu.dynamic_rotate %71 by %c255_i32 dim 1 : vector<8x256xf32>, i32 -> vector<8x256xf32>
    %cst_48 = arith.constant 0.000000e+00 : f32
    %85 = vector.broadcast %cst_48 : f32 to vector<8x256xf32>
    %86 = arith.select %44, %84, %85 : vector<8x256xi1>, vector<8x256xf32>
    %c241_i32 = arith.constant 241 : i32
    %87 = tpu.dynamic_rotate %71 by %c241_i32 dim 1 : vector<8x256xf32>, i32 -> vector<8x256xf32>
    %cst_49 = arith.constant 0.000000e+00 : f32
    %88 = vector.broadcast %cst_49 : f32 to vector<8x256xf32>
    %89 = arith.select %49, %87, %88 : vector<8x256xi1>, vector<8x256xf32>
    %c240_i32_50 = arith.constant 240 : i32
    %90 = tpu.dynamic_rotate %71 by %c240_i32_50 dim 1 : vector<8x256xf32>, i32 -> vector<8x256xf32>
    %cst_51 = arith.constant 0.000000e+00 : f32
    %91 = vector.broadcast %cst_51 : f32 to vector<8x256xf32>
    %92 = arith.select %51, %90, %91 : vector<8x256xi1>, vector<8x256xf32>
    %c239_i32 = arith.constant 239 : i32
    %93 = tpu.dynamic_rotate %71 by %c239_i32 dim 1 : vector<8x256xf32>, i32 -> vector<8x256xf32>
    %cst_52 = arith.constant 0.000000e+00 : f32
    %94 = vector.broadcast %cst_52 : f32 to vector<8x256xf32>
    %95 = arith.select %56, %93, %94 : vector<8x256xi1>, vector<8x256xf32>
    %96 = tpu.concatenate %74, %77, %80, %83, %71, %86, %89, %92, %95 in 0 : vector<8x256xf32>, vector<8x256xf32>, vector<8x256xf32>, vector<8x256xf32>, vector<8x256xf32>, vector<8x256xf32>, vector<8x256xf32>, vector<8x256xf32>, vector<8x256xf32> -> vector<72x256xf32>
    %cst_53 = arith.constant dense<0.000000e+00> : vector<8x256xf32>
    %97 = tpu.matmul %1, %96, %cst_53 {dimension_numbers = #tpu.dot_dimension_numbers<[1], [0], [0], [1], [0, 0, 1, 1], [], []>, precision = #tpu.contract_precision<fp32>} : vector<8x72xf32>, vector<72x256xf32>, vector<8x256xf32> -> vector<8x256xf32>
    %98 = vector.broadcast %7 : vector<8x1xf32> to vector<8x256xf32>
    %99 = arith.mulf %97, %98 : vector<8x256xf32>
    %100 = vector.broadcast %8 : vector<8x1xf32> to vector<8x256xf32>
    %101 = arith.addf %99, %100 : vector<8x256xf32>
    %cst_54 = arith.constant 0.000000e+00 : f32
    %102 = vector.broadcast %cst_54 : f32 to vector<8x256xf32>
    %103 = arith.maximumf %101, %102 : vector<8x256xf32>
    %cst_55 = arith.constant dense<0.000000e+00> : vector<32x256xf32>
    %104 = tpu.matmul %2, %103, %cst_55 {dimension_numbers = #tpu.dot_dimension_numbers<[1], [0], [0], [1], [0, 0, 1, 1], [], []>, precision = #tpu.contract_precision<fp32>} : vector<32x8xf32>, vector<8x256xf32>, vector<32x256xf32> -> vector<32x256xf32>
    %105 = vector.broadcast %10 : vector<16x1xf32> to vector<16x256xf32>
    %106 = arith.mulf %58, %105 : vector<16x256xf32>
    %107 = vector.broadcast %11 : vector<16x1xf32> to vector<16x256xf32>
    %108 = arith.addf %106, %107 : vector<16x256xf32>
    %cst_56 = arith.constant 0.000000e+00 : f32
    %109 = vector.broadcast %cst_56 : f32 to vector<16x256xf32>
    %110 = arith.maximumf %108, %109 : vector<16x256xf32>
    %cst_57 = arith.constant dense<0.000000e+00> : vector<32x256xf32>
    %111 = tpu.matmul %9, %110, %cst_57 {dimension_numbers = #tpu.dot_dimension_numbers<[1], [0], [0], [1], [0, 0, 1, 1], [], []>, precision = #tpu.contract_precision<fp32>} : vector<32x16xf32>, vector<16x256xf32>, vector<32x256xf32> -> vector<32x256xf32>
    %112 = arith.addf %104, %111 : vector<32x256xf32>
    %c0_58 = arith.constant 0 : index
    %c0_59 = arith.constant 0 : index
    %c0_60 = arith.constant 0 : index
    %113 = vector.load %arg14[%c0_58, %c0_59, %c0_60] : memref<2x32x256xf32, #tpu.memory_space<vmem>>, vector<1x32x256xf32>
    %114 = vector.shape_cast %113 : vector<1x32x256xf32> to vector<32x256xf32>
    %115 = vector.shape_cast %112 : vector<32x256xf32> to vector<1x32x256xf32>
    tpu.vector_store %arg14[%c0_58, %c0_59, %c0_60], %115 {strides = array<i32>} : memref<2x32x256xf32, #tpu.memory_space<vmem>>, vector<1x32x256xf32>,
    %c1 = arith.constant 1 : index
    %c0_61 = arith.constant 0 : index
    %c0_62 = arith.constant 0 : index
    %116 = vector.load %arg1[%c1, %c0_61, %c0_62] : memref<2x16x256xf32, #tpu.memory_space<vmem>>, vector<1x16x256xf32>
    %117 = vector.shape_cast %116 : vector<1x16x256xf32> to vector<16x256xf32>
    %118 = vector.broadcast %3 : vector<16x1xf32> to vector<16x256xf32>
    %119 = arith.mulf %117, %118 : vector<16x256xf32>
    %120 = vector.broadcast %4 : vector<16x1xf32> to vector<16x256xf32>
    %121 = arith.addf %119, %120 : vector<16x256xf32>
    %cst_63 = arith.constant 0.000000e+00 : f32
    %122 = vector.broadcast %cst_63 : f32 to vector<16x256xf32>
    %123 = arith.maximumf %121, %122 : vector<16x256xf32>
    %cst_64 = arith.constant dense<0.000000e+00> : vector<8x256xf32>
    %124 = tpu.matmul %0, %123, %cst_64 {dimension_numbers = #tpu.dot_dimension_numbers<[1], [0], [0], [1], [0, 0, 1, 1], [], []>, precision = #tpu.contract_precision<fp32>} : vector<8x16xf32>, vector<16x256xf32>, vector<8x256xf32> -> vector<8x256xf32>
    %125 = vector.broadcast %5 : vector<8x1xf32> to vector<8x256xf32>
    %126 = arith.mulf %124, %125 : vector<8x256xf32>
    %127 = vector.broadcast %6 : vector<8x1xf32> to vector<8x256xf32>
    %128 = arith.addf %126, %127 : vector<8x256xf32>
    %cst_65 = arith.constant 0.000000e+00 : f32
    %129 = vector.broadcast %cst_65 : f32 to vector<8x256xf32>
    %130 = arith.maximumf %128, %129 : vector<8x256xf32>
    %c17_i32_66 = arith.constant 17 : i32
    %131 = tpu.dynamic_rotate %130 by %c17_i32_66 dim 1 : vector<8x256xf32>, i32 -> vector<8x256xf32>
    %cst_67 = arith.constant 0.000000e+00 : f32
    %132 = vector.broadcast %cst_67 : f32 to vector<8x256xf32>
    %133 = arith.select %33, %131, %132 : vector<8x256xi1>, vector<8x256xf32>
    %c16_i32_68 = arith.constant 16 : i32
    %134 = tpu.dynamic_rotate %130 by %c16_i32_68 dim 1 : vector<8x256xf32>, i32 -> vector<8x256xf32>
    %cst_69 = arith.constant 0.000000e+00 : f32
    %135 = vector.broadcast %cst_69 : f32 to vector<8x256xf32>
    %136 = arith.select %35, %134, %135 : vector<8x256xi1>, vector<8x256xf32>
    %c15_i32_70 = arith.constant 15 : i32
    %137 = tpu.dynamic_rotate %130 by %c15_i32_70 dim 1 : vector<8x256xf32>, i32 -> vector<8x256xf32>
    %cst_71 = arith.constant 0.000000e+00 : f32
    %138 = vector.broadcast %cst_71 : f32 to vector<8x256xf32>
    %139 = arith.select %40, %137, %138 : vector<8x256xi1>, vector<8x256xf32>
    %c1_i32_72 = arith.constant 1 : i32
    %140 = tpu.dynamic_rotate %130 by %c1_i32_72 dim 1 : vector<8x256xf32>, i32 -> vector<8x256xf32>
    %cst_73 = arith.constant 0.000000e+00 : f32
    %141 = vector.broadcast %cst_73 : f32 to vector<8x256xf32>
    %142 = arith.select %42, %140, %141 : vector<8x256xi1>, vector<8x256xf32>
    %c255_i32_74 = arith.constant 255 : i32
    %143 = tpu.dynamic_rotate %130 by %c255_i32_74 dim 1 : vector<8x256xf32>, i32 -> vector<8x256xf32>
    %cst_75 = arith.constant 0.000000e+00 : f32
    %144 = vector.broadcast %cst_75 : f32 to vector<8x256xf32>
    %145 = arith.select %44, %143, %144 : vector<8x256xi1>, vector<8x256xf32>
    %c241_i32_76 = arith.constant 241 : i32
    %146 = tpu.dynamic_rotate %130 by %c241_i32_76 dim 1 : vector<8x256xf32>, i32 -> vector<8x256xf32>
    %cst_77 = arith.constant 0.000000e+00 : f32
    %147 = vector.broadcast %cst_77 : f32 to vector<8x256xf32>
    %148 = arith.select %49, %146, %147 : vector<8x256xi1>, vector<8x256xf32>
    %c240_i32_78 = arith.constant 240 : i32
    %149 = tpu.dynamic_rotate %130 by %c240_i32_78 dim 1 : vector<8x256xf32>, i32 -> vector<8x256xf32>
    %cst_79 = arith.constant 0.000000e+00 : f32
    %150 = vector.broadcast %cst_79 : f32 to vector<8x256xf32>
    %151 = arith.select %51, %149, %150 : vector<8x256xi1>, vector<8x256xf32>
    %c239_i32_80 = arith.constant 239 : i32
    %152 = tpu.dynamic_rotate %130 by %c239_i32_80 dim 1 : vector<8x256xf32>, i32 -> vector<8x256xf32>
    %cst_81 = arith.constant 0.000000e+00 : f32
    %153 = vector.broadcast %cst_81 : f32 to vector<8x256xf32>
    %154 = arith.select %56, %152, %153 : vector<8x256xi1>, vector<8x256xf32>
    %155 = tpu.concatenate %133, %136, %139, %142, %130, %145, %148, %151, %154 in 0 : vector<8x256xf32>, vector<8x256xf32>, vector<8x256xf32>, vector<8x256xf32>, vector<8x256xf32>, vector<8x256xf32>, vector<8x256xf32>, vector<8x256xf32>, vector<8x256xf32> -> vector<72x256xf32>
    %cst_82 = arith.constant dense<0.000000e+00> : vector<8x256xf32>
    %156 = tpu.matmul %1, %155, %cst_82 {dimension_numbers = #tpu.dot_dimension_numbers<[1], [0], [0], [1], [0, 0, 1, 1], [], []>, precision = #tpu.contract_precision<fp32>} : vector<8x72xf32>, vector<72x256xf32>, vector<8x256xf32> -> vector<8x256xf32>
    %157 = vector.broadcast %7 : vector<8x1xf32> to vector<8x256xf32>
    %158 = arith.mulf %156, %157 : vector<8x256xf32>
    %159 = vector.broadcast %8 : vector<8x1xf32> to vector<8x256xf32>
    %160 = arith.addf %158, %159 : vector<8x256xf32>
    %cst_83 = arith.constant 0.000000e+00 : f32
    %161 = vector.broadcast %cst_83 : f32 to vector<8x256xf32>
    %162 = arith.maximumf %160, %161 : vector<8x256xf32>
    %cst_84 = arith.constant dense<0.000000e+00> : vector<32x256xf32>
    %163 = tpu.matmul %2, %162, %cst_84 {dimension_numbers = #tpu.dot_dimension_numbers<[1], [0], [0], [1], [0, 0, 1, 1], [], []>, precision = #tpu.contract_precision<fp32>} : vector<32x8xf32>, vector<8x256xf32>, vector<32x256xf32> -> vector<32x256xf32>
    %164 = vector.broadcast %10 : vector<16x1xf32> to vector<16x256xf32>
    %165 = arith.mulf %117, %164 : vector<16x256xf32>
    %166 = vector.broadcast %11 : vector<16x1xf32> to vector<16x256xf32>
    %167 = arith.addf %165, %166 : vector<16x256xf32>
    %cst_85 = arith.constant 0.000000e+00 : f32
    %168 = vector.broadcast %cst_85 : f32 to vector<16x256xf32>
    %169 = arith.maximumf %167, %168 : vector<16x256xf32>
    %cst_86 = arith.constant dense<0.000000e+00> : vector<32x256xf32>
    %170 = tpu.matmul %9, %169, %cst_86 {dimension_numbers = #tpu.dot_dimension_numbers<[1], [0], [0], [1], [0, 0, 1, 1], [], []>, precision = #tpu.contract_precision<fp32>} : vector<32x16xf32>, vector<16x256xf32>, vector<32x256xf32> -> vector<32x256xf32>
    %171 = arith.addf %163, %170 : vector<32x256xf32>
    %c1_87 = arith.constant 1 : index
    %c0_88 = arith.constant 0 : index
    %c0_89 = arith.constant 0 : index
    %172 = vector.load %arg14[%c1_87, %c0_88, %c0_89] : memref<2x32x256xf32, #tpu.memory_space<vmem>>, vector<1x32x256xf32>
    %173 = vector.shape_cast %172 : vector<1x32x256xf32> to vector<32x256xf32>
    %174 = vector.shape_cast %171 : vector<32x256xf32> to vector<1x32x256xf32>
    tpu.vector_store %arg14[%c1_87, %c0_88, %c0_89], %174 {strides = array<i32>} : memref<2x32x256xf32, #tpu.memory_space<vmem>>, vector<1x32x256xf32>,
    return
  }
  func.func @transform_0(%arg0: i32) -> (i32, i32, i32) {
    %c0_i32 = arith.constant 0 : i32
    %c0_i32_0 = arith.constant 0 : i32
    %c0_i32_1 = arith.constant 0 : i32
    return %arg0, %c0_i32, %c0_i32_0 : i32, i32, i32
  }
  func.func @transform_1(%arg0: i32) -> (i32, i32) {
    %c0_i32 = arith.constant 0 : i32
    %c0_i32_0 = arith.constant 0 : i32
    %c0_i32_1 = arith.constant 0 : i32
    return %c0_i32, %c0_i32_0 : i32, i32
  }
  func.func @transform_2(%arg0: i32) -> (i32, i32) {
    %c0_i32 = arith.constant 0 : i32
    %c0_i32_0 = arith.constant 0 : i32
    %c0_i32_1 = arith.constant 0 : i32
    return %c0_i32, %c0_i32_0 : i32, i32
  }
  func.func @transform_3(%arg0: i32) -> (i32, i32) {
    %c0_i32 = arith.constant 0 : i32
    %c0_i32_0 = arith.constant 0 : i32
    %c0_i32_1 = arith.constant 0 : i32
    return %c0_i32, %c0_i32_0 : i32, i32
  }
  func.func @transform_4(%arg0: i32) -> (i32, i32) {
    %c0_i32 = arith.constant 0 : i32
    %c0_i32_0 = arith.constant 0 : i32
    %c0_i32_1 = arith.constant 0 : i32
    return %c0_i32, %c0_i32_0 : i32, i32
  }
  func.func @transform_5(%arg0: i32) -> (i32, i32) {
    %c0_i32 = arith.constant 0 : i32
    %c0_i32_0 = arith.constant 0 : i32
    %c0_i32_1 = arith.constant 0 : i32
    return %c0_i32, %c0_i32_0 : i32, i32
  }
  func.func @transform_6(%arg0: i32) -> (i32, i32) {
    %c0_i32 = arith.constant 0 : i32
    %c0_i32_0 = arith.constant 0 : i32
    %c0_i32_1 = arith.constant 0 : i32
    return %c0_i32, %c0_i32_0 : i32, i32
  }
  func.func @transform_7(%arg0: i32) -> (i32, i32) {
    %c0_i32 = arith.constant 0 : i32
    %c0_i32_0 = arith.constant 0 : i32
    %c0_i32_1 = arith.constant 0 : i32
    return %c0_i32, %c0_i32_0 : i32, i32
  }
  func.func @transform_8(%arg0: i32) -> (i32, i32) {
    %c0_i32 = arith.constant 0 : i32
    %c0_i32_0 = arith.constant 0 : i32
    %c0_i32_1 = arith.constant 0 : i32
    return %c0_i32, %c0_i32_0 : i32, i32
  }
  func.func @transform_9(%arg0: i32) -> (i32, i32) {
    %c0_i32 = arith.constant 0 : i32
    %c0_i32_0 = arith.constant 0 : i32
    %c0_i32_1 = arith.constant 0 : i32
    return %c0_i32, %c0_i32_0 : i32, i32
  }
  func.func @transform_10(%arg0: i32) -> (i32, i32) {
    %c0_i32 = arith.constant 0 : i32
    %c0_i32_0 = arith.constant 0 : i32
    %c0_i32_1 = arith.constant 0 : i32
    return %c0_i32, %c0_i32_0 : i32, i32
  }
  func.func @transform_11(%arg0: i32) -> (i32, i32) {
    %c0_i32 = arith.constant 0 : i32
    %c0_i32_0 = arith.constant 0 : i32
    %c0_i32_1 = arith.constant 0 : i32
    return %c0_i32, %c0_i32_0 : i32, i32
  }
  func.func @transform_12(%arg0: i32) -> (i32, i32) {
    %c0_i32 = arith.constant 0 : i32
    %c0_i32_0 = arith.constant 0 : i32
    %c0_i32_1 = arith.constant 0 : i32
    return %c0_i32, %c0_i32_0 : i32, i32
  }
  func.func @transform_13(%arg0: i32) -> (i32, i32, i32) {
    %c0_i32 = arith.constant 0 : i32
    %c0_i32_0 = arith.constant 0 : i32
    %c0_i32_1 = arith.constant 0 : i32
    return %arg0, %c0_i32, %c0_i32_0 : i32, i32, i32
  }
}

</mosaic_0001>

<bundles_post_ra>
// kernel: tpu_custom_call.1
= control target key start
LH: loop header
LB: loop body
LE: loop exit
PB: predicated region body
PF: predicated region fallthrough
CT: control target
= control target key end

     0   :  { %v5321_v2 = vmov 0   ;;  %s7096_s0 = inlined_call_operand.vmem [shape: f32[2,16,256], index: 0, kind: input, shape index: {}]   ;;  %s7097_s1 = inlined_call_operand.vmem [shape: f32[16,1], index: 1, kind: input, shape index: {}]   ;;  %s7098_s2 = inlined_call_operand.vmem [shape: f32[16,1], index: 2, kind: input, shape index: {}]   ;;  %s7099_s3 = inlined_call_operand.vmem [shape: f32[8,16], index: 3, kind: input, shape index: {}]   ;;  %s7100_s4 = inlined_call_operand.vmem [shape: f32[8,1], index: 4, kind: input, shape index: {}]   ;;  %s7101_s5 = inlined_call_operand.vmem [shape: f32[8,1], index: 5, kind: input, shape index: {}]   ;;  %s7102_s6 = inlined_call_operand.vmem [shape: f32[8,72], index: 6, kind: input, shape index: {}]   ;;  %s7103_s7 = inlined_call_operand.vmem [shape: f32[8,1], index: 7, kind: input, shape index: {}]   ;;  %s7104_s8 = inlined_call_operand.vmem [shape: f32[8,1], index: 8, kind: input, shape index: {}]   ;;  %s7105_s9 = inlined_call_operand.vmem [shape: f32[32,8], index: 9, kind: input, shape index: {}]   ;;  %s7106_s10 = inlined_call_operand.vmem [shape: f32[16,1], index: 10, kind: input, shape index: {}]   ;;  %s7107_s11 = inlined_call_operand.vmem [shape: f32[16,1], index: 11, kind: input, shape index: {}]   ;;  %s7108_s12 = inlined_call_operand.vmem [shape: f32[32,16], index: 12, kind: input, shape index: {}]   ;;  %s7109_s13 = inlined_call_operand.hbm [shape: f32[2,32,256], index: 13, kind: output, shape index: {}]  }
   0x1   :  { %v54_v0 = vld [vmem:[%s7098_s2 + $0x8] sm:$0xff]  ;;  %5298 = vset.pattern.permute.xlu1 %v5321_v2  ;;  %5297 = vset.pattern.permute.xlu0 %v5321_v2  ;;  %v53_v3 = vld [vmem:[%s7098_s2] sm:$0xff] }
   0x2   :  { %v52_v1 = vld [vmem:[%s7097_s1 + $0x8] sm:$0xff]  ;;  %135 = vperm.xlu1 %5298, %v54_v0   ;;  %v51_v4 = vld [vmem:[%s7097_s1] sm:$0xff] }
   0x3   :  { %121 = vperm.xlu0 %5297, %v52_v1  }
   0x4   :  { %18 = vsyncpa [#allocation3], 0  ;;  %v56_v5 = vld [vmem:[%s7101_s5] sm:$0xff]  ;;  %v7116_v7 = vmov 0.0   ;;  %vm146_vm0 = vcmask 130048   ;;  %v5432_v11 = vld [vmem:[%s7096_s0 + $0x10] sm:$0xff] }
   0x5   :  { %v55_v6 = vld [vmem:[%s7100_s4] sm:$0xff]  ;;  %218 = vmatprep.mubr.f32.mxu0 %v7116_v7  ;;  %314 = vmatprep.mubr.f32.mxu1 %v7116_v7  ;;  %v5437_v12 = vld [vmem:[%s7096_s0 + $0x18] sm:$0xff]  ;;  %v5442_v13 = vld [vmem:[%s7096_s0 + $0x30] sm:$0xff]  ;;  %s5324_s16 = smov 112   ;;  %s5325_s17 = smov 113   ;;  %vm729_vm13 = vcmask 588800  }
   0x6   :  { %130 = vperm.xlu1 %5298, %v53_v3   ;;  %v45_v8 = vld [vmem:[%s7099_s3] sm:$0xff]  ;;  %v5447_v14 = vld [vmem:[%s7096_s0 + $0x38] sm:$0xff]  ;;  %v5471_v28 = vld [vmem:[%s7096_s0 + $0x8] sm:$0xff]  ;;  %s5326_s18 = smov 127   ;;  %s5327_s19 = smov 1  }
   0x7   :  { %116 = vperm.xlu0 %5297, %v51_v4   ;;  %v148_v9 = vsel %vm146_vm0, %v45_v8, 0  ;;  %v5459_v22 = vld [vmem:[%s7096_s0] sm:$0xff]  ;;  %v5481_v30 = vld [vmem:[%s7096_s0 + $0x28] sm:$0xff]  ;;  %s5328_s2 = smov 15   ;;  %s5329_s1 = smov 16  }
   0x8   :  { %v5427_v10 = vand.u32 4294901760, %v148_v9  ;;  %v5476_v29 = vld [vmem:[%s7096_s0 + $0x20] sm:$0xff]  ;;  %s5323_s0 = smov 111   ;;  %s5330_s5 = smov 17  }
   0xa   :  { %650 = vperm.xlu1 %5298, %v56_v5   ;;  %7203 = vst [vmem:[#allocation5_spill] sm:$0xff] %v5427_v10  ;;  %v5450_v15 = vsub.f32 %v148_v9, %v5427_v10 }
   0xb   :  { %643 = vperm.xlu0 %5297, %v55_v6  }
   0xc   :  { %7204 = vst [vmem:[#allocation6_spill] sm:$0xff] %v5450_v15  ;;  %v5462_v23 = vand.u32 4294901760, %v5450_v15 }
   0xe   :  { %7205 = vst [vmem:[#allocation7_spill] sm:$0xff] %v5462_v23  ;;  %v222_v41 = vsub.f32 %v5450_v15, %v5462_v23 }
  0x10   :  { %v5493_v54 = vand.u32 4294901760, %v222_v41 }
  0x12   :  { %7206 = vst [vmem:[#allocation8_spill] sm:$0xff] %v5493_v54 }
  0x7d   :  { %v136_v17 = vpop.permute.xlu1 %135 }
  0x7e   :  { %v122_v16 = vpop.permute.xlu0 %121 }
  0x7f   :  { %v126_v18 = vmul.f32 %v122_v16, %v5432_v11  ;;  %v127_v19 = vmul.f32 %v122_v16, %v5437_v12  ;;  %v2744_v20 = vmul.f32 %v5442_v13, %v122_v16  ;;  %v2745_v21 = vmul.f32 %v5447_v14, %v122_v16 }
  0x81   :  { %v140_v24 = vadd.f32 %v136_v17, %v126_v18  ;;  %v141_v25 = vadd.f32 %v136_v17, %v127_v19  ;;  %v5464_v26 = vadd.f32 %v2744_v20, %v136_v17  ;;  %v5466_v27 = vadd.f32 %v2745_v21, %v136_v17  ;;  %v131_v38 = vpop.permute.xlu1 %130 }
  0x82   :  { %v117_v31 = vpop.permute.xlu0 %116 }
  0x83   :  { %v144_v32 = vmax.f32 %v140_v24, 0.0  ;;  %v145_v33 = vmax.f32 %v141_v25, 0.0  ;;  %v124_v34 = vmul.f32 %v117_v31, %v5459_v22  ;;  %v125_v35 = vmul.f32 %v117_v31, %v5471_v28 }
  0x84   :  { %v2742_v36 = vmul.f32 %v5476_v29, %v117_v31  ;;  %v2743_v37 = vmul.f32 %v5481_v30, %v117_v31 }
  0x85   :  { %v178_v39 = vand.u32 4294901760, %v145_v33  ;;  %v180_v40 = vand.u32 4294901760, %v144_v32  ;;  %v138_v42 = vadd.f32 %v131_v38, %v124_v34  ;;  %v139_v43 = vadd.f32 %v131_v38, %v125_v35  ;;  %v5510_v41 = vpop.permute.xlu1 %650 }
  0x86   :  { %v5489_v44 = vadd.f32 %v2742_v36, %v131_v38  ;;  %v5491_v45 = vadd.f32 %v2743_v37, %v131_v38  ;;  %v5507_v37 = vpop.permute.xlu0 %643  ;;  %7208 = vst [vmem:[#allocation10_spill] sm:$0xff] %v5510_v41 }
  0x87   :  { %179 = vmatprep.subr.mxu0 %v178_v39  ;;  %v259_v46 = vsub.f32 %v145_v33, %v178_v39  ;;  %v265_v47 = vsub.f32 %v144_v32, %v180_v40  ;;  %v142_v48 = vmax.f32 %v138_v42, 0.0  ;;  %v143_v49 = vmax.f32 %v139_v43, 0.0  ;;  %7207 = vst [vmem:[#allocation9_spill] sm:$0xff] %v5507_v37 }
  0x88   :  { %181 = vmatpush1.msra.mxu0 %v180_v40 }
  0x89   :  { %v260_v50 = vand.u32 4294901760, %v259_v46  ;;  %v266_v51 = vand.u32 4294901760, %v265_v47  ;;  %v182_v52 = vand.u32 4294901760, %v143_v49  ;;  %v184_v53 = vand.u32 4294901760, %v142_v48 }
  0x8b   :  { %v261_v55 = vsub.f32 %v259_v46, %v260_v50  ;;  %v267_v56 = vsub.f32 %v265_v47, %v266_v51  ;;  %183 = vmatprep.subr.mxu0 %v182_v52  ;;  %v271_v57 = vsub.f32 %v143_v49, %v182_v52  ;;  %v277_v58 = vsub.f32 %v142_v48, %v184_v53  ;;  %v64_v49 = vld [vmem:[%s7106_s10 + $0x8] sm:$0xff] }
  0x8c   :  { %185 = vmatpush1.msra.mxu0 %v184_v53 }
  0x8d   :  { %v262_v59 = vand.u32 4294901760, %v261_v55  ;;  %v268_v60 = vand.u32 4294901760, %v267_v56  ;;  %352 = vmatprep.subr.mxu0 %v259_v46  ;;  %224 = vmatmul.mubr.f32.vlgmr.msra.gmra.mxu0 %v5493_v54  ;;  %v272_v61 = vand.u32 4294901760, %v271_v57  ;;  %v278_v62 = vand.u32 4294901760, %v277_v58  ;;  %v58_v55 = vld [vmem:[%s7104_s8] sm:$0xff] }
  0x8e   :  { %355 = vmatpush1.msra.mxu0 %v265_v47  ;;  %394 = vmatprep.mubr.f32.mxu0 %v7116_v7  ;;  %v67_v56 = vlaneseq }
  0x8f   :  { %263 = vmatprep.subr.mxu1 %v262_v59  ;;  %358 = vmatprep.subr.mxu0 %v271_v57  ;;  %v273_v63 = vsub.f32 %v271_v57, %v272_v61  ;;  %v279_v0 = vsub.f32 %v277_v58, %v278_v62 }
  0x90   :  { %269 = vmatpush1.msra.mxu1 %v268_v60  ;;  %361 = vmatpush1.msra.mxu0 %v277_v58  ;;  %v5549_v57 = vand.u32 127, %v67_v56  ;;  %v46_v56 = vld [vmem:[%s7102_s6] sm:$0xff] }
  0x91   :  { %512 = vmatprep.subr.mxu0 %v260_v50  ;;  %397 = vmatmul.mubr.f32.vlgmr.msra.gmra.mxu0 %v5450_v15  ;;  %v274_v1 = vand.u32 4294901760, %v273_v63  ;;  %v280_v2 = vand.u32 4294901760, %v279_v0  ;;  %v63_v50 = vld [vmem:[%s7106_s10] sm:$0xff] }
  0x92   :  { %516 = vmatpush1.msra.mxu0 %v266_v51  ;;  %557 = vmatprep.mubr.f32.mxu0 %v7116_v7  ;;  %v66_v51 = vld [vmem:[%s7107_s11 + $0x8] sm:$0xff]  ;;  %7209 = vst [vmem:[#allocation11_spill] sm:$0xff] %v5549_v57  ;;  %v5552_v58 = vadd.s32 128, %v5549_v57  ;;  %v74_v60 = vand.u32 15, %v5549_v57  ;;  %vm724_vm3 = vcmp.lt.s32.totalorder %v5549_v57, 111  ;;  %vm715_vm6 = vcmp.lt.s32.totalorder %v5549_v57, 112 }
  0x93   :  { %275 = vmatprep.subr.mxu1 %v274_v1  ;;  %520 = vmatprep.subr.mxu0 %v272_v61  ;;  %v7211_v61 = vmov 0  ;;  %v7214_v1 = vmov 0  ;;  %vm706_vm8 = vcmp.lt.s32.totalorder %v5549_v57, 113  ;;  %vm697_vm10 = vcmp.lt.s32.totalorder %v5549_v57, 127 }
  0x94   :  { %281 = vmatpush1.msra.mxu1 %v280_v2  ;;  %524 = vmatpush1.msra.mxu0 %v278_v62  ;;  %7210 = vst [vmem:[#allocation12_spill] sm:$0xff] %v5552_v58  ;;  %v81_v59 = vand.u32 15, %v5552_v58  ;;  %vm105_vm2 = vcmp.lt.s32.totalorder %v5552_v58, 240  ;;  %vm5566_vm4 = vcmp.ne.s32.totalorder %v74_v60, 15  ;;  %v7217_v2 = vmov 0 }
  0x95   :  { %316 = vmatmul.mubr.f32.vlgmr.msra.gmra.mxu1 %v5427_v10  ;;  %432 = vmatprep.subr.mxu1 %v178_v39  ;;  %v7215_v1 = vsel %vm5566_vm4, 4294967295, %v7214_v1  ;;  %vm5620_vm9 = vcmp.ne.s32.totalorder %v74_v60, 0  ;;  %vm7120_vm12 = vcmp.lt.s32.totalorder %v5549_v57, 1  ;;  %vm94_vm14 = vcmp.ge.s32.totalorder %v5549_v57, 16 }
  0x96   :  { %434 = vmatpush1.msra.mxu1 %v180_v40  ;;  %471 = vmatprep.mubr.f32.mxu1 %v7116_v7  ;;  %vm5556_vm1 = vcmp.ne.s32.totalorder %v81_v59, 15  ;;  %7216 = vst [vmem:[#allocation14_spill] sm:$0xff] %v7215_v1  ;;  %vm5597_vm7 = vcmp.ne.s32.totalorder %v81_v59, 0  ;;  %vm7129_vm15 = vcmp.lt.s32.totalorder %v5549_v57, 15 }
  0x97   :  { %436 = vmatprep.subr.mxu1 %v182_v52  ;;  %559 = vmatmul.mubr.f32.vlgmr.msra.gmra.mxu0 %v5427_v10  ;;  %v7212_v61 = vsel %vm5556_vm1, 4294967295, %v7211_v61  ;;  %vm5574_vm5 = vmand %vm105_vm2, %vm5556_vm1 }
  0x98   :  { %438 = vmatpush1.msra.mxu1 %v184_v53  ;;  %815 = vmatprep.mubr.f32.mxu0 %v7116_v7  ;;  %7213 = vst [vmem:[#allocation13_spill] sm:$0xff] %v7212_v61  ;;  %v7218_v2 = vsel %vm5574_vm5, 4294967295, %v7217_v2  ;;  %vm5632_vm11 = vmand %vm105_vm2, %vm5597_vm7 }
  0x99   :  { %475 = vmatmul.mubr.f32.vlgmr.msra.gmra.mxu1 %v5462_v23  ;;  %594 = vmatprep.subr.mxu1 %v178_v39  ;;  %7219 = vst [vmem:[#allocation15_spill] sm:$0xff] %v7218_v2 }
  0x9a   :  { %596 = vmatpush1.msra.mxu1 %v180_v40  ;;  %633 = vmatprep.mubr.f32.mxu1 %v7116_v7 }
  0x9b   :  { %598 = vmatprep.subr.mxu1 %v182_v52  ;;  %v65_v52 = vld [vmem:[%s7107_s11] sm:$0xff] }
  0x9c   :  { %600 = vmatpush1.msra.mxu1 %v184_v53  ;;  %v57_v53 = vld [vmem:[%s7103_s7] sm:$0xff] }
  0x9d   :  { %635 = vmatmul.mubr.f32.vlgmr.msra.gmra.mxu1 %v5427_v10 }
  0x9e   :  { %981 = vmatprep.mubr.f32.mxu1 %v7116_v7 }
 0x14d   :  { %v225_v3 = vpop.f32.mrf.mxu0 }
 0x14f   :  { %v227_v4 = vpop.f32.mrf.mxu0 }
 0x151   :  { %v398_v5 = vpop.f32.mrf.mxu0 }
 0x153   :  { %v400_v8 = vpop.f32.mrf.mxu0 }
 0x155   :  { %v317_v6 = vpop.f32.mrf.mxu1 }
 0x156   :  { %v318_v9 = vadd.f32 %v317_v6, %v225_v3 }
 0x157   :  { %v319_v16 = vpop.f32.mrf.mxu1  ;;  %v560_v20 = vpop.f32.mrf.mxu0 }
 0x158   :  { %v399_v17 = vadd.f32 %v398_v5, %v318_v9  ;;  %v320_v18 = vadd.f32 %v319_v16, %v227_v4 }
 0x159   :  { %v476_v19 = vpop.f32.mrf.mxu1  ;;  %v562_v33 = vpop.f32.mrf.mxu0 }
 0x15a   :  { %v401_v21 = vadd.f32 %v400_v8, %v320_v18  ;;  %v477_v24 = vadd.f32 %v476_v19, %v399_v17 }
 0x15b   :  { %v478_v25 = vpop.f32.mrf.mxu1 }
 0x15c   :  { %v561_v31 = vadd.f32 %v560_v20, %v477_v24  ;;  %v479_v32 = vadd.f32 %v478_v25, %v401_v21  ;;  %v7220_v21 = vmov 0 }
 0x15d   :  { %v636_v34 = vpop.f32.mrf.mxu1  ;;  %v7221_v21 = vsel %vm5597_vm7, 4294967295, %v7220_v21 }
 0x15e   :  { %v563_v35 = vadd.f32 %v562_v33, %v479_v32  ;;  %v637_v36 = vadd.f32 %v636_v34, %v561_v31  ;;  %7222 = vst [vmem:[#allocation16_spill] sm:$0xff] %v7221_v21 }
 0x15f   :  { %v638_v38 = vpop.f32.mrf.mxu1 }
 0x160   :  { %v646_v39 = vmul.f32 %v5507_v37, %v637_v36  ;;  %v639_v40 = vadd.f32 %v638_v38, %v563_v35 }
 0x162   :  { %v653_v42 = vadd.f32 %v5510_v41, %v646_v39  ;;  %v647_v43 = vmul.f32 %v5507_v37, %v639_v40  ;;  %v7223_v39 = vmov 0 }
 0x163   :  { %v7224_v39 = vsel %vm5620_vm9, 4294967295, %v7223_v39 }
 0x164   :  { %v655_v46 = vmax.f32 %v653_v42, 0.0  ;;  %v654_v47 = vadd.f32 %v5510_v41, %v647_v43  ;;  %7225 = vst [vmem:[#allocation17_spill] sm:$0xff] %v7224_v39  ;;  %v7226_v43 = vmov 0 }
 0x165   :  { %v7227_v43 = vsel %vm5632_vm11, 4294967295, %v7226_v43 }
 0x166   :  { %v656_v48 = vmax.f32 %v654_v47, 0.0  ;;  %720 = vrot.lane.b32.xlu0 %v655_v46, %s5323_s0  ;;  %v5563_v63 = vand.u32 4294901760, %v655_v46  ;;  %7228 = vst [vmem:[#allocation18_spill] sm:$0xff] %v7227_v43 }
 0x168   :  { %722 = vrot.lane.b32.xlu1 %v656_v48, %s5323_s0  ;;  %v5561_v62 = vand.u32 4294901760, %v656_v48  ;;  %v5582_v5 = vsub.f32 %v655_v46, %v5563_v63 }
 0x16a   :  { %711 = vrot.lane.b32.xlu0 %v655_v46, %s5324_s16  ;;  %v5579_v4 = vsub.f32 %v656_v48, %v5561_v62  ;;  %v7110_v25 = vand.u32 4294901760, %v5582_v5 }
 0x16c   :  { %713 = vrot.lane.b32.xlu1 %v656_v48, %s5324_s16  ;;  %v7111_v24 = vand.u32 4294901760, %v5579_v4 }
 0x16e   :  { %702 = vrot.lane.b32.xlu0 %v655_v46, %s5325_s17 }
 0x170   :  { %704 = vrot.lane.b32.xlu1 %v656_v48, %s5325_s17 }
 0x172   :  { %693 = vrot.lane.b32.xlu0 %v655_v46, %s5326_s18 }
 0x174   :  { %695 = vrot.lane.b32.xlu1 %v656_v48, %s5326_s18 }
 0x176   :  { %684 = vrot.lane.b32.xlu0 %v655_v46, %s5327_s19 }
 0x178   :  { %686 = vrot.lane.b32.xlu1 %v656_v48, %s5327_s19 }
 0x17a   :  { %675 = vrot.lane.b32.xlu0 %v655_v46, %s5328_s2 }
 0x17c   :  { %677 = vrot.lane.b32.xlu1 %v656_v48, %s5328_s2 }
 0x17e   :  { %666 = vrot.lane.b32.xlu0 %v655_v46, %s5329_s1 }
 0x180   :  { %668 = vrot.lane.b32.xlu1 %v656_v48, %s5329_s1 }
 0x182   :  { %657 = vrot.lane.b32.xlu0 %v655_v46, %s5330_s5 }
 0x184   :  { %659 = vrot.lane.b32.xlu1 %v656_v48, %s5330_s5 }
 0x186   :  { %1429 = vperm.xlu0 %5297, %v64_v49   ;;  %v5644_v49 = vsub.f32 %v5579_v4, %v7111_v24 }
 0x188   :  { %1424 = vperm.xlu1 %5298, %v63_v50   ;;  %v5649_v50 = vsub.f32 %v5582_v5, %v7110_v25 }
 0x18a   :  { %1443 = vperm.xlu0 %5297, %v66_v51  }
 0x18c   :  { %1438 = vperm.xlu1 %5298, %v65_v52  }
 0x18e   :  { %1408 = vperm.xlu0 %5297, %v57_v53  }
 0x190   :  { %1415 = vperm.xlu1 %5298, %v58_v55  }
 0x1d8   :  { %v721_v0 = vpop.permute.xlu0 %720 }
 0x1da   :  { %v723_v3 = vpop.permute.xlu1 %722 }
 0x1db   :  { %v725_v6 = vsel %vm724_vm3, %v721_v0, %v723_v3  ;;  %v726_v8 = vsel %vm724_vm3, %v723_v3, %v721_v0 }
 0x1dc   :  { %v727_v9 = vsel %vm5566_vm4, %v725_v6, 0.0  ;;  %v728_v16 = vsel %vm5574_vm5, %v726_v8, 0.0  ;;  %v712_v17 = vpop.permute.xlu0 %711 }
 0x1dd   :  { %v5593_v18 = vand.u32 4294901760, %v728_v16  ;;  %v5595_v19 = vand.u32 4294901760, %v727_v9 }
 0x1de   :  { %v714_v20 = vpop.permute.xlu1 %713 }
 0x1df   :  { %v5605_v31 = vsub.f32 %v728_v16, %v5593_v18  ;;  %v5608_v32 = vsub.f32 %v727_v9, %v5595_v19  ;;  %v716_v33 = vsel %vm715_vm6, %v712_v17, %v714_v20  ;;  %v717_v34 = vsel %vm715_vm6, %v714_v20, %v712_v17  ;;  %748 = vmatprep.subr.mxu0 %v5593_v18 }
 0x1e0   :  { %v719_v35 = vsel %vm105_vm2, %v717_v34, 0.0  ;;  %v5617_v36 = vand.u32 4294901760, %v716_v33  ;;  %v703_v38 = vpop.permute.xlu0 %702  ;;  %750 = vmatpush1.msra.mxu0 %v5595_v19 }
 0x1e1   :  { %v7114_v40 = vand.u32 4294901760, %v5608_v32  ;;  %v5626_v42 = vand.u32 4294901760, %v719_v35  ;;  %v7115_v46 = vand.u32 4294901760, %v5605_v31 }
 0x1e2   :  { %v5639_v47 = vsub.f32 %v716_v33, %v5617_v36  ;;  %v705_v48 = vpop.permute.xlu1 %704 }
 0x1e3   :  { %v5652_v51 = vsub.f32 %v719_v35, %v5626_v42  ;;  %v707_v52 = vsel %vm706_vm8, %v703_v38, %v705_v48  ;;  %v708_v53 = vsel %vm706_vm8, %v705_v48, %v703_v38  ;;  %752 = vmatprep.subr.mxu0 %v5626_v42  ;;  %v844_v55 = vsub.f32 %v5605_v31, %v7115_v46 }
 0x1e4   :  { %v7112_v59 = vand.u32 4294901760, %v5639_v47  ;;  %v709_v60 = vsel %vm5620_vm9, %v707_v52, 0.0  ;;  %v710_v0 = vsel %vm5632_vm11, %v708_v53, 0.0  ;;  %v694_v3 = vpop.permute.xlu0 %693  ;;  %754 = vmatpush1.msra.mxu0 %v5617_v36  ;;  %v850_v6 = vsub.f32 %v5608_v32, %v7114_v40 }
 0x1e5   :  { %v5674_v8 = vand.u32 4294901760, %v710_v0  ;;  %v5676_v9 = vand.u32 4294901760, %v709_v60  ;;  %v845_v16 = vand.u32 4294901760, %v844_v55  ;;  %v7113_v17 = vand.u32 4294901760, %v5652_v51 }
 0x1e6   :  { %v862_v20 = vsub.f32 %v5639_v47, %v7112_v59  ;;  %v696_v33 = vpop.permute.xlu1 %695  ;;  %v851_v34 = vand.u32 4294901760, %v850_v6  ;;  %v731_v35 = vsel %vm729_vm13, %v46_v56, 0  ;;  %vm5745_vm13 = vmand %vm94_vm14, %vm5566_vm4 }
 0x1e7   :  { %v5685_v38 = vsub.f32 %v710_v0, %v5674_v8  ;;  %v5688_v48 = vsub.f32 %v709_v60, %v5676_v9  ;;  %v698_v52 = vsel %vm697_vm10, %v694_v3, %v696_v33  ;;  %v699_v53 = vsel %vm697_vm10, %v696_v33, %v694_v3  ;;  %756 = vmatprep.subr.mxu0 %v5674_v8 }
 0x1e8   :  { %v700_v55 = vsel %vm5566_vm4, %v698_v52, 0.0  ;;  %v701_v56 = vsel %vm5556_vm1, %v699_v53, 0.0  ;;  %846 = vmatprep.subr.mxu1 %v845_v16  ;;  %v685_v0 = vpop.permute.xlu0 %684  ;;  %758 = vmatpush1.msra.mxu0 %v5676_v9  ;;  %v856_v60 = vsub.f32 %v5652_v51, %v7113_v17  ;;  %v863_v25 = vand.u32 4294901760, %v862_v20 }
 0x1e9   :  { %v7118_v3 = vand.u32 4294901760, %v5688_v48  ;;  %v5705_v6 = vand.u32 4294901760, %v701_v56  ;;  %v5707_v33 = vand.u32 4294901760, %v700_v55  ;;  %852 = vmatpush1.msra.mxu1 %v851_v34  ;;  %v7119_v52 = vand.u32 4294901760, %v5685_v38 }
 0x1ea   :  { %v687_v53 = vpop.permute.xlu1 %686  ;;  %v857_v16 = vand.u32 4294901760, %v856_v60  ;;  %v5711_v59 = vand.u32 4294901760, %v731_v35 }
 0x1eb   :  { %v5714_v17 = vsub.f32 %v701_v56, %v5705_v6  ;;  %v5717_v40 = vsub.f32 %v700_v55, %v5707_v33  ;;  %v689_v46 = vsel %vm7120_vm12, %v685_v0, %v687_v53  ;;  %v690_v34 = vsel %vm7120_vm12, %v687_v53, %v685_v0  ;;  %760 = vmatprep.subr.mxu0 %v5705_v6 }
 0x1ec   :  { %7229 = vst [vmem:[#allocation19_spill] sm:$0xff] %v5711_v59  ;;  %v691_v20 = vsel %vm5620_vm9, %v690_v34, 0.0  ;;  %v692_v60 = vsel %vm5597_vm7, %v689_v46, 0.0  ;;  %858 = vmatprep.subr.mxu1 %v857_v16  ;;  %v676_v56 = vpop.permute.xlu0 %675  ;;  %762 = vmatpush1.msra.mxu0 %v5707_v33  ;;  %v868_v55 = vsub.f32 %v5685_v38, %v7119_v52  ;;  %v874_v0 = vsub.f32 %v5688_v48, %v7118_v3 }
 0x1ed   :  { %v5736_v7 = vand.u32 4294901760, %v692_v60  ;;  %v5738_v34 = vand.u32 4294901760, %v691_v20  ;;  %864 = vmatpush1.msra.mxu1 %v863_v25  ;;  %764 = vmatprep.subr.mxu0 %v5561_v62  ;;  %v7230_v46 = vmov 0  ;;  %vm7134_vm12 = vcmp.lt.s32.totalorder %v5549_v57, 16 }
 0x1ee   :  { %v7231_v46 = vsel %vm5745_vm13, 4294967295, %v7230_v46  ;;  %v678_v3 = vpop.permute.xlu1 %677  ;;  %766 = vmatpush1.msra.mxu0 %v5563_v63  ;;  %v869_v52 = vand.u32 4294901760, %v868_v55  ;;  %v875_v24 = vand.u32 4294901760, %v874_v0  ;;  %v5753_v25 = vsub.f32 %v731_v35, %v5711_v59 }
 0x1ef   :  { %7232 = vst [vmem:[#allocation20_spill] sm:$0xff] %v7231_v46  ;;  %v5756_v53 = vsub.f32 %v692_v60, %v5736_v7  ;;  %v5759_v43 = vsub.f32 %v691_v20, %v5738_v34  ;;  %v680_v58 = vsel %vm7129_vm15, %v676_v56, %v678_v3  ;;  %v681_v16 = vsel %vm7129_vm15, %v678_v3, %v676_v56 }
 0x1f0   :  { %7233 = vst [vmem:[#allocation21_spill] sm:$0xff] %v5753_v25  ;;  %768 = vmatprep.subr.mxu0 %v5736_v7  ;;  %v682_v55 = vsel %vm5745_vm13, %v681_v16, 0.0  ;;  %v683_v35 = vsel %vm5556_vm1, %v680_v58, 0.0  ;;  %870 = vmatprep.subr.mxu1 %v869_v52  ;;  %v667_v60 = vpop.permute.xlu0 %666  ;;  %v7234_v20 = vand.u32 4294901760, %v5714_v17  ;;  %v7235_v2 = vand.u32 4294901760, %v5717_v40 }
 0x1f1   :  { %770 = vmatpush1.msra.mxu0 %v5738_v34  ;;  %v5778_v1 = vand.u32 4294901760, %v683_v35  ;;  %v5780_v16 = vand.u32 4294901760, %v682_v55  ;;  %876 = vmatpush1.msra.mxu1 %v875_v24  ;;  %v7135_v58 = vand.u32 4294901760, %v5756_v53  ;;  %vm661_vm15 = vcmp.lt.s32.totalorder %v5549_v57, 17 }
 0x1f2   :  { %v880_v0 = vsub.f32 %v5714_v17, %v7234_v20  ;;  %v886_v3 = vsub.f32 %v5717_v40, %v7235_v2  ;;  %v669_v52 = vpop.permute.xlu1 %668  ;;  %v5785_v20 = vand.u32 4294901760, %v5753_v25 }
 0x1f3   :  { %v5788_v41 = vsub.f32 %v683_v35, %v5778_v1  ;;  %v5791_v2 = vsub.f32 %v682_v55, %v5780_v16  ;;  %v671_v56 = vsel %vm7134_vm12, %v667_v60, %v669_v52  ;;  %v672_v24 = vsel %vm7134_vm12, %v669_v52, %v667_v60  ;;  %772 = vmatprep.subr.mxu0 %v5778_v1  ;;  %vm5816_vm12 = vmand %vm94_vm14, %vm5620_vm9 }
 0x1f4   :  { %v881_v46 = vand.u32 4294901760, %v880_v0  ;;  %v887_v61 = vand.u32 4294901760, %v886_v3  ;;  %7236 = vst [vmem:[#allocation22_spill] sm:$0xff] %v5785_v20  ;;  %v673_v0 = vsel %vm94_vm14, %v672_v24, 0.0  ;;  %v5800_v3 = vand.u32 4294901760, %v671_v56  ;;  %774 = vmatpush1.msra.mxu0 %v5780_v16 }
 0x1f5   :  { %v904_v55 = vsub.f32 %v5756_v53, %v7135_v58  ;;  %v7237_v35 = vand.u32 4294901760, %v5759_v43  ;;  %v5810_v52 = vand.u32 4294901760, %v673_v0  ;;  %v899_v24 = vand.u32 4294901760, %v5649_v50 }
 0x1f6   :  { %882 = vmatprep.subr.mxu1 %v881_v46  ;;  %v7238_v46 = vmov 0  ;;  %v7146_v58 = vand.u32 4294901760, %v5788_v41  ;;  %v5823_v23 = vsub.f32 %v671_v56, %v5800_v3  ;;  %v7241_v60 = vand.u32 4294901760, %v5644_v49  ;;  %776 = vmatprep.subr.mxu0 %v5800_v3 }
 0x1f7   :  { %v910_v37 = vsub.f32 %v5759_v43, %v7237_v35  ;;  %888 = vmatpush1.msra.mxu1 %v887_v61  ;;  %v7239_v46 = vsel %vm5816_vm12, 4294967295, %v7238_v46  ;;  %v658_v35 = vpop.permute.xlu0 %657  ;;  %v660_v61 = vpop.permute.xlu1 %659  ;;  %v905_v39 = vand.u32 4294901760, %v904_v55  ;;  %v819_v15 = vsub.f32 %v5753_v25, %v5785_v20  ;;  %778 = vmatpush1.msra.mxu0 %v5810_v52 }
 0x1f8   :  { %7240 = vst [vmem:[#allocation23_spill] sm:$0xff] %v7239_v46  ;;  %894 = vmatprep.subr.mxu1 %v7241_v60  ;;  %v5831_v54 = vsub.f32 %v673_v0, %v5810_v52  ;;  %v662_v50 = vsel %vm661_vm15, %v658_v35, %v660_v61  ;;  %v663_v56 = vsel %vm661_vm15, %v660_v61, %v658_v35  ;;  %v7242_v55 = vand.u32 4294901760, %v5791_v2 }
 0x1f9   :  { %v911_v10 = vand.u32 4294901760, %v910_v37  ;;  %900 = vmatpush1.msra.mxu1 %v899_v24  ;;  %v664_v49 = vsel %vm5816_vm12, %v663_v56, 0.0  ;;  %v665_v37 = vsel %vm5597_vm7, %v662_v50, 0.0  ;;  %v916_v0 = vsub.f32 %v5788_v41, %v7146_v58 }
 0x1fa   :  { %906 = vmatprep.subr.mxu1 %v905_v39  ;;  %v922_v60 = vsub.f32 %v5791_v2, %v7242_v55  ;;  %v7147_v35 = vand.u32 4294901760, %v5831_v54  ;;  %v5849_v24 = vand.u32 4294901760, %v665_v37  ;;  %v5851_v61 = vand.u32 4294901760, %v664_v49 }
 0x1fb   :  { %912 = vmatpush1.msra.mxu1 %v911_v10  ;;  %v7150_v56 = vand.u32 4294901760, %v5823_v23  ;;  %v917_v46 = vand.u32 4294901760, %v916_v0  ;;  %v5854_v39 = vand.u32 4294901760, %v819_v15 }
 0x1fc   :  { %v923_v50 = vand.u32 4294901760, %v922_v60  ;;  %v5857_v21 = vsub.f32 %v665_v37, %v5849_v24  ;;  %v5860_v58 = vsub.f32 %v664_v49, %v5851_v61  ;;  %780 = vmatprep.subr.mxu0 %v5849_v24  ;;  %v934_v10 = vsub.f32 %v5831_v54, %v7147_v35 }
 0x1fd   :  { %7243 = vst [vmem:[#allocation24_spill] sm:$0xff] %v5854_v39  ;;  %v928_v55 = vsub.f32 %v5823_v23, %v7150_v56  ;;  %918 = vmatprep.subr.mxu1 %v917_v46  ;;  %782 = vmatpush1.msra.mxu0 %v5851_v61  ;;  %v7244_v35 = vmov 0.0  }
 0x1fe   :  { %v7149_v15 = vand.u32 4294901760, %v5860_v58  ;;  %924 = vmatpush1.msra.mxu1 %v923_v50  ;;  %1005 = vmatprep.subr.mxu0 %v5605_v31  ;;  %v935_v37 = vand.u32 4294901760, %v934_v10  ;;  %v7148_v0 = vand.u32 4294901760, %v5857_v21 }
 0x1ff   :  { %v929_v49 = vand.u32 4294901760, %v928_v55  ;;  %821 = vmatmul.mubr.f32.vlgmr.msra.gmra.mxu0 %v5854_v39 }
 0x200   :  { %1008 = vmatpush1.msra.mxu0 %v5608_v32  ;;  %v940_v46 = vsub.f32 %v5857_v21, %v7148_v0  ;;  %v946_v60 = vsub.f32 %v5860_v58, %v7149_v15  ;;  %1089 = vmatprep.mubr.f32.mxu0 %v7244_v35 }
 0x201   :  { %930 = vmatprep.subr.mxu1 %v929_v49  ;;  %1011 = vmatprep.subr.mxu0 %v5652_v51  ;;  %v1430_v50 = vpop.permute.xlu0 %1429 }
 0x202   :  { %936 = vmatpush1.msra.mxu1 %v935_v37  ;;  %1014 = vmatpush1.msra.mxu0 %v5639_v47  ;;  %v941_v55 = vand.u32 4294901760, %v940_v46  ;;  %v947_v10 = vand.u32 4294901760, %v946_v60  ;;  %v3996_v0 = vmul.f32 %v5442_v13, %v1430_v50  ;;  %v3997_v15 = vmul.f32 %v5447_v14, %v1430_v50 }
 0x203   :  { %1017 = vmatprep.subr.mxu0 %v5685_v38  ;;  %v1425_v49 = vpop.permute.xlu1 %1424 }
 0x204   :  { %1020 = vmatpush1.msra.mxu0 %v5688_v48  ;;  %942 = vmatprep.subr.mxu1 %v941_v55  ;;  %v3994_v56 = vmul.f32 %v5476_v29, %v1425_v49  ;;  %v3995_v55 = vmul.f32 %v5481_v30, %v1425_v49  ;;  %v59_v29 = vld [vmem:[%s7108_s12] sm:$0xff]  ;;  %v7249_v30 = vand.u32 4294901760, %v5605_v31  ;;  %v1434_v31 = vmul.f32 %v1430_v50, %v5432_v11 }
 0x205   :  { %1023 = vmatprep.subr.mxu0 %v5714_v17  ;;  %948 = vmatpush1.msra.mxu1 %v947_v10  ;;  %v1444_v37 = vpop.permute.xlu0 %1443  ;;  %v1455_v10 = vsel %vm146_vm0, %v59_v29, 0  ;;  %v1433_v29 = vmul.f32 %v1425_v49, %v5471_v28  ;;  %v1432_v11 = vmul.f32 %v1425_v49, %v5459_v22  ;;  %v61_v22 = vld [vmem:[%s7108_s12 + $0x10] sm:$0xff] }
 0x206   :  { %1026 = vmatpush1.msra.mxu0 %v5717_v40  ;;  %v5890_v46 = vadd.f32 %v3996_v0, %v1444_v37  ;;  %v5892_v60 = vadd.f32 %v3997_v15, %v1444_v37  ;;  %983 = vmatmul.mubr.f32.vlgmr.msra.gmra.mxu1 %v5711_v59  ;;  %v7251_v15 = vand.u32 4294901760, %v5652_v51  ;;  %v60_v51 = vld [vmem:[%s7108_s12 + $0x8] sm:$0xff] }
 0x207   :  { %1029 = vmatprep.subr.mxu0 %v5579_v4  ;;  %1113 = vmatprep.subr.mxu1 %v5593_v18  ;;  %v1439_v13 = vpop.permute.xlu1 %1438  ;;  %v1458_v28 = vsel %vm146_vm0, %v60_v51, 0 }
 0x208   :  { %7245 = vst [vmem:[#allocation25_spill] sm:$0xff] %v5890_v46  ;;  %7246 = vst [vmem:[#allocation26_spill] sm:$0xff] %v5892_v60  ;;  %1032 = vmatpush1.msra.mxu0 %v5582_v5  ;;  %1115 = vmatpush1.msra.mxu1 %v5595_v19  ;;  %v5901_v14 = vadd.f32 %v3994_v56, %v1439_v13  ;;  %v5903_v0 = vadd.f32 %v3995_v55, %v1439_v13  ;;  %v7250_v56 = vand.u32 4294901760, %v5608_v32 }
 0x209   :  { %1035 = vmatprep.subr.mxu0 %v5756_v53  ;;  %1117 = vmatprep.subr.mxu1 %v5626_v42  ;;  %v1435_v55 = vmul.f32 %v1430_v50, %v5437_v12  ;;  %v7253_v32 = vand.u32 4294901760, %v5685_v38  ;;  %v7254_v12 = vand.u32 4294901760, %v5688_v48  ;;  %v1448_v50 = vadd.f32 %v1444_v37, %v1434_v31 }
 0x20a   :  { %7247 = vst [vmem:[#allocation27_spill] sm:$0xff] %v5901_v14  ;;  %7248 = vst [vmem:[#allocation28_spill] sm:$0xff] %v5903_v0  ;;  %1038 = vmatpush1.msra.mxu0 %v5759_v43  ;;  %1119 = vmatpush1.msra.mxu1 %v5617_v36  ;;  %v7252_v14 = vand.u32 4294901760, %v5639_v47  ;;  %v5950_v47 = vand.u32 4294901760, %v1455_v10  ;;  %v7256_v38 = vand.u32 4294901760, %v5714_v17  ;;  %v7257_v48 = vand.u32 4294901760, %v5717_v40 }
 0x20b   :  { %1041 = vmatprep.subr.mxu0 %v5788_v41  ;;  %1121 = vmatprep.subr.mxu1 %v5674_v8  ;;  %v7258_v17 = vand.u32 4294901760, %v5579_v4  ;;  %v5974_v40 = vand.u32 4294901760, %v1458_v28  ;;  %v7262_v31 = vand.u32 4294901760, %v5756_v53  ;;  %v1461_v4 = vsel %vm146_vm0, %v61_v22, 0 }
 0x20c   :  { %1044 = vmatpush1.msra.mxu0 %v5791_v2  ;;  %1123 = vmatpush1.msra.mxu1 %v5676_v9  ;;  %7255 = vst [vmem:[#allocation29_spill] sm:$0xff] %v5950_v47  ;;  %v6002_v51 = vand.u32 4294901760, %v1461_v4 }
 0x20d   :  { %1047 = vmatprep.subr.mxu0 %v5823_v23  ;;  %1125 = vmatprep.subr.mxu1 %v5705_v6  ;;  %7261 = vst [vmem:[#allocation31_spill] sm:$0xff] %v5974_v40 }
 0x20e   :  { %1050 = vmatpush1.msra.mxu0 %v5831_v54  ;;  %1127 = vmatpush1.msra.mxu1 %v5707_v33  ;;  %7268 = vst [vmem:[#allocation34_spill] sm:$0xff] %v6002_v51 }
 0x20f   :  { %1053 = vmatprep.subr.mxu0 %v5857_v21  ;;  %1129 = vmatprep.subr.mxu1 %v5561_v62 }
 0x210   :  { %1056 = vmatpush1.msra.mxu0 %v5860_v58  ;;  %1131 = vmatpush1.msra.mxu1 %v5563_v63 }
 0x211   :  { %1092 = vmatmul.mubr.f32.vlgmr.msra.gmra.mxu0 %v5753_v25  ;;  %1133 = vmatprep.subr.mxu1 %v5736_v7 }
 0x212   :  { %1207 = vmatprep.subr.mxu0 %v7249_v30  ;;  %1135 = vmatpush1.msra.mxu1 %v5738_v34  ;;  %v1449_v30 = vadd.f32 %v1444_v37, %v1435_v55  ;;  %v5969_v37 = vsub.f32 %v1455_v10, %v5950_v47  ;;  %v7263_v10 = vand.u32 4294901760, %v5759_v43  ;;  %v6000_v43 = vsub.f32 %v1458_v28, %v5974_v40 }
 0x213   :  { %1211 = vmatpush1.msra.mxu0 %v7250_v56  ;;  %1137 = vmatprep.subr.mxu1 %v5778_v1  ;;  %v1446_v56 = vadd.f32 %v1439_v13, %v1432_v11 }
 0x214   :  { %1215 = vmatprep.subr.mxu0 %v7251_v15  ;;  %1139 = vmatpush1.msra.mxu1 %v5780_v16  ;;  %v1453_v49 = vmax.f32 %v1449_v30, 0.0  ;;  %7259 = vst [vmem:[#allocation30_spill] sm:$0xff] %v5969_v37  ;;  %v1452_v15 = vmax.f32 %v1448_v50, 0.0  ;;  %7267 = vst [vmem:[#allocation33_spill] sm:$0xff] %v6000_v43  ;;  %v7271_v30 = vand.u32 4294901760, %v5857_v21  ;;  %v6031_v21 = vsub.f32 %v1461_v4, %v6002_v51 }
 0x215   :  { %1219 = vmatpush1.msra.mxu0 %v7252_v14  ;;  %1141 = vmatprep.subr.mxu1 %v5800_v3  ;;  %v1447_v14 = vadd.f32 %v1439_v13, %v1433_v29  ;;  %v7260_v13 = vand.u32 4294901760, %v5582_v5  ;;  %v62_v5 = vld [vmem:[%s7108_s12 + $0x18] sm:$0xff] }
 0x216   :  { %1223 = vmatprep.subr.mxu0 %v7253_v32  ;;  %1143 = vmatpush1.msra.mxu1 %v5810_v52  ;;  %v5989_v53 = vand.u32 4294901760, %v1453_v49  ;;  %v7266_v32 = vand.u32 4294901760, %v5791_v2  ;;  %v1464_v29 = vsel %vm146_vm0, %v62_v5, 0  ;;  %v7270_v2 = vand.u32 4294901760, %v5831_v54  ;;  %7274 = vst [vmem:[#allocation36_spill] sm:$0xff] %v6031_v21 }
 0x217   :  { %1227 = vmatpush1.msra.mxu0 %v7254_v12  ;;  %1145 = vmatprep.subr.mxu1 %v5849_v24  ;;  %v1451_v55 = vmax.f32 %v1447_v14, 0.0  ;;  %v7272_v12 = vand.u32 4294901760, %v5860_v58  ;;  %v6055_v14 = vand.u32 4294901760, %v6031_v21  ;;  %vm2104_vm0 = vcmask 64512  }
 0x218   :  { %1231 = vmatprep.subr.mxu0 %v7256_v38  ;;  %1147 = vmatpush1.msra.mxu1 %v5851_v61 }
 0x219   :  { %1180 = vmatprep.mubr.f32.mxu1 %v7244_v35  ;;  %1235 = vmatpush1.msra.mxu0 %v7257_v48  ;;  %7277 = vst [vmem:[#allocation39_spill] sm:$0xff] %v6055_v14  ;;  %v1560_v22 = vsub.f32 %v6031_v21, %v6055_v14 }
 0x21a   :  { %1184 = vmatmul.mubr.f32.vlgmr.msra.gmra.mxu1 %v5785_v20  ;;  %1239 = vmatprep.subr.mxu0 %v7258_v17 }
 0x21b   :  { %1331 = vmatprep.subr.mxu1 %v5593_v18  ;;  %1243 = vmatpush1.msra.mxu0 %v7260_v13  ;;  %v1450_v18 = vmax.f32 %v1446_v56, 0.0 }
 0x21c   :  { %1333 = vmatpush1.msra.mxu1 %v5595_v19  ;;  %1247 = vmatprep.subr.mxu0 %v7262_v31  ;;  %v7264_v19 = vand.u32 4294901760, %v5788_v41  ;;  %v7269_v41 = vand.u32 4294901760, %v5823_v23 }
 0x21d   :  { %1335 = vmatprep.subr.mxu1 %v5626_v42  ;;  %1251 = vmatpush1.msra.mxu0 %v7263_v10  ;;  %v5992_v42 = vand.u32 4294901760, %v5969_v37 }
 0x21e   :  { %1337 = vmatpush1.msra.mxu1 %v5617_v36  ;;  %1255 = vmatprep.subr.mxu0 %v7264_v19  ;;  %v5997_v36 = vand.u32 4294901760, %v1452_v15  ;;  %v47_v19 = vld [vmem:[%s7105_s9] sm:$0xff] }
 0x21f   :  { %1339 = vmatprep.subr.mxu1 %v5674_v8  ;;  %7265 = vst [vmem:[#allocation32_spill] sm:$0xff] %v5992_v42  ;;  %1259 = vmatpush1.msra.mxu0 %v7266_v32  ;;  %v6007_v8 = vand.u32 4294901760, %v1451_v55  ;;  %v1538_v23 = vsub.f32 %v5969_v37, %v5992_v42  ;;  %v2106_v32 = vsel %vm2104_vm0, %v47_v19, 0 }
 0x220   :  { %1341 = vmatpush1.msra.mxu1 %v5676_v9  ;;  %1263 = vmatprep.subr.mxu0 %v7269_v41  ;;  %v6013_v9 = vand.u32 4294901760, %v1450_v18  ;;  %v6025_v54 = vsub.f32 %v1452_v15, %v5997_v36  ;;  %v6087_v15 = vand.u32 4294901760, %v1560_v22 }
 0x221   :  { %1343 = vmatprep.subr.mxu1 %v5705_v6  ;;  %1267 = vmatpush1.msra.mxu0 %v7270_v2  ;;  %v1608_v6 = vsub.f32 %v1453_v49, %v5989_v53  ;;  %v6038_v58 = vsub.f32 %v1451_v55, %v6007_v8  ;;  %v6047_v50 = vand.u32 4294901760, %v1538_v23 }
 0x222   :  { %1345 = vmatpush1.msra.mxu1 %v5707_v33  ;;  %1271 = vmatprep.subr.mxu0 %v7271_v30  ;;  %v6028_v33 = vand.u32 4294901760, %v6000_v43  ;;  %v6043_v11 = vsub.f32 %v1450_v18, %v6013_v9  ;;  %7281 = vst [vmem:[#allocation43_spill] sm:$0xff] %v6087_v15 }
 0x223   :  { %1347 = vmatprep.subr.mxu1 %v5561_v62  ;;  %1275 = vmatpush1.msra.mxu0 %v7272_v12  ;;  %v6033_v62 = vand.u32 4294901760, %v1464_v29  ;;  %7276 = vst [vmem:[#allocation38_spill] sm:$0xff] %v6047_v50  ;;  %v1609_v38 = vand.u32 4294901760, %v1608_v6 }
 0x224   :  { %1308 = vmatprep.mubr.f32.mxu0 %v7244_v35  ;;  %7273 = vst [vmem:[#allocation35_spill] sm:$0xff] %v6028_v33  ;;  %1349 = vmatpush1.msra.mxu1 %v5563_v63  ;;  %v1549_v63 = vsub.f32 %v6000_v43, %v6028_v33 }
 0x225   :  { %7275 = vst [vmem:[#allocation37_spill] sm:$0xff] %v6033_v62  ;;  %1310 = vmatmul.mubr.f32.vlgmr.msra.gmra.mxu0 %v5711_v59  ;;  %1351 = vmatprep.subr.mxu1 %v5736_v7  ;;  %v1615_v7 = vand.u32 4294901760, %v6025_v54  ;;  %v6058_v28 = vsub.f32 %v1464_v29, %v6033_v62  ;;  %v1610_v56 = vsub.f32 %v1608_v6, %v1609_v38 }
 0x226   :  { %1495 = vmatprep.subr.mxu0 %v5989_v53  ;;  %1353 = vmatpush1.msra.mxu1 %v5738_v34  ;;  %v1621_v34 = vand.u32 4294901760, %v6038_v58  ;;  %v6069_v48 = vand.u32 4294901760, %v1549_v63 }
 0x227   :  { %1497 = vmatpush1.msra.mxu0 %v5997_v36  ;;  %1355 = vmatprep.subr.mxu1 %v5778_v1  ;;  %7278 = vst [vmem:[#allocation40_spill] sm:$0xff] %v6058_v28  ;;  %v1627_v1 = vand.u32 4294901760, %v6043_v11  ;;  %v6075_v49 = vand.u32 4294901760, %v6058_v28  ;;  %v1611_v17 = vand.u32 4294901760, %v1610_v56 }
 0x228   :  { %1499 = vmatprep.subr.mxu0 %v6007_v8  ;;  %1357 = vmatpush1.msra.mxu1 %v5780_v16  ;;  %7279 = vst [vmem:[#allocation41_spill] sm:$0xff] %v6069_v48  ;;  %v1616_v16 = vsub.f32 %v6025_v54, %v1615_v7 }
 0x229   :  { %1501 = vmatpush1.msra.mxu0 %v6013_v9  ;;  %1534 = vmatprep.mubr.f32.mxu0 %v7244_v35  ;;  %7280 = vst [vmem:[#allocation42_spill] sm:$0xff] %v6075_v49  ;;  %v1571_v13 = vsub.f32 %v6058_v28, %v6075_v49 }
 0x22a   :  { %1359 = vmatprep.subr.mxu1 %v5800_v3  ;;  %1540 = vmatmul.mubr.f32.vlgmr.msra.gmra.mxu0 %v6047_v50  ;;  %v1622_v3 = vsub.f32 %v6038_v58, %v1621_v34 }
 0x22b   :  { %1722 = vmatprep.subr.mxu0 %v1608_v6  ;;  %1361 = vmatpush1.msra.mxu1 %v5810_v52  ;;  %v1628_v52 = vsub.f32 %v6043_v11, %v1627_v1  ;;  %v6094_v31 = vand.u32 4294901760, %v1571_v13 }
 0x22c   :  { %1725 = vmatpush1.msra.mxu0 %v6025_v54  ;;  %1363 = vmatprep.subr.mxu1 %v5849_v24  ;;  %v1617_v24 = vand.u32 4294901760, %v1616_v16 }
 0x22d   :  { %1728 = vmatprep.subr.mxu0 %v6038_v58  ;;  %1365 = vmatpush1.msra.mxu1 %v5851_v61  ;;  %v1623_v61 = vand.u32 4294901760, %v1622_v3  ;;  %v1629_v55 = vand.u32 4294901760, %v1628_v52  ;;  %7282 = vst [vmem:[#allocation44_spill] sm:$0xff] %v6094_v31  ;;  %v50_v52 = vld [vmem:[%s7105_s9 + $0x18] sm:$0xff] }
 0x22e   :  { %1398 = vmatprep.mubr.f32.mxu1 %v7244_v35  ;;  %1545 = vmatprep.mubr.f32.mxu0 %v7244_v35 }
 0x22f   :  { %1731 = vmatpush1.msra.mxu0 %v6043_v11  ;;  %1400 = vmatmul.mubr.f32.vlgmr.msra.gmra.mxu1 %v5711_v59  ;;  %v49_v11 = vld [vmem:[%s7105_s9 + $0x10] sm:$0xff] }
 0x230   :  { %1551 = vmatmul.mubr.f32.gmra.mxu0 %v6069_v48  ;;  %1612 = vmatprep.subr.mxu1 %v1611_v17  ;;  %v2112_v16 = vsel %vm2104_vm0, %v49_v11, 0  ;;  %v6169_v17 = vpop.permute.xlu0 %1408 }
 0x231   :  { %1933 = vmatprep.subr.mxu0 %v1609_v38  ;;  %1618 = vmatpush1.msra.mxu1 %v1617_v24  ;;  %7286 = vst [vmem:[#allocation48_spill] sm:$0xff] %v6169_v17 }
 0x232   :  { %1556 = vmatprep.mubr.f32.mxu0 %v7244_v35  ;;  %1624 = vmatprep.subr.mxu1 %v1623_v61 }
 0x233   :  { %1663 = vmatprep.mubr.f32.mxu1 %v7244_v35  ;;  %1630 = vmatpush1.msra.mxu1 %v1629_v55 }
 0x234   :  { %1562 = vmatmul.mubr.f32.gmra.mxu0 %v6087_v15  ;;  %1665 = vmatmul.mubr.f32.vlgmr.msra.gmra.mxu1 %v5950_v47 }
 0x235   :  { %1826 = vmatprep.subr.mxu1 %v5989_v53  ;;  %1567 = vmatprep.mubr.f32.mxu0 %v7244_v35 }
 0x236   :  { %1828 = vmatpush1.msra.mxu1 %v5997_v36  ;;  %1670 = vmatprep.mubr.f32.mxu1 %v7244_v35 }
 0x237   :  { %1830 = vmatprep.subr.mxu1 %v6007_v8 }
 0x238   :  { %1832 = vmatpush1.msra.mxu1 %v6013_v9  ;;  %1573 = vmatmul.mubr.f32.gmra.mxu0 %v6094_v31 }
 0x239   :  { %1672 = vmatmul.mubr.f32.gmra.mxu1 %v5974_v40  ;;  %2036 = vmatprep.subr.mxu1 %v5989_v53 }
 0x23a   :  { %1677 = vmatprep.mubr.f32.mxu1 %v7244_v35  ;;  %1764 = vmatprep.mubr.f32.mxu0 %v7244_v35 }
 0x23c   :  { %1767 = vmatmul.mubr.f32.vlgmr.msra.gmra.mxu0 %v5969_v37 }
 0x23d   :  { %1679 = vmatmul.mubr.f32.gmra.mxu1 %v6002_v51  ;;  %1937 = vmatpush1.msra.mxu0 %v1615_v7 }
 0x23e   :  { %1941 = vmatprep.subr.mxu0 %v1621_v34  ;;  %1684 = vmatprep.mubr.f32.mxu1 %v7244_v35 }
 0x23f   :  { %1945 = vmatpush1.msra.mxu0 %v1627_v1  ;;  %1772 = vmatprep.mubr.f32.mxu0 %v7244_v35 }
 0x240   :  { %1775 = vmatmul.mubr.f32.gmra.mxu0 %v6000_v43 }
 0x241   :  { %1686 = vmatmul.mubr.f32.gmra.mxu1 %v6033_v62  ;;  %1780 = vmatprep.mubr.f32.mxu0 %v7244_v35 }
 0x242   :  { %1865 = vmatprep.mubr.f32.mxu1 %v7244_v35 }
 0x244   :  { %1783 = vmatmul.mubr.f32.gmra.mxu0 %v6031_v21 }
 0x245   :  { %1869 = vmatmul.mubr.f32.vlgmr.msra.gmra.mxu1 %v5992_v42  ;;  %1788 = vmatprep.mubr.f32.mxu0 %v7244_v35 }
 0x246   :  { %2038 = vmatpush1.msra.mxu1 %v5997_v36  ;;  %1874 = vmatprep.mubr.f32.mxu1 %v7244_v35 }
 0x247   :  { %2040 = vmatprep.subr.mxu1 %v6007_v8  ;;  %v48_v8 = vld [vmem:[%s7105_s9 + $0x8] sm:$0xff]  ;;  %s5331_s9 = smov [#allocation2]  }
 0x248   :  { %2042 = vmatpush1.msra.mxu1 %v6013_v9  ;;  %1791 = vmatmul.mubr.f32.gmra.mxu0 %v6058_v28  ;;  %v6154_v9 = vand.u32 4294901760, %v2106_v32  ;;  %v2109_v6 = vsel %vm2104_vm0, %v48_v8, 0 }
 0x249   :  { %1878 = vmatmul.mubr.f32.gmra.mxu1 %v6028_v33  ;;  %1978 = vmatprep.mubr.f32.mxu0 %v7244_v35  ;;  %v6163_v7 = vand.u32 4294901760, %v2109_v6 }
 0x24a   :  { %1883 = vmatprep.mubr.f32.mxu1 %v7244_v35  ;;  %7283 = vst [vmem:[#allocation45_spill] sm:$0xff] %v6154_v9  ;;  %v6161_v63 = vsub.f32 %v2106_v32, %v6154_v9 }
 0x24b   :  { %7285 = vst [vmem:[#allocation47_spill] sm:$0xff] %v6163_v7  ;;  %v6175_v61 = vsub.f32 %v2109_v6, %v6163_v7 }
 0x24c   :  { %1980 = vmatmul.mubr.f32.vlgmr.msra.gmra.mxu0 %v5950_v47  ;;  %7284 = vst [vmem:[#allocation46_spill] sm:$0xff] %v6161_v63  ;;  %v6172_v13 = vand.u32 4294901760, %v6161_v63 }
 0x24d   :  { %1887 = vmatmul.mubr.f32.gmra.mxu1 %v6055_v14  ;;  %1985 = vmatprep.mubr.f32.mxu0 %v7244_v35  ;;  %7288 = vst [vmem:[#allocation50_spill] sm:$0xff] %v6175_v61 }
 0x24e   :  { %1892 = vmatprep.mubr.f32.mxu1 %v7244_v35  ;;  %7287 = vst [vmem:[#allocation49_spill] sm:$0xff] %v6172_v13  ;;  %v2187_v32 = vsub.f32 %v6161_v63, %v6172_v13 }
 0x250   :  { %1987 = vmatmul.mubr.f32.gmra.mxu0 %v5974_v40  ;;  %v6198_v6 = vand.u32 4294901760, %v2187_v32 }
 0x251   :  { %1896 = vmatmul.mubr.f32.gmra.mxu1 %v6075_v49  ;;  %1992 = vmatprep.mubr.f32.mxu0 %v7244_v35 }
 0x252   :  { %2075 = vmatprep.mubr.f32.mxu1 %v7244_v35  ;;  %7294 = vst [vmem:[#allocation56_spill] sm:$0xff] %v6198_v6 }
 0x254   :  { %1994 = vmatmul.mubr.f32.gmra.mxu0 %v6002_v51 }
 0x255   :  { %2077 = vmatmul.mubr.f32.vlgmr.msra.gmra.mxu1 %v5950_v47  ;;  %1999 = vmatprep.mubr.f32.mxu0 %v7244_v35 }
 0x256   :  { %2082 = vmatprep.mubr.f32.mxu1 %v7244_v35 }
 0x258   :  { %2001 = vmatmul.mubr.f32.gmra.mxu0 %v6033_v62 }
 0x259   :  { %2084 = vmatmul.mubr.f32.gmra.mxu1 %v5974_v40  ;;  %2183 = vmatprep.mubr.f32.mxu0 %v7244_v35 }
 0x25a   :  { %2089 = vmatprep.mubr.f32.mxu1 %v7244_v35 }
 0x25d   :  { %2091 = vmatmul.mubr.f32.gmra.mxu1 %v6002_v51 }
 0x25e   :  { %2096 = vmatprep.mubr.f32.mxu1 %v7244_v35 }
 0x261   :  { %2098 = vmatmul.mubr.f32.gmra.mxu1 %v6033_v62 }
 0x262   :  { %2302 = vmatprep.mubr.f32.mxu1 %v7244_v35 }
 0x2bf   :  { %v822_v4 = vpop.f32.mrf.mxu0 }
 0x2c1   :  { %v824_v18 = vpop.f32.mrf.mxu0 }
 0x2c6   :  { %v984_v10 = vpop.f32.mrf.mxu1 }
 0x2c7   :  { %v985_v29 = vadd.f32 %v984_v10, %v822_v4  ;;  %v6180_v10 = vpop.permute.xlu1 %1415 }
 0x2c8   :  { %v986_v53 = vpop.f32.mrf.mxu1  ;;  %7290 = vst [vmem:[#allocation52_spill] sm:$0xff] %v6180_v10 }
 0x2c9   :  { %v987_v30 = vadd.f32 %v986_v53, %v824_v18  ;;  %v6178_v18 = vand.u32 4294901760, %v2112_v16 }
 0x2cb   :  { %7289 = vst [vmem:[#allocation51_spill] sm:$0xff] %v6178_v18 }
 0x2d1   :  { %v1093_v5 = vpop.f32.mrf.mxu0 }
 0x2d2   :  { %v1094_v23 = vadd.f32 %v1093_v5, %v985_v29  ;;  %v2115_v5 = vsel %vm2104_vm0, %v50_v52, 0  ;;  %v6192_v29 = vsub.f32 %v2112_v16, %v6178_v18 }
 0x2d3   :  { %v1095_v36 = vpop.f32.mrf.mxu0 }
 0x2d4   :  { %v1096_v54 = vadd.f32 %v1095_v36, %v987_v30  ;;  %v6188_v36 = vand.u32 4294901760, %v6175_v61  ;;  %7292 = vst [vmem:[#allocation54_spill] sm:$0xff] %v6192_v29  ;;  %v6204_v11 = vand.u32 4294901760, %v6192_v29 }
 0x2d6   :  { %7291 = vst [vmem:[#allocation53_spill] sm:$0xff] %v6188_v36  ;;  %7295 = vst [vmem:[#allocation57_spill] sm:$0xff] %v6204_v11 }
 0x2da   :  { %v1185_v41 = vpop.f32.mrf.mxu1 }
 0x2db   :  { %v1186_v58 = vadd.f32 %v1185_v41, %v1094_v23 }
 0x2dc   :  { %v1187_v12 = vpop.f32.mrf.mxu1 }
 0x2dd   :  { %v1188_v34 = vadd.f32 %v1187_v12, %v1096_v54  ;;  %v2198_v12 = vsub.f32 %v6175_v61, %v6188_v36 }
 0x2df   :  { %v6211_v16 = vand.u32 4294901760, %v2198_v12  ;;  %v2751_v12 = vmax.f32 %v5491_v45, 0.0 }
 0x2e1   :  { %7297 = vst [vmem:[#allocation59_spill] sm:$0xff] %v6211_v16  ;;  %v6262_v45 = vand.u32 4294901760, %v2751_v12 }
 0x2e5   :  { %v1311_v2 = vpop.f32.mrf.mxu0 }
 0x2e6   :  { %v1312_v1 = vadd.f32 %v1311_v2, %v1186_v58  ;;  %v6194_v2 = vand.u32 4294901760, %v2115_v5 }
 0x2e7   :  { %v1313_v38 = vpop.f32.mrf.mxu0 }
 0x2e8   :  { %v1314_v22 = vadd.f32 %v1313_v38, %v1188_v34  ;;  %7293 = vst [vmem:[#allocation55_spill] sm:$0xff] %v6194_v2  ;;  %v6207_v38 = vsub.f32 %v2115_v5, %v6194_v2 }
 0x2ea   :  { %7296 = vst [vmem:[#allocation58_spill] sm:$0xff] %v6207_v38 }
 0x2ef   :  { %v1401_v56 = vpop.f32.mrf.mxu1 }
 0x2f0   :  { %v1402_v3 = vadd.f32 %v1401_v56, %v1312_v1 }
 0x2f1   :  { %v1403_v24 = vpop.f32.mrf.mxu1 }
 0x2f2   :  { %v1411_v55 = vmul.f32 %v6169_v17, %v1402_v3  ;;  %v1404_v4 = vadd.f32 %v1403_v24, %v1314_v22  ;;  %v2209_v22 = vsub.f32 %v6192_v29, %v6204_v11  ;;  %v6216_v3 = vand.u32 4294901760, %v6207_v38 }
 0x2f4   :  { %v1418_v19 = vadd.f32 %v6180_v10, %v1411_v55  ;;  %v1412_v53 = vmul.f32 %v6169_v17, %v1404_v4  ;;  %7298 = vst [vmem:[#allocation60_spill] sm:$0xff] %v6216_v3  ;;  %v2753_v55 = vmax.f32 %v5466_v27, 0.0  ;;  %v6221_v5 = vand.u32 4294901760, %v2209_v22 }
 0x2f6   :  { %v1420_v41 = vmax.f32 %v1418_v19, 0.0  ;;  %v1419_v8 = vadd.f32 %v6180_v10, %v1412_v53  ;;  %7299 = vst [vmem:[#allocation61_spill] sm:$0xff] %v6221_v5  ;;  %v2220_v19 = vsub.f32 %v6207_v38, %v6216_v3  ;;  %v6230_v27 = vand.u32 4294901760, %v2753_v55 }
 0x2f8   :  { %v6196_v30 = vand.u32 4294901760, %v1420_v41  ;;  %v1421_v23 = vmax.f32 %v1419_v8, 0.0  ;;  %v6228_v32 = vand.u32 4294901760, %v2220_v19 }
 0x2fa   :  { %v2265_v54 = vsub.f32 %v1420_v41, %v6196_v30  ;;  %v2147_v58 = vand.u32 4294901760, %v1421_v23  ;;  %7300 = vst [vmem:[#allocation62_spill] sm:$0xff] %v6228_v32  ;;  %v6238_v41 = vsub.f32 %v2753_v55, %v6230_v27 }
 0x2fc   :  { %2148 = vmatprep.subr.mxu0 %v2147_v58  ;;  %v2259_v34 = vsub.f32 %v1421_v23, %v2147_v58  ;;  %v2266_v1 = vand.u32 4294901760, %v2265_v54  ;;  %v2864_v8 = vand.u32 4294901760, %v6238_v41  ;;  %v2752_v23 = vmax.f32 %v5464_v26, 0.0 }
 0x2fd   :  { %2150 = vmatpush1.msra.mxu0 %v6196_v30 }
 0x2fe   :  { %2189 = vmatmul.mubr.f32.vlgmr.msra.gmra.mxu0 %v6198_v6  ;;  %2363 = vmatprep.subr.mxu0 %v2259_v34  ;;  %v2260_v56 = vand.u32 4294901760, %v2259_v34  ;;  %v2267_v52 = vsub.f32 %v2265_v54, %v2266_v1 }
 0x2ff   :  { %2366 = vmatpush1.msra.mxu0 %v2265_v54  ;;  %2194 = vmatprep.mubr.f32.mxu0 %v7244_v35  ;;  %v2865_v54 = vsub.f32 %v6238_v41, %v2864_v8 }
 0x300   :  { %2568 = vmatprep.subr.mxu0 %v2260_v56  ;;  %v2261_v24 = vsub.f32 %v2259_v34, %v2260_v56  ;;  %v2268_v53 = vand.u32 4294901760, %v2267_v52  ;;  %v6258_v34 = vand.u32 4294901760, %v2752_v23  ;;  %v2875_v56 = vsub.f32 %v2751_v12, %v6262_v45 }
 0x301   :  { %v2866_v26 = vand.u32 4294901760, %v2865_v54  ;;  %v7301_v54 = vld [vmem:[#allocation8_spill] sm:$0xff] }
 0x302   :  { %2200 = vmatmul.mubr.f32.gmra.mxu0 %v6211_v16  ;;  %v2262_v4 = vand.u32 4294901760, %v2261_v24  ;;  %v2876_v52 = vand.u32 4294901760, %v2875_v56 }
 0x303   :  { %2205 = vmatprep.mubr.f32.mxu0 %v7244_v35 }
 0x304   :  { %2263 = vmatprep.subr.mxu1 %v2262_v4  ;;  %v2877_v4 = vsub.f32 %v2875_v56, %v2876_v52 }
 0x305   :  { %2269 = vmatpush1.msra.mxu1 %v2268_v53 }
 0x306   :  { %2211 = vmatmul.mubr.f32.gmra.mxu0 %v6221_v5  ;;  %2304 = vmatmul.mubr.f32.vlgmr.msra.gmra.mxu1 %v6154_v9 }
 0x307   :  { %2463 = vmatprep.subr.mxu1 %v2147_v58  ;;  %2216 = vmatprep.mubr.f32.mxu0 %v7244_v35 }
 0x308   :  { %2465 = vmatpush1.msra.mxu1 %v6196_v30  ;;  %2309 = vmatprep.mubr.f32.mxu1 %v7244_v35 }
 0x309   :  { %2665 = vmatprep.subr.mxu1 %v2147_v58  ;;  %v2750_v58 = vmax.f32 %v5489_v44, 0.0  ;;  %v2869_v44 = vsub.f32 %v2752_v23, %v6258_v34  ;;  %v2878_v23 = vand.u32 4294901760, %v2877_v4 }
 0x30a   :  { %2222 = vmatmul.mubr.f32.gmra.mxu0 %v6228_v32  ;;  %2311 = vmatmul.mubr.f32.gmra.mxu1 %v6163_v7 }
 0x30b   :  { %2316 = vmatprep.mubr.f32.mxu1 %v7244_v35  ;;  %2399 = vmatprep.mubr.f32.mxu0 %v7244_v35  ;;  %v2870_v22 = vand.u32 4294901760, %v2869_v44 }
 0x30d   :  { %v2871_v55 = vsub.f32 %v2869_v44, %v2870_v22 }
 0x30e   :  { %2318 = vmatmul.mubr.f32.gmra.mxu1 %v6178_v18  ;;  %2402 = vmatmul.mubr.f32.vlgmr.msra.gmra.mxu0 %v6161_v63 }
 0x30f   :  { %2572 = vmatpush1.msra.mxu0 %v2266_v1  ;;  %2323 = vmatprep.mubr.f32.mxu1 %v7244_v35  ;;  %v6266_v1 = vand.u32 4294901760, %v2750_v58  ;;  %v2872_v53 = vand.u32 4294901760, %v2871_v55 }
 0x310   :  { %2783 = vmatprep.subr.mxu0 %v6230_v27  ;;  %2407 = vmatprep.mubr.f32.mxu0 %v7244_v35 }
 0x312   :  { %2325 = vmatmul.mubr.f32.gmra.mxu1 %v6194_v2  ;;  %2410 = vmatmul.mubr.f32.gmra.mxu0 %v6175_v61 }
 0x313   :  { %2415 = vmatprep.mubr.f32.mxu0 %v7244_v35  ;;  %2498 = vmatprep.mubr.f32.mxu1 %v7244_v35 }
 0x316   :  { %2418 = vmatmul.mubr.f32.gmra.mxu0 %v6192_v29  ;;  %2502 = vmatmul.mubr.f32.vlgmr.msra.gmra.mxu1 %v6172_v13 }
 0x317   :  { %2667 = vmatpush1.msra.mxu1 %v6196_v30  ;;  %2423 = vmatprep.mubr.f32.mxu0 %v7244_v35  ;;  %v2881_v30 = vsub.f32 %v2750_v58, %v6266_v1  ;;  %v7302_v58 = vld [vmem:[#allocation6_spill] sm:$0xff] }
 0x318   :  { %2867 = vmatprep.subr.mxu1 %v2866_v26  ;;  %2507 = vmatprep.mubr.f32.mxu1 %v7244_v35  ;;  %v7303_v26 = vld [vmem:[#allocation5_spill] sm:$0xff] }
 0x319   :  { %v2882_v24 = vand.u32 4294901760, %v2881_v30 }
 0x31a   :  { %2426 = vmatmul.mubr.f32.gmra.mxu0 %v6207_v38  ;;  %2511 = vmatmul.mubr.f32.gmra.mxu1 %v6188_v36 }
 0x31b   :  { %2516 = vmatprep.mubr.f32.mxu1 %v7244_v35  ;;  %2605 = vmatprep.mubr.f32.mxu0 %v7244_v35  ;;  %v2883_v19 = vsub.f32 %v2881_v30, %v2882_v24 }
 0x31d   :  { %v2884_v12 = vand.u32 4294901760, %v2883_v19 }
 0x31e   :  { %2520 = vmatmul.mubr.f32.gmra.mxu1 %v6204_v11  ;;  %2607 = vmatmul.mubr.f32.vlgmr.msra.gmra.mxu0 %v6154_v9 }
 0x31f   :  { %2785 = vmatpush1.msra.mxu0 %v6258_v34  ;;  %2525 = vmatprep.mubr.f32.mxu1 %v7244_v35 }
 0x320   :  { %2787 = vmatprep.subr.mxu0 %v6262_v45  ;;  %2612 = vmatprep.mubr.f32.mxu0 %v7244_v35 }
 0x321   :  { %2789 = vmatpush1.msra.mxu0 %v6266_v1 }
 0x322   :  { %2956 = vmatprep.subr.mxu0 %v6238_v41  ;;  %2529 = vmatmul.mubr.f32.gmra.mxu1 %v6216_v3  ;;  %v7304_v41 = vld [vmem:[#allocation7_spill] sm:$0xff] }
 0x323   :  { %2614 = vmatmul.mubr.f32.gmra.mxu0 %v6163_v7  ;;  %2700 = vmatprep.mubr.f32.mxu1 %v7244_v35 }
 0x324   :  { %2619 = vmatprep.mubr.f32.mxu0 %v7244_v35 }
 0x326   :  { %2702 = vmatmul.mubr.f32.vlgmr.msra.gmra.mxu1 %v6154_v9 }
 0x327   :  { %2621 = vmatmul.mubr.f32.gmra.mxu0 %v6178_v18  ;;  %2873 = vmatpush1.msra.mxu1 %v2872_v53 }
 0x328   :  { %2879 = vmatprep.subr.mxu1 %v2878_v23  ;;  %2626 = vmatprep.mubr.f32.mxu0 %v7244_v35 }
 0x329   :  { %2885 = vmatpush1.msra.mxu1 %v2884_v12  ;;  %2707 = vmatprep.mubr.f32.mxu1 %v7244_v35 }
 0x32a   :  { %3036 = vmatprep.subr.mxu1 %v6230_v27  ;;  %2709 = vmatmul.mubr.f32.gmra.mxu1 %v6163_v7 }
 0x32b   :  { %2628 = vmatmul.mubr.f32.gmra.mxu0 %v6194_v2  ;;  %2714 = vmatprep.mubr.f32.mxu1 %v7244_v35 }
 0x32c   :  { %2822 = vmatprep.mubr.f32.mxu0 %v7244_v35 }
 0x32e   :  { %2716 = vmatmul.mubr.f32.gmra.mxu1 %v6178_v18 }
 0x32f   :  { %2828 = vmatmul.mubr.f32.vlgmr.msra.gmra.mxu0 %v7301_v54  ;;  %2721 = vmatprep.mubr.f32.mxu1 %v7244_v35 }
 0x330   :  { %2959 = vmatpush1.msra.mxu0 %v2869_v44  ;;  %2998 = vmatprep.mubr.f32.mxu0 %v7244_v35 }
 0x331   :  { %2962 = vmatprep.subr.mxu0 %v2875_v56  ;;  %v1666_v56 = vpop.f32.mrf.mxu1 }
 0x332   :  { %2965 = vmatpush1.msra.mxu0 %v2881_v30  ;;  %2723 = vmatmul.mubr.f32.gmra.mxu1 %v6194_v2 }
 0x333   :  { %3116 = vmatprep.subr.mxu0 %v2864_v8  ;;  %3001 = vmatmul.mubr.f32.vlgmr.msra.gmra.mxu0 %v7302_v58  ;;  %v1541_v8 = vpop.f32.mrf.mxu0 }
 0x334   :  { %3120 = vmatpush1.msra.mxu0 %v2870_v22  ;;  %2918 = vmatprep.mubr.f32.mxu1 %v7244_v35  ;;  %v1668_v22 = vpop.f32.mrf.mxu1  ;;  %v1667_v60 = vadd.f32 %v1666_v56, %v1541_v8 }
 0x335   :  { %3124 = vmatprep.subr.mxu0 %v2876_v52  ;;  %3161 = vmatprep.mubr.f32.mxu0 %v7244_v35  ;;  %v1543_v44 = vpop.f32.mrf.mxu0 }
 0x336   :  { %3128 = vmatpush1.msra.mxu0 %v2882_v24  ;;  %2920 = vmatmul.mubr.f32.vlgmr.msra.gmra.mxu1 %v7303_v26  ;;  %v1673_v52 = vpop.f32.mrf.mxu1 }
 0x337   :  { %3038 = vmatpush1.msra.mxu1 %v6258_v34  ;;  %3075 = vmatprep.mubr.f32.mxu1 %v7244_v35  ;;  %v1552_v30 = vpop.f32.mrf.mxu0 }
 0x338   :  { %3040 = vmatprep.subr.mxu1 %v6262_v45  ;;  %3163 = vmatmul.mubr.f32.vlgmr.msra.gmra.mxu0 %v7303_v26 }
 0x339   :  { %3042 = vmatpush1.msra.mxu1 %v6266_v1  ;;  %3397 = vmatprep.mubr.f32.mxu0 %v7244_v35 }
 0x33a   :  { %3198 = vmatprep.subr.mxu1 %v6230_v27  ;;  %3079 = vmatmul.mubr.f32.vlgmr.msra.gmra.mxu1 %v7304_v41  ;;  %v6322_v27 = vpop.f32.mrf.mxu0 }
 0x33b   :  { %3200 = vmatpush1.msra.mxu1 %v6258_v34  ;;  %3237 = vmatprep.mubr.f32.mxu1 %v7244_v35  ;;  %v1675_v34 = vpop.f32.mrf.mxu1 }
 0x33c   :  { %3202 = vmatprep.subr.mxu1 %v6262_v45  ;;  %v6324_v24 = vpop.f32.mrf.mxu0 }
 0x33d   :  { %3204 = vmatpush1.msra.mxu1 %v6266_v1  ;;  %v1680_v45 = vpop.f32.mrf.mxu1 }
 0x33e   :  { %3239 = vmatmul.mubr.f32.vlgmr.msra.gmra.mxu1 %v7303_v26  ;;  %v6326_v55 = vpop.f32.mrf.mxu0 }
 0x33f   :  { %3563 = vmatprep.mubr.f32.mxu1 %v7244_v35  ;;  %v6330_v1 = vpop.f32.mrf.mxu1  ;;  %v1669_v35 = vadd.f32 %v1668_v22, %v1543_v44 }
 0x340   :  { %v6328_v4 = vpop.f32.mrf.mxu0  ;;  %v1683_v44 = vadd.f32 %v6330_v1, %v6326_v55 }
 0x341   :  { %v6334_v53 = vpop.f32.mrf.mxu1 }
 0x342   :  { %v6332_v19 = vpop.f32.mrf.mxu0 }
 0x343   :  { %v6336_v12 = vpop.f32.mrf.mxu1 }
 0x344   :  { %v1768_v23 = vpop.f32.mrf.mxu0 }
 0x345   :  { %v1870_v58 = vpop.f32.mrf.mxu1 }
 0x346   :  { %v1770_v54 = vpop.f32.mrf.mxu0 }
 0x347   :  { %v1872_v41 = vpop.f32.mrf.mxu1 }
 0x348   :  { %v1776_v26 = vpop.f32.mrf.mxu0 }
 0x349   :  { %v1879_v11 = vpop.f32.mrf.mxu1 }
 0x34a   :  { %v1778_v3 = vpop.f32.mrf.mxu0 }
 0x34b   :  { %v6338_v38 = vpop.f32.mrf.mxu1 }
 0x34c   :  { %v1784_v36 = vpop.f32.mrf.mxu0 }
 0x34d   :  { %v6340_v29 = vpop.f32.mrf.mxu1 }
 0x34e   :  { %v1786_v13 = vpop.f32.mrf.mxu0 }
 0x34f   :  { %v6344_v2 = vpop.f32.mrf.mxu1 }
 0x350   :  { %v6342_v61 = vpop.f32.mrf.mxu0 }
 0x351   :  { %v6348_v18 = vpop.f32.mrf.mxu1 }
 0x352   :  { %v6346_v63 = vpop.f32.mrf.mxu0 }
 0x353   :  { %v6350_v32 = vpop.f32.mrf.mxu1 }
 0x354   :  { %v1981_v7 = vpop.f32.mrf.mxu0 }
 0x355   :  { %v2078_v5 = vpop.f32.mrf.mxu1 }
 0x356   :  { %v1983_v9 = vpop.f32.mrf.mxu0 }
 0x357   :  { %v6352_v6 = vpop.f32.mrf.mxu1 }
 0x358   :  { %v1988_v16 = vpop.f32.mrf.mxu0 }
 0x359   :  { %v6356_v17 = vpop.f32.mrf.mxu1 }
 0x35a   :  { %v6354_v10 = vpop.f32.mrf.mxu0 }
 0x35b   :  { %v6360_v14 = vpop.f32.mrf.mxu1 }
 0x35c   :  { %v6358_v49 = vpop.f32.mrf.mxu0 }
 0x35d   :  { %v6364_v28 = vpop.f32.mrf.mxu1 }
 0x35e   :  { %v6362_v33 = vpop.f32.mrf.mxu0 }
 0x35f   :  { %v6368_v21 = vpop.f32.mrf.mxu1 }
 0x360   :  { %v6366_v42 = vpop.f32.mrf.mxu0  ;;  %7305 = vst [vmem:[#allocation8_spill] sm:$0xff] %v6368_v21  ;;  %v1771_v21 = vadd.f32 %v1770_v54, %v1669_v35 }
 0x361   :  { %v6372_v51 = vpop.f32.mrf.mxu1 }
 0x362   :  { %v6370_v62 = vpop.f32.mrf.mxu0  ;;  %7307 = vst [vmem:[#allocation5_spill] sm:$0xff] %v6372_v51  ;;  %v1769_v51 = vadd.f32 %v1768_v23, %v1667_v60  ;;  %v1873_v60 = vadd.f32 %v1872_v41, %v1771_v21 }
 0x363   :  { %7306 = vst [vmem:[#allocation6_spill] sm:$0xff] %v6370_v62  ;;  %v6376_v31 = vpop.f32.mrf.mxu1  ;;  %v1676_v62 = vadd.f32 %v1675_v34, %v6322_v27  ;;  %v1688_v27 = vadd.f32 %v6334_v53, %v6328_v4 }
 0x364   :  { %7308 = vst [vmem:[#allocation7_spill] sm:$0xff] %v6376_v31  ;;  %v1674_v31 = vadd.f32 %v1673_v52, %v1552_v30  ;;  %v1871_v56 = vadd.f32 %v1870_v58, %v1769_v51  ;;  %v1690_v51 = vadd.f32 %v6336_v12, %v6332_v19  ;;  %v1984_v21 = vadd.f32 %v1983_v9, %v1873_v60 }
 0x365   :  { %v1779_v52 = vadd.f32 %v1778_v3, %v1676_v62  ;;  %v1793_v3 = vadd.f32 %v6342_v61, %v1688_v27 }
 0x366   :  { %v1982_v23 = vadd.f32 %v1981_v7, %v1871_v56  ;;  %v2081_v53 = vadd.f32 %v6352_v6, %v1984_v21 }
 0x367   :  { %v1882_v54 = vadd.f32 %v6338_v38, %v1779_v52  ;;  %v7315_v27 = vld [vmem:[#allocation8_spill] sm:$0xff] }
 0x368   :  { %v2079_v4 = vadd.f32 %v2078_v5, %v1982_v23 }
 0x369   :  { %v1991_v9 = vadd.f32 %v6354_v10, %v1882_v54  ;;  %v7318_v54 = vld [vmem:[#allocation5_spill] sm:$0xff] }
 0x36b   :  { %v2088_v6 = vadd.f32 %v6360_v14, %v1991_v9  ;;  %v7316_v14 = vld [vmem:[#allocation6_spill] sm:$0xff] }
 0x3be   :  { %v2190_v43 = vpop.f32.mrf.mxu0 }
 0x3bf   :  { %v2191_v38 = vadd.f32 %v2190_v43, %v2079_v4 }
 0x3c0   :  { %v2192_v37 = vpop.f32.mrf.mxu0 }
 0x3c1   :  { %v2193_v5 = vadd.f32 %v2192_v37, %v2081_v53  ;;  %v7320_v53 = vld [vmem:[#allocation7_spill] sm:$0xff] }
 0x3c2   :  { %v6374_v40 = vpop.f32.mrf.mxu0 }
 0x3c4   :  { %v6378_v47 = vpop.f32.mrf.mxu0 }
 0x3c5   :  { %v2204_v37 = vadd.f32 %v6378_v47, %v2088_v6 }
 0x3c6   :  { %v6380_v15 = vpop.f32.mrf.mxu0  ;;  %v2305_v48 = vpop.f32.mrf.mxu1 }
 0x3c7   :  { %7309 = vst [vmem:[#allocation63_spill] sm:$0xff] %v6380_v15 }
 0x3c8   :  { %v6382_v50 = vpop.f32.mrf.mxu0  ;;  %v6384_v0 = vpop.f32.mrf.mxu1 }
 0x3c9   :  { %7310 = vst [vmem:[#allocation64_spill] sm:$0xff] %v6382_v50 }
 0x3ca   :  { %v6386_v46 = vpop.f32.mrf.mxu0  ;;  %v6388_v20 = vpop.f32.mrf.mxu1 }
 0x3cb   :  { %7311 = vst [vmem:[#allocation65_spill] sm:$0xff] %v6386_v46  ;;  %7312 = vst [vmem:[#allocation66_spill] sm:$0xff] %v6388_v20  ;;  %v1681_v46 = vadd.f32 %v1680_v45, %v6324_v24 }
 0x3cc   :  { %v6390_v25 = vpop.f32.mrf.mxu0  ;;  %v6392_v59 = vpop.f32.mrf.mxu1 }
 0x3cd   :  { %7313 = vst [vmem:[#allocation67_spill] sm:$0xff] %v6390_v25  ;;  %v1777_v25 = vadd.f32 %v1776_v26, %v1674_v31  ;;  %v1785_v35 = vadd.f32 %v1784_v36, %v1681_v46  ;;  %v1787_v31 = vadd.f32 %v1786_v13, %v1683_v44 }
 0x3ce   :  { %v6394_v39 = vpop.f32.mrf.mxu1  ;;  %v2403_v57 = vpop.f32.mrf.mxu0 }
 0x3cf   :  { %v1880_v45 = vadd.f32 %v1879_v11, %v1777_v25  ;;  %v1889_v62 = vadd.f32 %v6340_v29, %v1785_v35  ;;  %v1891_v7 = vadd.f32 %v6344_v2, %v1787_v31  ;;  %v1795_v11 = vadd.f32 %v6346_v63, %v1690_v51 }
 0x3d0   :  { %v6396_v15 = vpop.f32.mrf.mxu1  ;;  %v2405_v50 = vpop.f32.mrf.mxu0  ;;  %v1898_v29 = vadd.f32 %v6348_v18, %v1793_v3  ;;  %v2306_v2 = vadd.f32 %v2305_v48, %v2191_v38  ;;  %v2308_v18 = vadd.f32 %v6384_v0, %v2193_v5  ;;  %v7319_v21 = vld [vmem:[#allocation64_spill] sm:$0xff] }
 0x3d1   :  { %v1989_v25 = vadd.f32 %v1988_v16, %v1880_v45  ;;  %v1996_v61 = vadd.f32 %v6358_v49, %v1889_v62  ;;  %v1900_v63 = vadd.f32 %v6350_v32, %v1795_v11  ;;  %v1998_v26 = vadd.f32 %v6362_v33, %v1891_v7 }
 0x3d2   :  { %v6400_v20 = vpop.f32.mrf.mxu1  ;;  %v2411_v8 = vpop.f32.mrf.mxu0  ;;  %v2404_v10 = vadd.f32 %v2403_v57, %v2306_v2  ;;  %v2003_v44 = vadd.f32 %v6366_v42, %v1898_v29  ;;  %v7314_v48 = vld [vmem:[#allocation66_spill] sm:$0xff]  ;;  %v2406_v60 = vadd.f32 %v2405_v50, %v2308_v18  ;;  %v2315_v57 = vadd.f32 %v6392_v59, %v2204_v37  ;;  %v7321_v59 = vld [vmem:[#allocation65_spill] sm:$0xff] }
 0x3d3   :  { %v2086_v16 = vadd.f32 %v6356_v17, %v1989_v25  ;;  %v2093_v49 = vadd.f32 %v6364_v28, %v1996_v61  ;;  %v2095_v35 = vadd.f32 %v7315_v27, %v1998_v26  ;;  %v2005_v45 = vadd.f32 %v7316_v14, %v1900_v63 }
 0x3d4   :  { %v6404_v22 = vpop.f32.mrf.mxu1  ;;  %v6406_v30 = vpop.f32.mrf.mxu0  ;;  %v2100_v47 = vadd.f32 %v7318_v54, %v2003_v44  ;;  %v7322_v5 = vld [vmem:[#allocation67_spill] sm:$0xff] }
 0x3d5   :  { %v2202_v43 = vadd.f32 %v6374_v40, %v2086_v16  ;;  %v7317_v40 = vld [vmem:[#allocation63_spill] sm:$0xff]  ;;  %v2215_v62 = vadd.f32 %v7319_v21, %v2095_v35  ;;  %v2414_v3 = vadd.f32 %v6406_v30, %v2315_v57  ;;  %v2102_v9 = vadd.f32 %v7320_v53, %v2005_v45 }
 0x3d6   :  { %v6410_v34 = vpop.f32.mrf.mxu0  ;;  %v2503_v24 = vpop.f32.mrf.mxu1  ;;  %v2213_v23 = vadd.f32 %v7317_v40, %v2093_v49 }
 0x3d7   :  { %v2313_v32 = vadd.f32 %v7314_v48, %v2202_v43  ;;  %v2504_v33 = vadd.f32 %v2503_v24, %v2404_v10  ;;  %v2226_v30 = vadd.f32 %v7322_v5, %v2102_v9  ;;  %v7324_v9 = vld [vmem:[#allocation10_spill] sm:$0xff] }
 0x3d8   :  { %v6414_v55 = vpop.f32.mrf.mxu0  ;;  %v2505_v1 = vpop.f32.mrf.mxu1  ;;  %v2320_v50 = vadd.f32 %v6394_v39, %v2213_v23 }
 0x3d9   :  { %v2412_v28 = vadd.f32 %v2411_v8, %v2313_v32  ;;  %v2506_v51 = vadd.f32 %v2505_v1, %v2406_v60  ;;  %v2224_v8 = vadd.f32 %v7321_v59, %v2100_v47  ;;  %v2322_v1 = vadd.f32 %v6396_v15, %v2215_v62 }
 0x3da   :  { %v6419_v46 = vpop.f32.mrf.mxu0  ;;  %v2512_v36 = vpop.f32.mrf.mxu1  ;;  %v2420_v29 = vadd.f32 %v6410_v34, %v2320_v50  ;;  %v2329_v43 = vadd.f32 %v6404_v22, %v2226_v30 }
 0x3db   :  { %v2513_v4 = vadd.f32 %v2512_v36, %v2412_v28  ;;  %v2327_v36 = vadd.f32 %v6400_v20, %v2224_v8  ;;  %v2422_v63 = vadd.f32 %v6414_v55, %v2322_v1 }
 0x3dc   :  { %v6423_v13 = vpop.f32.mrf.mxu0  ;;  %v2514_v19 = vpop.f32.mrf.mxu1 }
 0x3dd   :  { %v2515_v61 = vadd.f32 %v2514_v19, %v2414_v3  ;;  %v2428_v19 = vadd.f32 %v6419_v46, %v2327_v36  ;;  %v2430_v20 = vadd.f32 %v6423_v13, %v2329_v43 }
 0x3de   :  { %v2521_v12 = vpop.f32.mrf.mxu1  ;;  %v2608_v58 = vpop.f32.mrf.mxu0 }
 0x3df   :  { %v2609_v42 = vadd.f32 %v2608_v58, %v2504_v33  ;;  %v2522_v26 = vadd.f32 %v2521_v12, %v2420_v29 }
 0x3e0   :  { %v2523_v41 = vpop.f32.mrf.mxu1  ;;  %v2610_v56 = vpop.f32.mrf.mxu0 }
 0x3e1   :  { %v2611_v25 = vadd.f32 %v2610_v56, %v2506_v51  ;;  %v2524_v18 = vadd.f32 %v2523_v41, %v2422_v63 }
 0x3e2   :  { %v2530_v17 = vpop.f32.mrf.mxu1 }
 0x3e3   :  { %v2615_v52 = vpop.f32.mrf.mxu0  ;;  %v2531_v48 = vadd.f32 %v2530_v17, %v2428_v19 }
 0x3e4   :  { %v2532_v0 = vpop.f32.mrf.mxu1  ;;  %v2616_v58 = vadd.f32 %v2615_v52, %v2513_v4 }
 0x3e5   :  { %v2617_v31 = vpop.f32.mrf.mxu0  ;;  %v2533_v33 = vadd.f32 %v2532_v0, %v2430_v20 }
 0x3e6   :  { %v2703_v24 = vpop.f32.mrf.mxu1  ;;  %v2618_v56 = vadd.f32 %v2617_v31, %v2515_v61 }
 0x3e7   :  { %v2622_v7 = vpop.f32.mrf.mxu0  ;;  %v2704_v11 = vadd.f32 %v2703_v24, %v2609_v42 }
 0x3e8   :  { %v2705_v38 = vpop.f32.mrf.mxu1  ;;  %v2623_v10 = vadd.f32 %v2622_v7, %v2522_v26  ;;  %v7323_v7 = vld [vmem:[#allocation9_spill] sm:$0xff] }
 0x3e9   :  { %2729 = vst [vmem:[#allocation2] sm:$0xff] %v2704_v11  ;;  %v2624_v39 = vpop.f32.mrf.mxu0  ;;  %v2706_v16 = vadd.f32 %v2705_v38, %v2611_v25 }
 0x3ea   :  { %v2710_v2 = vpop.f32.mrf.mxu1  ;;  %v2625_v55 = vadd.f32 %v2624_v39, %v2524_v18  ;;  %v7325_v39 = vld [vmem:[#allocation11_spill] sm:$0xff] }
 0x3eb   :  { %2730 = vst [vmem:[#allocation2 + $0x8] sm:$0xff] %v2706_v16  ;;  %v2629_v6 = vpop.f32.mrf.mxu0  ;;  %v2711_v15 = vadd.f32 %v2710_v2, %v2616_v58 }
 0x3ec   :  { %v2712_v34 = vpop.f32.mrf.mxu1  ;;  %v2630_v52 = vadd.f32 %v2629_v6, %v2531_v48 }
 0x3ed   :  { %2731 = vst [vmem:[#allocation2 + $0x10] sm:$0xff] %v2711_v15  ;;  %v2631_v49 = vpop.f32.mrf.mxu0  ;;  %v2713_v44 = vadd.f32 %v2712_v34, %v2618_v56 }
 0x3ee   :  { %v2717_v37 = vpop.f32.mrf.mxu1  ;;  %v2632_v41 = vadd.f32 %v2631_v49, %v2533_v33 }
 0x3ef   :  { %2732 = vst [vmem:[#allocation2 + $0x18] sm:$0xff] %v2713_v44  ;;  %v2718_v12 = vadd.f32 %v2717_v37, %v2623_v10  ;;  %v2829_v32 = vpop.f32.mrf.mxu0 }
 0x3f0   :  { %v2719_v60 = vpop.f32.mrf.mxu1 }
 0x3f1   :  { %2733 = vst [vmem:[#allocation2 + $0x20] sm:$0xff] %v2718_v12  ;;  %v2720_v22 = vadd.f32 %v2719_v60, %v2625_v55  ;;  %v2831_v27 = vpop.f32.mrf.mxu0 }
 0x3f2   :  { %v2724_v46 = vpop.f32.mrf.mxu1 }
 0x3f3   :  { %2734 = vst [vmem:[#allocation2 + $0x28] sm:$0xff] %v2720_v22  ;;  %v2725_v35 = vadd.f32 %v2724_v46, %v2630_v52  ;;  %v3002_v14 = vpop.f32.mrf.mxu0 }
 0x3f4   :  { %v2726_v45 = vpop.f32.mrf.mxu1 }
 0x3f5   :  { %2735 = vst [vmem:[#allocation2 + $0x30] sm:$0xff] %v2725_v35  ;;  %v2727_v40 = vadd.f32 %v2726_v45, %v2632_v41  ;;  %v3004_v17 = vpop.f32.mrf.mxu0 }
 0x3f6   :  { %v2921_v13 = vpop.f32.mrf.mxu1 }
 0x3f7   :  { %2736 = vst [vmem:[#allocation2 + $0x38] sm:$0xff] %v2727_v40  ;;  %v2922_v23 = vadd.f32 %v2921_v13, %v2829_v32 }
 0x3f8   :  { %v2923_v57 = vpop.f32.mrf.mxu1  ;;  %v3164_v42 = vpop.f32.mrf.mxu0 }
 0x3f9   :  { %v3003_v28 = vadd.f32 %v3002_v14, %v2922_v23  ;;  %v2924_v51 = vadd.f32 %v2923_v57, %v2831_v27 }
 0x3fa   :  { %v3080_v0 = vpop.f32.mrf.mxu1  ;;  %v3166_v50 = vpop.f32.mrf.mxu0 }
 0x3fb   :  { %v3005_v31 = vadd.f32 %v3004_v17, %v2924_v51  ;;  %v3081_v54 = vadd.f32 %v3080_v0, %v3003_v28 }
 0x3fc   :  { %v3082_v47 = vpop.f32.mrf.mxu1 }
 0x3fd   :  { %v3165_v21 = vadd.f32 %v3164_v42, %v3081_v54  ;;  %v3083_v62 = vadd.f32 %v3082_v47, %v3005_v31 }
 0x3fe   :  { %v3240_v24 = vpop.f32.mrf.mxu1 }
 0x3ff   :  { %v3167_v3 = vadd.f32 %v3166_v50, %v3083_v62  ;;  %v3241_v4 = vadd.f32 %v3240_v24, %v3165_v21 }
 0x400   :  { %v3242_v25 = vpop.f32.mrf.mxu1 }
 0x401   :  { %v3245_v11 = vmul.f32 %v3241_v4, %v7323_v7  ;;  %v3243_v53 = vadd.f32 %v3242_v25, %v3167_v3 }
 0x403   :  { %v3247_v59 = vadd.f32 %v3245_v11, %v7324_v9  ;;  %v3246_v8 = vmul.f32 %v3243_v53, %v7323_v7 }
 0x405   :  { %v6460_v1 = vmax.f32 %v3247_v59, 0.0  ;;  %v3248_v38 = vadd.f32 %v3246_v8, %v7324_v9 }
 0x407   :  { %v3250_v29 = vmax.f32 %v3248_v38, 0.0  ;;  %3307 = vrot.lane.b32.xlu0 %v6460_v1, %s5323_s0  ;;  %v6525_v33 = vand.u32 4294901760, %v6460_v1 }
 0x409   :  { %3309 = vrot.lane.b32.xlu1 %v3250_v29, %s5323_s0  ;;  %v6522_v60 = vand.u32 4294901760, %v3250_v29  ;;  %v6560_v47 = vsub.f32 %v6460_v1, %v6525_v33  ;;  %s5270_s0 = sshll.u32 %s5331_s9, 4  ;;  %s5271_s0 = int_to_ptr.vmem [resolvable:$true] %s5270_s0 }
 0x40a   :  { %p5304_p1 = scmp.lt.s32.totalorder %s5271_s0, %s5271_s0 }
 0x40b   :  { %3299 = vrot.lane.b32.xlu0 %v6460_v1, %s5324_s16  ;;  %v6556_v54 = vsub.f32 %v3250_v29, %v6522_v60 }
 0x40d   :  { %3301 = vrot.lane.b32.xlu1 %v3250_v29, %s5324_s16  ;;  %s5299_s16 = scalar_lea.vmem %s5271_s0, 2048 }
 0x40e   :  { %p5300_p0 = scmp.ne.s32.totalorder %s5271_s0, %s5299_s16  ;;  %p5305_p2 = scmp.lt.s32.totalorder %s5299_s16, %s5299_s16 }
 0x40f   :  { %3291 = vrot.lane.b32.xlu0 %v6460_v1, %s5325_s17 }
 0x410   :  { %p5306_p3 = por %p5305_p2, %p5304_p1 }
 0x411   :  { %3293 = vrot.lane.b32.xlu1 %v3250_v29, %s5325_s17 }
 0x412   :  { %p5307_p4 = pnand %p5306_p3, %p5300_p0 }
 0x413   :  { %3283 = vrot.lane.b32.xlu0 %v6460_v1, %s5326_s18 }
 0x415   :  { %3285 = vrot.lane.b32.xlu1 %v3250_v29, %s5326_s18 }
 0x417   :  { %3275 = vrot.lane.b32.xlu0 %v6460_v1, %s5327_s19 }
 0x419   :  { %3277 = vrot.lane.b32.xlu1 %v3250_v29, %s5327_s19 }
 0x41b   :  { %3267 = vrot.lane.b32.xlu0 %v6460_v1, %s5328_s2 }
 0x41d   :  { %3269 = vrot.lane.b32.xlu1 %v3250_v29, %s5328_s2 }
 0x41f   :  { %3259 = vrot.lane.b32.xlu0 %v6460_v1, %s5329_s1 }
 0x421   :  { %3261 = vrot.lane.b32.xlu1 %v3250_v29, %s5329_s1 }
 0x423   :  { %3251 = vrot.lane.b32.xlu0 %v6460_v1, %s5330_s5 }
 0x425   :  { %3253 = vrot.lane.b32.xlu1 %v3250_v29, %s5330_s5 }
 0x479   :  { %v3308_v61 = vpop.permute.xlu0 %3307 }
 0x47b   :  { %v3310_v58 = vpop.permute.xlu1 %3309 }
 0x47c   :  { %v3311_v16 = vsel %vm724_vm3, %v3308_v61, %v3310_v58  ;;  %v3312_v5 = vsel %vm724_vm3, %v3310_v58, %v3308_v61  ;;  %v3473_v61 = vand.u32 4294901760, %v6556_v54  ;;  %v3479_v58 = vand.u32 4294901760, %v6560_v47 }
 0x47d   :  { %v3313_v36 = vsel %vm5566_vm4, %v3311_v16, 0.0  ;;  %v3314_v63 = vsel %vm5574_vm5, %v3312_v5, 0.0  ;;  %v3300_v26 = vpop.permute.xlu0 %3299 }
 0x47e   :  { %v6495_v56 = vand.u32 4294901760, %v3314_v63  ;;  %v6497_v6 = vand.u32 4294901760, %v3313_v36  ;;  %v3474_v35 = vsub.f32 %v6556_v54, %v3473_v61 }
 0x47f   :  { %v3302_v15 = vpop.permute.xlu1 %3301 }
 0x480   :  { %v6500_v43 = vsub.f32 %v3314_v63, %v6495_v56  ;;  %v6503_v34 = vsub.f32 %v3313_v36, %v6497_v6  ;;  %v3303_v19 = vsel %vm715_vm6, %v3300_v26, %v3302_v15  ;;  %v3304_v18 = vsel %vm715_vm6, %v3302_v15, %v3300_v26  ;;  %3330 = vmatprep.subr.mxu0 %v6495_v56 }
 0x481   :  { %v3306_v49 = vsel %vm105_vm2, %v3304_v18, 0.0  ;;  %v6512_v44 = vand.u32 4294901760, %v3303_v19  ;;  %v3292_v37 = vpop.permute.xlu0 %3291  ;;  %3332 = vmatpush1.msra.mxu0 %v6497_v6  ;;  %vm7332_vm2 = vcmp.lt.s32.totalorder %v7325_v39, 1 }
 0x482   :  { %v3431_v20 = vand.u32 4294901760, %v6503_v34  ;;  %v6516_v48 = vand.u32 4294901760, %v3306_v49  ;;  %v3425_v55 = vand.u32 4294901760, %v6500_v43  ;;  %vm7333_vm3 = vmmov %vm7332_vm2 }
 0x483   :  { %v6520_v12 = vsub.f32 %v3303_v19, %v6512_v44  ;;  %v3294_v32 = vpop.permute.xlu1 %3293 }
 0x484   :  { %v6528_v52 = vsub.f32 %v3306_v49, %v6516_v48  ;;  %v3295_v22 = vsel %vm706_vm8, %v3292_v37, %v3294_v32  ;;  %v3296_v27 = vsel %vm706_vm8, %v3294_v32, %v3292_v37  ;;  %3334 = vmatprep.subr.mxu0 %v6516_v48  ;;  %v3426_v46 = vsub.f32 %v6500_v43, %v3425_v55 }
 0x485   :  { %v3443_v41 = vand.u32 4294901760, %v6520_v12  ;;  %v3297_v14 = vsel %vm5620_vm9, %v3295_v22, 0.0  ;;  %v3298_v40 = vsel %vm5632_vm11, %v3296_v27, 0.0  ;;  %v3284_v13 = vpop.permute.xlu0 %3283  ;;  %3336 = vmatpush1.msra.mxu0 %v6512_v44  ;;  %v3432_v17 = vsub.f32 %v6503_v34, %v3431_v20 }
 0x486   :  { %v6547_v23 = vand.u32 4294901760, %v3298_v40  ;;  %v6549_v57 = vand.u32 4294901760, %v3297_v14  ;;  %v3427_v28 = vand.u32 4294901760, %v3426_v46  ;;  %v3437_v51 = vand.u32 4294901760, %v6528_v52 }
 0x487   :  { %v3444_v0 = vsub.f32 %v6520_v12, %v3443_v41  ;;  %v3286_v42 = vpop.permute.xlu1 %3285  ;;  %v3433_v31 = vand.u32 4294901760, %v3432_v17 }
 0x488   :  { %v6563_v21 = vsub.f32 %v3298_v40, %v6547_v23  ;;  %v6566_v62 = vsub.f32 %v3297_v14, %v6549_v57  ;;  %v3287_v50 = vsel %vm697_vm10, %v3284_v13, %v3286_v42  ;;  %v3288_v24 = vsel %vm697_vm10, %v3286_v42, %v3284_v13  ;;  %3338 = vmatprep.subr.mxu0 %v6547_v23 }
 0x489   :  { %v3289_v3 = vsel %vm5566_vm4, %v3287_v50, 0.0  ;;  %v3290_v25 = vsel %vm5556_vm1, %v3288_v24, 0.0  ;;  %3428 = vmatprep.subr.mxu1 %v3427_v28  ;;  %v3276_v7 = vpop.permute.xlu0 %3275  ;;  %3340 = vmatpush1.msra.mxu0 %v6549_v57  ;;  %v3438_v11 = vsub.f32 %v6528_v52, %v3437_v51  ;;  %v3445_v29 = vand.u32 4294901760, %v3444_v0 }
 0x48a   :  { %v3455_v53 = vand.u32 4294901760, %v6566_v62  ;;  %v6582_v9 = vand.u32 4294901760, %v3290_v25  ;;  %v6584_v59 = vand.u32 4294901760, %v3289_v3  ;;  %3434 = vmatpush1.msra.mxu1 %v3433_v31  ;;  %v3449_v8 = vand.u32 4294901760, %v6563_v21 }
 0x48b   :  { %v3278_v1 = vpop.permute.xlu1 %3277  ;;  %v3439_v38 = vand.u32 4294901760, %v3438_v11  ;;  %v3480_v14 = vsub.f32 %v6560_v47, %v3479_v58  ;;  %vm7335_vm4 = vcmp.lt.s32.totalorder %v7325_v39, 15 }
 0x48c   :  { %v6590_v16 = vsub.f32 %v3290_v25, %v6582_v9  ;;  %v6593_v5 = vsub.f32 %v3289_v3, %v6584_v59  ;;  %v3279_v30 = vsel %vm7332_vm2, %v3276_v7, %v3278_v1  ;;  %v3280_v36 = vsel %vm7333_vm3, %v3278_v1, %v3276_v7  ;;  %3342 = vmatprep.subr.mxu0 %v6582_v9  ;;  %vm7336_vm5 = vmmov %vm7335_vm4 }
 0x48d   :  { %v3281_v2 = vsel %vm5620_vm9, %v3280_v36, 0.0  ;;  %v3282_v26 = vsel %vm5597_vm7, %v3279_v30, 0.0  ;;  %3440 = vmatprep.subr.mxu1 %v3439_v38  ;;  %v3268_v15 = vpop.permute.xlu0 %3267  ;;  %3344 = vmatpush1.msra.mxu0 %v6584_v59  ;;  %v3450_v19 = vsub.f32 %v6563_v21, %v3449_v8  ;;  %v3456_v18 = vsub.f32 %v6566_v62, %v3455_v53 }
 0x48e   :  { %v3467_v10 = vand.u32 4294901760, %v6593_v5  ;;  %v6612_v49 = vand.u32 4294901760, %v3282_v26  ;;  %v6614_v37 = vand.u32 4294901760, %v3281_v2  ;;  %3446 = vmatpush1.msra.mxu1 %v3445_v29  ;;  %3346 = vmatprep.subr.mxu0 %v6522_v60  ;;  %v3461_v32 = vand.u32 4294901760, %v6590_v16 }
 0x48f   :  { %v3270_v22 = vpop.permute.xlu1 %3269  ;;  %3348 = vmatpush1.msra.mxu0 %v6525_v33  ;;  %v3451_v27 = vand.u32 4294901760, %v3450_v19  ;;  %v3457_v46 = vand.u32 4294901760, %v3456_v18  ;;  %v3475_v29 = vand.u32 4294901760, %v3474_v35  ;;  %v3481_v35 = vand.u32 4294901760, %v3480_v14 }
 0x490   :  { %v6626_v45 = vsub.f32 %v3282_v26, %v6612_v49  ;;  %v6629_v40 = vsub.f32 %v3281_v2, %v6614_v37  ;;  %v3271_v13 = vsel %vm7335_vm4, %v3268_v15, %v3270_v22  ;;  %v3272_v17 = vsel %vm7336_vm5, %v3270_v22, %v3268_v15  ;;  %3350 = vmatprep.subr.mxu0 %v6612_v49 }
 0x491   :  { %v3273_v0 = vsel %vm5745_vm13, %v3272_v17, 0.0  ;;  %v3274_v42 = vsel %vm5556_vm1, %v3271_v13, 0.0  ;;  %3452 = vmatprep.subr.mxu1 %v3451_v27  ;;  %v3260_v31 = vpop.permute.xlu0 %3259  ;;  %3352 = vmatpush1.msra.mxu0 %v6614_v37  ;;  %v3462_v50 = vsub.f32 %v6590_v16, %v3461_v32  ;;  %v3468_v24 = vsub.f32 %v6593_v5, %v3467_v10 }
 0x492   :  { %v3491_v3 = vand.u32 4294901760, %v6629_v40  ;;  %v6648_v25 = vand.u32 4294901760, %v3274_v42  ;;  %v6650_v7 = vand.u32 4294901760, %v3273_v0  ;;  %3458 = vmatpush1.msra.mxu1 %v3457_v46  ;;  %v3485_v4 = vand.u32 4294901760, %v6626_v45 }
 0x493   :  { %v3262_v11 = vpop.permute.xlu1 %3261  ;;  %v3463_v1 = vand.u32 4294901760, %v3462_v50  ;;  %v3469_v38 = vand.u32 4294901760, %v3468_v24  ;;  %vm7338_vm1 = vcmp.lt.s32.totalorder %v7325_v39, 16 }
 0x494   :  { %v6654_v30 = vsub.f32 %v3274_v42, %v6648_v25  ;;  %v6657_v36 = vsub.f32 %v3273_v0, %v6650_v7  ;;  %v3263_v2 = vsel %vm7338_vm1, %v3260_v31, %v3262_v11  ;;  %vm7339_vm6 = vmmov %vm7338_vm1  ;;  %3354 = vmatprep.subr.mxu0 %v6648_v25  ;;  %v3486_v18 = vsub.f32 %v6626_v45, %v3485_v4 }
 0x495   :  { %v3264_v26 = vsel %vm7339_vm6, %v3262_v11, %v3260_v31  ;;  %v6666_v19 = vand.u32 4294901760, %v3263_v2  ;;  %3464 = vmatprep.subr.mxu1 %v3463_v1  ;;  %3356 = vmatpush1.msra.mxu0 %v6650_v7  ;;  %v3492_v22 = vsub.f32 %v6629_v40, %v3491_v3  ;;  %v3252_v28 = vpop.permute.xlu0 %3251 }
 0x496   :  { %v3265_v15 = vsel %vm94_vm14, %v3264_v26, 0.0  ;;  %v3503_v27 = vand.u32 4294901760, %v6657_v36  ;;  %3470 = vmatpush1.msra.mxu1 %v3469_v38  ;;  %v3497_v13 = vand.u32 4294901760, %v6654_v30  ;;  %v3487_v42 = vand.u32 4294901760, %v3486_v18 }
 0x497   :  { %v6676_v46 = vand.u32 4294901760, %v3265_v15  ;;  %v6680_v17 = vsub.f32 %v3263_v2, %v6666_v19  ;;  %3476 = vmatprep.subr.mxu1 %v3475_v29  ;;  %v3254_v0 = vpop.permute.xlu1 %3253  ;;  %3358 = vmatprep.subr.mxu0 %v6666_v19  ;;  %v3493_v31 = vand.u32 4294901760, %v3492_v22 }
 0x498   :  { %v3255_v24 = vsel %vm661_vm15, %v3252_v28, %v3254_v0  ;;  %v3256_v14 = vsel %vm661_vm15, %v3254_v0, %v3252_v28  ;;  %3482 = vmatpush1.msra.mxu1 %v3481_v35  ;;  %v3498_v29 = vsub.f32 %v6654_v30, %v3497_v13  ;;  %v3504_v2 = vsub.f32 %v6657_v36, %v3503_v27 }
 0x499   :  { %v6684_v50 = vsub.f32 %v3265_v15, %v6676_v46  ;;  %3360 = vmatpush1.msra.mxu0 %v6676_v46  ;;  %v3257_v1 = vsel %vm5816_vm12, %v3256_v14, 0.0  ;;  %v3258_v38 = vsel %vm5597_vm7, %v3255_v24, 0.0  ;;  %3488 = vmatprep.subr.mxu1 %v3487_v42  ;;  %v3509_v18 = vand.u32 4294901760, %v6680_v17 }
 0x49a   :  { %v6702_v26 = vand.u32 4294901760, %v3258_v38  ;;  %v6704_v15 = vand.u32 4294901760, %v3257_v1  ;;  %3494 = vmatpush1.msra.mxu1 %v3493_v31  ;;  %v3499_v63 = vand.u32 4294901760, %v3498_v29  ;;  %v3505_v22 = vand.u32 4294901760, %v3504_v2 }
 0x49b   :  { %v3515_v39 = vand.u32 4294901760, %v6684_v50  ;;  %v3510_v0 = vsub.f32 %v6680_v17, %v3509_v18 }
 0x49c   :  { %v6708_v35 = vsub.f32 %v3258_v38, %v6702_v26  ;;  %v6711_v28 = vsub.f32 %v3257_v1, %v6704_v15  ;;  %3362 = vmatprep.subr.mxu0 %v6702_v26  ;;  %3500 = vmatprep.subr.mxu1 %v3499_v63  ;;  %v7341_v1 = vld [vmem:[#allocation24_spill] sm:$0xff] }
 0x49d   :  { %v3516_v42 = vsub.f32 %v6684_v50, %v3515_v39  ;;  %3364 = vmatpush1.msra.mxu0 %v6704_v15  ;;  %3506 = vmatpush1.msra.mxu1 %v3505_v22  ;;  %v3511_v24 = vand.u32 4294901760, %v3510_v0  ;;  %v7342_v22 = vmov 0.0   ;;  %v7343_v0 = vld [vmem:[#allocation19_spill] sm:$0xff] }
 0x49e   :  { %v3527_v31 = vand.u32 4294901760, %v6711_v28  ;;  %3587 = vmatprep.subr.mxu0 %v6500_v43  ;;  %v3521_v11 = vand.u32 4294901760, %v6708_v35  ;;  %3403 = vmatmul.mubr.f32.vlgmr.msra.gmra.mxu0 %v7341_v1  ;;  %v7345_v43 = vld [vmem:[#allocation26_spill] sm:$0xff] }
 0x49f   :  { %v3517_v14 = vand.u32 4294901760, %v3516_v42  ;;  %3512 = vmatprep.subr.mxu1 %v3511_v24  ;;  %3590 = vmatpush1.msra.mxu0 %v6503_v34  ;;  %v7344_v42 = vld [vmem:[#allocation21_spill] sm:$0xff]  ;;  %v4005_v34 = vmax.f32 %v7345_v43, 0.0 }
 0x4a0   :  { %v3522_v38 = vsub.f32 %v6708_v35, %v3521_v11  ;;  %v3528_v29 = vsub.f32 %v6711_v28, %v3527_v31  ;;  %3593 = vmatprep.subr.mxu0 %v6528_v52  ;;  %3671 = vmatprep.mubr.f32.mxu0 %v7342_v22  ;;  %v7348_v52 = vld [vmem:[#allocation28_spill] sm:$0xff] }
 0x4a1   :  { %3518 = vmatpush1.msra.mxu1 %v3517_v14  ;;  %3596 = vmatpush1.msra.mxu0 %v6520_v12 }
 0x4a2   :  { %v3523_v2 = vand.u32 4294901760, %v3522_v38  ;;  %v3529_v63 = vand.u32 4294901760, %v3528_v29  ;;  %3599 = vmatprep.subr.mxu0 %v6563_v21 }
 0x4a3   :  { %3602 = vmatpush1.msra.mxu0 %v6566_v62 }
 0x4a4   :  { %3524 = vmatprep.subr.mxu1 %v3523_v2  ;;  %3605 = vmatprep.subr.mxu0 %v6590_v16 }
 0x4a5   :  { %3530 = vmatpush1.msra.mxu1 %v3529_v63  ;;  %3608 = vmatpush1.msra.mxu0 %v6593_v5 }
 0x4a6   :  { %3565 = vmatmul.mubr.f32.vlgmr.msra.gmra.mxu1 %v7343_v0  ;;  %3611 = vmatprep.subr.mxu0 %v6556_v54 }
 0x4a7   :  { %3695 = vmatprep.subr.mxu1 %v6495_v56  ;;  %3614 = vmatpush1.msra.mxu0 %v6560_v47 }
 0x4a8   :  { %3697 = vmatpush1.msra.mxu1 %v6497_v6  ;;  %3617 = vmatprep.subr.mxu0 %v6626_v45  ;;  %v7353_v45 = vld [vmem:[#allocation29_spill] sm:$0xff] }
 0x4a9   :  { %3699 = vmatprep.subr.mxu1 %v6516_v48  ;;  %3620 = vmatpush1.msra.mxu0 %v6629_v40  ;;  %v7354_v40 = vld [vmem:[#allocation44_spill] sm:$0xff] }
 0x4aa   :  { %3701 = vmatpush1.msra.mxu1 %v6512_v44  ;;  %3623 = vmatprep.subr.mxu0 %v6654_v30  ;;  %v7359_v30 = vld [vmem:[#allocation37_spill] sm:$0xff] }
 0x4ab   :  { %3703 = vmatprep.subr.mxu1 %v6547_v23  ;;  %3626 = vmatpush1.msra.mxu0 %v6657_v36  ;;  %v7360_v36 = vld [vmem:[#allocation36_spill] sm:$0xff] }
 0x4ac   :  { %3705 = vmatpush1.msra.mxu1 %v6549_v57  ;;  %3629 = vmatprep.subr.mxu0 %v6680_v17  ;;  %v7365_v17 = vld [vmem:[#allocation42_spill] sm:$0xff] }
 0x4ad   :  { %3707 = vmatprep.subr.mxu1 %v6582_v9  ;;  %3632 = vmatpush1.msra.mxu0 %v6684_v50 }
 0x4ae   :  { %3709 = vmatpush1.msra.mxu1 %v6584_v59  ;;  %3635 = vmatprep.subr.mxu0 %v6708_v35 }
 0x4af   :  { %3711 = vmatprep.subr.mxu1 %v6522_v60  ;;  %3638 = vmatpush1.msra.mxu0 %v6711_v28 }
 0x4b0   :  { %3713 = vmatpush1.msra.mxu1 %v6525_v33  ;;  %3674 = vmatmul.mubr.f32.vlgmr.msra.gmra.mxu0 %v7344_v42 }
 0x4b1   :  { %3715 = vmatprep.subr.mxu1 %v6612_v49  ;;  %3789 = vmatprep.subr.mxu0 %v3425_v55  ;;  %v7347_v55 = vld [vmem:[#allocation25_spill] sm:$0xff] }
 0x4b2   :  { %3717 = vmatpush1.msra.mxu1 %v6614_v37  ;;  %3793 = vmatpush1.msra.mxu0 %v3431_v20  ;;  %v7346_v20 = vld [vmem:[#allocation22_spill] sm:$0xff]  ;;  %v4004_v12 = vmax.f32 %v7347_v55, 0.0  ;;  %v7366_v55 = vld [vmem:[#allocation48_spill] sm:$0xff] }
 0x4b3   :  { %3719 = vmatprep.subr.mxu1 %v6648_v25  ;;  %3797 = vmatprep.subr.mxu0 %v3437_v51  ;;  %v7349_v51 = vld [vmem:[#allocation27_spill] sm:$0xff] }
 0x4b4   :  { %3721 = vmatpush1.msra.mxu1 %v6650_v7  ;;  %3801 = vmatpush1.msra.mxu0 %v3443_v41  ;;  %v4003_v41 = vmax.f32 %v7348_v52, 0.0  ;;  %v4002_v21 = vmax.f32 %v7349_v51, 0.0 }
 0x4b5   :  { %3723 = vmatprep.subr.mxu1 %v6666_v19  ;;  %3805 = vmatprep.subr.mxu0 %v3449_v8 }
 0x4b6   :  { %3725 = vmatpush1.msra.mxu1 %v6676_v46  ;;  %3809 = vmatpush1.msra.mxu0 %v3455_v53 }
 0x4b7   :  { %3727 = vmatprep.subr.mxu1 %v6702_v26  ;;  %3813 = vmatprep.subr.mxu0 %v3461_v32  ;;  %v7352_v32 = vld [vmem:[#allocation43_spill] sm:$0xff] }
 0x4b8   :  { %3729 = vmatpush1.msra.mxu1 %v6704_v15  ;;  %3762 = vmatprep.mubr.f32.mxu1 %v7342_v22 }
 0x4b9   :  { %3817 = vmatpush1.msra.mxu0 %v3467_v10  ;;  %3766 = vmatmul.mubr.f32.vlgmr.msra.gmra.mxu1 %v7346_v20  ;;  %v7351_v10 = vld [vmem:[#allocation41_spill] sm:$0xff] }
 0x4ba   :  { %3821 = vmatprep.subr.mxu0 %v3473_v61  ;;  %3913 = vmatprep.subr.mxu1 %v6495_v56  ;;  %v6805_v56 = vand.u32 4294901760, %v4005_v34 }
 0x4bb   :  { %3825 = vmatpush1.msra.mxu0 %v3479_v58  ;;  %3915 = vmatpush1.msra.mxu1 %v6497_v6  ;;  %v6810_v6 = vand.u32 4294901760, %v4004_v12 }
 0x4bc   :  { %3829 = vmatprep.subr.mxu0 %v3485_v4  ;;  %3917 = vmatprep.subr.mxu1 %v6516_v48  ;;  %v6815_v48 = vand.u32 4294901760, %v4003_v41  ;;  %v7358_v4 = vld [vmem:[#allocation33_spill] sm:$0xff] }
 0x4bd   :  { %3833 = vmatpush1.msra.mxu0 %v3491_v3  ;;  %3919 = vmatpush1.msra.mxu1 %v6512_v44  ;;  %v6820_v44 = vand.u32 4294901760, %v4002_v21  ;;  %v7355_v3 = vld [vmem:[#allocation31_spill] sm:$0xff] }
 0x4be   :  { %3837 = vmatprep.subr.mxu0 %v3497_v13  ;;  %3921 = vmatprep.subr.mxu1 %v6547_v23  ;;  %v4148_v23 = vsub.f32 %v4005_v34, %v6805_v56  ;;  %v4160_v54 = vsub.f32 %v4003_v41, %v6815_v48  ;;  %v7364_v13 = vld [vmem:[#allocation39_spill] sm:$0xff]  ;;  %v7367_v41 = vld [vmem:[#allocation52_spill] sm:$0xff] }
 0x4bf   :  { %3841 = vmatpush1.msra.mxu0 %v3503_v27  ;;  %3923 = vmatpush1.msra.mxu1 %v6549_v57  ;;  %v4154_v57 = vsub.f32 %v4004_v12, %v6810_v6  ;;  %v4166_v47 = vsub.f32 %v4002_v21, %v6820_v44  ;;  %v7362_v27 = vld [vmem:[#allocation40_spill] sm:$0xff] }
 0x4c0   :  { %3845 = vmatprep.subr.mxu0 %v3509_v18  ;;  %3925 = vmatprep.subr.mxu1 %v6582_v9  ;;  %v7350_v9 = vld [vmem:[#allocation38_spill] sm:$0xff] }
 0x4c1   :  { %3849 = vmatpush1.msra.mxu0 %v3515_v39  ;;  %3927 = vmatpush1.msra.mxu1 %v6584_v59  ;;  %v4155_v62 = vand.u32 4294901760, %v4154_v57  ;;  %v4167_v53 = vand.u32 4294901760, %v4166_v47 }
 0x4c2   :  { %3853 = vmatprep.subr.mxu0 %v3521_v11  ;;  %3929 = vmatprep.subr.mxu1 %v6522_v60  ;;  %v4149_v60 = vand.u32 4294901760, %v4148_v23 }
 0x4c3   :  { %3857 = vmatpush1.msra.mxu0 %v3527_v31  ;;  %3890 = vmatprep.mubr.f32.mxu0 %v7342_v22  ;;  %v4156_v8 = vsub.f32 %v4154_v57, %v4155_v62  ;;  %v4168_v58 = vsub.f32 %v4166_v47, %v4167_v53 }
 0x4c4   :  { %3931 = vmatpush1.msra.mxu1 %v6525_v33  ;;  %3892 = vmatmul.mubr.f32.vlgmr.msra.gmra.mxu0 %v7343_v0  ;;  %v4161_v33 = vand.u32 4294901760, %v4160_v54  ;;  %v4150_v59 = vsub.f32 %v4148_v23, %v4149_v60 }
 0x4c5   :  { %3933 = vmatprep.subr.mxu1 %v6612_v49  ;;  %4035 = vmatprep.subr.mxu0 %v6805_v56  ;;  %v4157_v5 = vand.u32 4294901760, %v4156_v8 }
 0x4c6   :  { %3935 = vmatpush1.msra.mxu1 %v6614_v37  ;;  %4037 = vmatpush1.msra.mxu0 %v6810_v6  ;;  %v4162_v61 = vsub.f32 %v4160_v54, %v4161_v33  ;;  %v4151_v16 = vand.u32 4294901760, %v4150_v59  ;;  %v4169_v37 = vand.u32 4294901760, %v4168_v58  ;;  %v7371_v58 = vld [vmem:[#allocation45_spill] sm:$0xff] }
 0x4c7   :  { %3937 = vmatprep.subr.mxu1 %v6648_v25  ;;  %4039 = vmatprep.subr.mxu0 %v6815_v48  ;;  %v7356_v25 = vld [vmem:[#allocation30_spill] sm:$0xff] }
 0x4c8   :  { %3939 = vmatpush1.msra.mxu1 %v6650_v7  ;;  %4041 = vmatpush1.msra.mxu0 %v6820_v44  ;;  %v4163_v49 = vand.u32 4294901760, %v4162_v61  ;;  %v7357_v7 = vld [vmem:[#allocation34_spill] sm:$0xff]  ;;  %v7370_v61 = vld [vmem:[#allocation61_spill] sm:$0xff] }
 0x4c9   :  { %4074 = vmatprep.mubr.f32.mxu0 %v7342_v22  ;;  %3941 = vmatprep.subr.mxu1 %v6666_v19  ;;  %v7361_v19 = vld [vmem:[#allocation32_spill] sm:$0xff] }
 0x4ca   :  { %4080 = vmatmul.mubr.f32.vlgmr.msra.gmra.mxu0 %v7350_v9  ;;  %4262 = vmatprep.subr.mxu0 %v4148_v23  ;;  %v7369_v9 = vld [vmem:[#allocation59_spill] sm:$0xff] }
 0x4cb   :  { %3943 = vmatpush1.msra.mxu1 %v6676_v46  ;;  %4265 = vmatpush1.msra.mxu0 %v4154_v57  ;;  %v7363_v46 = vld [vmem:[#allocation35_spill] sm:$0xff] }
 0x4cc   :  { %3945 = vmatprep.subr.mxu1 %v6702_v26  ;;  %4268 = vmatprep.subr.mxu0 %v4160_v54 }
 0x4cd   :  { %3947 = vmatpush1.msra.mxu1 %v6704_v15  ;;  %3980 = vmatprep.mubr.f32.mxu1 %v7342_v22 }
 0x4ce   :  { %4085 = vmatprep.mubr.f32.mxu0 %v7342_v22  ;;  %4271 = vmatpush1.msra.mxu0 %v4166_v47 }
 0x4cf   :  { %3982 = vmatmul.mubr.f32.vlgmr.msra.gmra.mxu1 %v7343_v0  ;;  %4091 = vmatmul.mubr.f32.gmra.mxu0 %v7351_v10  ;;  %v7374_v10 = vld [vmem:[#allocation51_spill] sm:$0xff] }
 0x4d0   :  { %4152 = vmatprep.subr.mxu1 %v4151_v16  ;;  %4473 = vmatprep.subr.mxu0 %v4149_v60  ;;  %v7368_v60 = vld [vmem:[#allocation56_spill] sm:$0xff]  ;;  %v7372_v16 = vld [vmem:[#allocation62_spill] sm:$0xff] }
 0x4d1   :  { %4158 = vmatpush1.msra.mxu1 %v4157_v5  ;;  %4096 = vmatprep.mubr.f32.mxu0 %v7342_v22  ;;  %v7373_v5 = vld [vmem:[#allocation47_spill] sm:$0xff] }
 0x4d2   :  { %4164 = vmatprep.subr.mxu1 %v4163_v49  ;;  %4203 = vmatprep.mubr.f32.mxu1 %v7342_v22  ;;  %v7375_v49 = vld [vmem:[#allocation46_spill] sm:$0xff] }
 0x4d3   :  { %4170 = vmatpush1.msra.mxu1 %v4169_v37  ;;  %4102 = vmatmul.mubr.f32.gmra.mxu0 %v7352_v32  ;;  %v7376_v37 = vld [vmem:[#allocation55_spill] sm:$0xff]  ;;  %v7377_v32 = vld [vmem:[#allocation50_spill] sm:$0xff] }
 0x4d4   :  { %4205 = vmatmul.mubr.f32.vlgmr.msra.gmra.mxu1 %v7353_v45  ;;  %4366 = vmatprep.subr.mxu1 %v6805_v56 }
 0x4d5   :  { %4107 = vmatprep.mubr.f32.mxu0 %v7342_v22  ;;  %4368 = vmatpush1.msra.mxu1 %v6810_v6 }
 0x4d6   :  { %4210 = vmatprep.mubr.f32.mxu1 %v7342_v22  ;;  %4370 = vmatprep.subr.mxu1 %v6815_v48 }
 0x4d7   :  { %4372 = vmatpush1.msra.mxu1 %v6820_v44  ;;  %4113 = vmatmul.mubr.f32.gmra.mxu0 %v7354_v40  ;;  %v7379_v40 = vld [vmem:[#allocation49_spill] sm:$0xff] }
 0x4d8   :  { %4212 = vmatmul.mubr.f32.gmra.mxu1 %v7355_v3  ;;  %4576 = vmatprep.subr.mxu1 %v6805_v56 }
 0x4d9   :  { %4217 = vmatprep.mubr.f32.mxu1 %v7342_v22  ;;  %4304 = vmatprep.mubr.f32.mxu0 %v7342_v22 }
 0x4db   :  { %4307 = vmatmul.mubr.f32.vlgmr.msra.gmra.mxu0 %v7356_v25  ;;  %v7381_v25 = vld [vmem:[#allocation53_spill] sm:$0xff] }
 0x4dc   :  { %4219 = vmatmul.mubr.f32.gmra.mxu1 %v7357_v7  ;;  %4477 = vmatpush1.msra.mxu0 %v4155_v62 }
 0x4dd   :  { %4481 = vmatprep.subr.mxu0 %v4161_v33  ;;  %4224 = vmatprep.mubr.f32.mxu1 %v7342_v22 }
 0x4de   :  { %4485 = vmatpush1.msra.mxu0 %v4167_v53  ;;  %4312 = vmatprep.mubr.f32.mxu0 %v7342_v22 }
 0x4df   :  { %4315 = vmatmul.mubr.f32.gmra.mxu0 %v7358_v4  ;;  %v7383_v4 = vld [vmem:[#allocation60_spill] sm:$0xff] }
 0x4e0   :  { %4226 = vmatmul.mubr.f32.gmra.mxu1 %v7359_v30  ;;  %4320 = vmatprep.mubr.f32.mxu0 %v7342_v22 }
 0x4e1   :  { %4405 = vmatprep.mubr.f32.mxu1 %v7342_v22 }
 0x4e3   :  { %4323 = vmatmul.mubr.f32.gmra.mxu0 %v7360_v36 }
 0x4e4   :  { %4409 = vmatmul.mubr.f32.vlgmr.msra.gmra.mxu1 %v7361_v19  ;;  %4328 = vmatprep.mubr.f32.mxu0 %v7342_v22 }
 0x4e5   :  { %4578 = vmatpush1.msra.mxu1 %v6810_v6  ;;  %4414 = vmatprep.mubr.f32.mxu1 %v7342_v22 }
 0x4e6   :  { %4580 = vmatprep.subr.mxu1 %v6815_v48 }
 0x4e7   :  { %4582 = vmatpush1.msra.mxu1 %v6820_v44  ;;  %4331 = vmatmul.mubr.f32.gmra.mxu0 %v7362_v27 }
 0x4e8   :  { %4418 = vmatmul.mubr.f32.gmra.mxu1 %v7363_v46  ;;  %4518 = vmatprep.mubr.f32.mxu0 %v7342_v22 }
 0x4e9   :  { %4423 = vmatprep.mubr.f32.mxu1 %v7342_v22 }
 0x4eb   :  { %4520 = vmatmul.mubr.f32.vlgmr.msra.gmra.mxu0 %v7353_v45 }
 0x4ec   :  { %4427 = vmatmul.mubr.f32.gmra.mxu1 %v7364_v13  ;;  %4525 = vmatprep.mubr.f32.mxu0 %v7342_v22 }
 0x4ed   :  { %4432 = vmatprep.mubr.f32.mxu1 %v7342_v22 }
 0x4ef   :  { %4527 = vmatmul.mubr.f32.gmra.mxu0 %v7355_v3 }
 0x4f0   :  { %4436 = vmatmul.mubr.f32.gmra.mxu1 %v7365_v17  ;;  %4532 = vmatprep.mubr.f32.mxu0 %v7342_v22 }
 0x4f1   :  { %4615 = vmatprep.mubr.f32.mxu1 %v7342_v22 }
 0x4f3   :  { %4534 = vmatmul.mubr.f32.gmra.mxu0 %v7357_v7 }
 0x4f4   :  { %4617 = vmatmul.mubr.f32.vlgmr.msra.gmra.mxu1 %v7353_v45  ;;  %4539 = vmatprep.mubr.f32.mxu0 %v7342_v22  ;;  %v7378_v45 = vld [vmem:[#allocation54_spill] sm:$0xff] }
 0x4f5   :  { %4622 = vmatprep.mubr.f32.mxu1 %v7342_v22 }
 0x4f7   :  { %4541 = vmatmul.mubr.f32.gmra.mxu0 %v7359_v30 }
 0x4f8   :  { %4624 = vmatmul.mubr.f32.gmra.mxu1 %v7355_v3  ;;  %4710 = vmatprep.mubr.f32.mxu0 %v7342_v22  ;;  %v7380_v3 = vld [vmem:[#allocation58_spill] sm:$0xff] }
 0x4f9   :  { %4629 = vmatprep.mubr.f32.mxu1 %v7342_v22 }
 0x4fc   :  { %4631 = vmatmul.mubr.f32.gmra.mxu1 %v7357_v7  ;;  %v7382_v7 = vld [vmem:[#allocation57_spill] sm:$0xff] }
 0x4fd   :  { %4636 = vmatprep.mubr.f32.mxu1 %v7342_v22 }
 0x500   :  { %4638 = vmatmul.mubr.f32.gmra.mxu1 %v7359_v30 }
 0x501   :  { %4829 = vmatprep.mubr.f32.mxu1 %v7342_v22 }
 0x55e   :  { %v3404_v50 = vpop.f32.mrf.mxu0 }
 0x560   :  { %v3406_v39 = vpop.f32.mrf.mxu0 }
 0x566   :  { %v3566_v26 = vpop.f32.mrf.mxu1 }
 0x567   :  { %v3567_v31 = vadd.f32 %v3566_v26, %v3404_v50 }
 0x568   :  { %v3568_v18 = vpop.f32.mrf.mxu1 }
 0x569   :  { %v3569_v14 = vadd.f32 %v3568_v18, %v3406_v39 }
 0x570   :  { %v3675_v15 = vpop.f32.mrf.mxu0 }
 0x571   :  { %v3676_v11 = vadd.f32 %v3675_v15, %v3567_v31 }
 0x572   :  { %v3677_v35 = vpop.f32.mrf.mxu0 }
 0x573   :  { %v3678_v38 = vadd.f32 %v3677_v35, %v3569_v14 }
 0x579   :  { %v3767_v28 = vpop.f32.mrf.mxu1 }
 0x57a   :  { %v3768_v29 = vadd.f32 %v3767_v28, %v3676_v11 }
 0x57b   :  { %v3769_v1 = vpop.f32.mrf.mxu1 }
 0x57c   :  { %v3770_v63 = vadd.f32 %v3769_v1, %v3678_v38 }
 0x584   :  { %v3893_v24 = vpop.f32.mrf.mxu0 }
 0x585   :  { %v3894_v0 = vadd.f32 %v3893_v24, %v3768_v29 }
 0x586   :  { %v3895_v2 = vpop.f32.mrf.mxu0 }
 0x587   :  { %v3896_v43 = vadd.f32 %v3895_v2, %v3770_v63 }
 0x58a   :  { %v4081_v30 = vpop.f32.mrf.mxu0 }
 0x58c   :  { %v4083_v36 = vpop.f32.mrf.mxu0 }
 0x58f   :  { %v3983_v42 = vpop.f32.mrf.mxu1  ;;  %v4092_v27 = vpop.f32.mrf.mxu0 }
 0x590   :  { %v3984_v34 = vadd.f32 %v3983_v42, %v3894_v0 }
 0x591   :  { %v3985_v20 = vpop.f32.mrf.mxu1  ;;  %v6957_v13 = vpop.f32.mrf.mxu0 }
 0x592   :  { %v3988_v12 = vmul.f32 %v3984_v34, %v7366_v55  ;;  %v3986_v52 = vadd.f32 %v3985_v20, %v3896_v43 }
 0x593   :  { %v6959_v50 = vpop.f32.mrf.mxu0 }
 0x594   :  { %v3990_v51 = vadd.f32 %v3988_v12, %v7367_v41  ;;  %v3989_v21 = vmul.f32 %v3986_v52, %v7366_v55  ;;  %v4206_v19 = vpop.f32.mrf.mxu1 }
 0x595   :  { %v6961_v26 = vpop.f32.mrf.mxu0 }
 0x596   :  { %v3992_v56 = vmax.f32 %v3990_v51, 0.0  ;;  %v3991_v6 = vadd.f32 %v3989_v21, %v7367_v41  ;;  %v4208_v46 = vpop.f32.mrf.mxu1 }
 0x597   :  { %v6963_v18 = vpop.f32.mrf.mxu0 }
 0x598   :  { %v4676_v48 = vand.u32 4294901760, %v3992_v56  ;;  %v3993_v44 = vmax.f32 %v3991_v6, 0.0  ;;  %v4213_v17 = vpop.f32.mrf.mxu1 }
 0x59a   :  { %v4792_v23 = vsub.f32 %v3992_v56, %v4676_v48  ;;  %v4674_v57 = vand.u32 4294901760, %v3993_v44  ;;  %v4215_v39 = vpop.f32.mrf.mxu1 }
 0x59c   :  { %4675 = vmatprep.subr.mxu0 %v4674_v57  ;;  %v4786_v54 = vsub.f32 %v3993_v44, %v4674_v57  ;;  %v4793_v47 = vand.u32 4294901760, %v4792_v23  ;;  %v4220_v15 = vpop.f32.mrf.mxu1 }
 0x59d   :  { %4677 = vmatpush1.msra.mxu0 %v4676_v48 }
 0x59e   :  { %4716 = vmatmul.mubr.f32.vlgmr.msra.gmra.mxu0 %v7368_v60  ;;  %4890 = vmatprep.subr.mxu0 %v4786_v54  ;;  %v4787_v62 = vand.u32 4294901760, %v4786_v54  ;;  %v4794_v33 = vsub.f32 %v4792_v23, %v4793_v47  ;;  %v6965_v35 = vpop.f32.mrf.mxu1 }
 0x59f   :  { %4893 = vmatpush1.msra.mxu0 %v4792_v23  ;;  %4721 = vmatprep.mubr.f32.mxu0 %v7342_v22 }
 0x5a0   :  { %5095 = vmatprep.subr.mxu0 %v4787_v62  ;;  %v4788_v53 = vsub.f32 %v4786_v54, %v4787_v62  ;;  %v4795_v8 = vand.u32 4294901760, %v4794_v33  ;;  %v6969_v28 = vpop.f32.mrf.mxu1 }
 0x5a2   :  { %4727 = vmatmul.mubr.f32.gmra.mxu0 %v7369_v9  ;;  %v4789_v59 = vand.u32 4294901760, %v4788_v53  ;;  %v6971_v24 = vpop.f32.mrf.mxu1 }
 0x5a3   :  { %4732 = vmatprep.mubr.f32.mxu0 %v7342_v22 }
 0x5a4   :  { %4790 = vmatprep.subr.mxu1 %v4789_v59  ;;  %v4410_v11 = vpop.f32.mrf.mxu1 }
 0x5a5   :  { %4796 = vmatpush1.msra.mxu1 %v4795_v8 }
 0x5a6   :  { %4738 = vmatmul.mubr.f32.gmra.mxu0 %v7370_v61  ;;  %4831 = vmatmul.mubr.f32.vlgmr.msra.gmra.mxu1 %v7371_v58  ;;  %v4412_v38 = vpop.f32.mrf.mxu1 }
 0x5a7   :  { %4990 = vmatprep.subr.mxu1 %v4674_v57  ;;  %4743 = vmatprep.mubr.f32.mxu0 %v7342_v22 }
 0x5a8   :  { %4992 = vmatpush1.msra.mxu1 %v4676_v48  ;;  %4836 = vmatprep.mubr.f32.mxu1 %v7342_v22  ;;  %v4419_v2 = vpop.f32.mrf.mxu1 }
 0x5a9   :  { %5192 = vmatprep.subr.mxu1 %v4674_v57 }
 0x5aa   :  { %4749 = vmatmul.mubr.f32.gmra.mxu0 %v7372_v16  ;;  %4838 = vmatmul.mubr.f32.gmra.mxu1 %v7373_v5  ;;  %v6973_v0 = vpop.f32.mrf.mxu1 }
 0x5ab   :  { %4843 = vmatprep.mubr.f32.mxu1 %v7342_v22  ;;  %4926 = vmatprep.mubr.f32.mxu0 %v7342_v22 }
 0x5ac   :  { %v6975_v43 = vpop.f32.mrf.mxu1 }
 0x5ae   :  { %4845 = vmatmul.mubr.f32.gmra.mxu1 %v7374_v10  ;;  %4929 = vmatmul.mubr.f32.vlgmr.msra.gmra.mxu0 %v7375_v49  ;;  %v6979_v20 = vpop.f32.mrf.mxu1 }
 0x5af   :  { %5099 = vmatpush1.msra.mxu0 %v4793_v47  ;;  %4850 = vmatprep.mubr.f32.mxu1 %v7342_v22 }
 0x5b0   :  { %4934 = vmatprep.mubr.f32.mxu0 %v7342_v22  ;;  %v6983_v12 = vpop.f32.mrf.mxu1 }
 0x5b2   :  { %4852 = vmatmul.mubr.f32.gmra.mxu1 %v7376_v37  ;;  %4937 = vmatmul.mubr.f32.gmra.mxu0 %v7377_v32  ;;  %v6985_v41 = vpop.f32.mrf.mxu1 }
 0x5b3   :  { %4942 = vmatprep.mubr.f32.mxu0 %v7342_v22  ;;  %5025 = vmatprep.mubr.f32.mxu1 %v7342_v22 }
 0x5b4   :  { %v4618_v21 = vpop.f32.mrf.mxu1 }
 0x5b6   :  { %4945 = vmatmul.mubr.f32.gmra.mxu0 %v7378_v45  ;;  %5029 = vmatmul.mubr.f32.vlgmr.msra.gmra.mxu1 %v7379_v40  ;;  %v6987_v6 = vpop.f32.mrf.mxu1  ;;  %v4207_v45 = vadd.f32 %v4206_v19, %v4081_v30 }
 0x5b7   :  { %5194 = vmatpush1.msra.mxu1 %v4676_v48  ;;  %4950 = vmatprep.mubr.f32.mxu0 %v7342_v22 }
 0x5b8   :  { %5034 = vmatprep.mubr.f32.mxu1 %v7342_v22  ;;  %v6991_v44 = vpop.f32.mrf.mxu1 }
 0x5ba   :  { %4953 = vmatmul.mubr.f32.gmra.mxu0 %v7380_v3  ;;  %5038 = vmatmul.mubr.f32.gmra.mxu1 %v7381_v25  ;;  %v6995_v57 = vpop.f32.mrf.mxu1  ;;  %v4209_v25 = vadd.f32 %v4208_v46, %v4083_v36  ;;  %v4223_v36 = vadd.f32 %v6965_v35, %v6961_v26 }
 0x5bb   :  { %5043 = vmatprep.mubr.f32.mxu1 %v7342_v22  ;;  %5132 = vmatprep.mubr.f32.mxu0 %v7342_v22 }
 0x5bc   :  { %v6999_v47 = vpop.f32.mrf.mxu1 }
 0x5be   :  { %5047 = vmatmul.mubr.f32.gmra.mxu1 %v7382_v7  ;;  %5134 = vmatmul.mubr.f32.vlgmr.msra.gmra.mxu0 %v7371_v58  ;;  %v7003_v62 = vpop.f32.mrf.mxu1 }
 0x5bf   :  { %5052 = vmatprep.mubr.f32.mxu1 %v7342_v22  ;;  %5139 = vmatprep.mubr.f32.mxu0 %v7342_v22  ;;  %7384 = vst [vmem:[#allocation66_spill] sm:$0xff] %v7003_v62 }
 0x5c0   :  { %v7007_v9 = vpop.f32.mrf.mxu1 }
 0x5c1   :  { %7386 = vst [vmem:[#allocation6_spill] sm:$0xff] %v7007_v9 }
 0x5c2   :  { %5056 = vmatmul.mubr.f32.gmra.mxu1 %v7383_v4  ;;  %5141 = vmatmul.mubr.f32.gmra.mxu0 %v7373_v5  ;;  %v7011_v61 = vpop.f32.mrf.mxu1 }
 0x5c3   :  { %5146 = vmatprep.mubr.f32.mxu0 %v7342_v22  ;;  %5227 = vmatprep.mubr.f32.mxu1 %v7342_v22  ;;  %7387 = vst [vmem:[#allocation63_spill] sm:$0xff] %v7011_v61  ;;  %v4214_v61 = vadd.f32 %v4213_v17, %v4092_v27 }
 0x5c6   :  { %5148 = vmatmul.mubr.f32.gmra.mxu0 %v7374_v10  ;;  %5229 = vmatmul.mubr.f32.vlgmr.msra.gmra.mxu1 %v7371_v58 }
 0x5c7   :  { %5153 = vmatprep.mubr.f32.mxu0 %v7342_v22  ;;  %5234 = vmatprep.mubr.f32.mxu1 %v7342_v22 }
 0x5ca   :  { %5155 = vmatmul.mubr.f32.gmra.mxu0 %v7376_v37  ;;  %5236 = vmatmul.mubr.f32.gmra.mxu1 %v7373_v5 }
 0x5cb   :  { %5241 = vmatprep.mubr.f32.mxu1 %v7342_v22 }
 0x5ce   :  { %5243 = vmatmul.mubr.f32.gmra.mxu1 %v7374_v10 }
 0x5cf   :  { %5248 = vmatprep.mubr.f32.mxu1 %v7342_v22  ;;  %v6967_v22 = vpop.f32.mrf.mxu0 }
 0x5d1   :  { %v4308_v31 = vpop.f32.mrf.mxu0 }
 0x5d2   :  { %5250 = vmatmul.mubr.f32.gmra.mxu1 %v7376_v37  ;;  %v4309_v9 = vadd.f32 %v4308_v31, %v4207_v45 }
 0x5d3   :  { %v4310_v14 = vpop.f32.mrf.mxu0 }
 0x5d4   :  { %v4311_v62 = vadd.f32 %v4310_v14, %v4209_v25  ;;  %v4411_v19 = vadd.f32 %v4410_v11, %v4309_v9  ;;  %v4230_v11 = vadd.f32 %v6971_v24, %v6967_v22 }
 0x5d5   :  { %v4316_v1 = vpop.f32.mrf.mxu0 }
 0x5d6   :  { %v4413_v17 = vadd.f32 %v4412_v38, %v4311_v62 }
 0x5d7   :  { %v4318_v29 = vpop.f32.mrf.mxu0 }
 0x5d9   :  { %v4324_v63 = vpop.f32.mrf.mxu0 }
 0x5db   :  { %v4326_v42 = vpop.f32.mrf.mxu0 }
 0x5dd   :  { %v6977_v34 = vpop.f32.mrf.mxu0 }
 0x5df   :  { %v6981_v55 = vpop.f32.mrf.mxu0 }
 0x5e0   :  { %v4335_v22 = vadd.f32 %v6981_v55, %v4230_v11 }
 0x5e1   :  { %v4521_v52 = vpop.f32.mrf.mxu0 }
 0x5e2   :  { %v4522_v45 = vadd.f32 %v4521_v52, %v4411_v19  ;;  %v4440_v55 = vadd.f32 %v6985_v41, %v4335_v22 }
 0x5e3   :  { %v4523_v51 = vpop.f32.mrf.mxu0 }
 0x5e4   :  { %v4524_v38 = vadd.f32 %v4523_v51, %v4413_v17  ;;  %v4619_v62 = vadd.f32 %v4618_v21, %v4522_v45 }
 0x5e5   :  { %v4528_v56 = vpop.f32.mrf.mxu0 }
 0x5e7   :  { %v6989_v48 = vpop.f32.mrf.mxu0 }
 0x5e9   :  { %v6993_v23 = vpop.f32.mrf.mxu0 }
 0x5eb   :  { %v6997_v54 = vpop.f32.mrf.mxu0 }
 0x5ed   :  { %v7001_v60 = vpop.f32.mrf.mxu0 }
 0x5ef   :  { %v7005_v33 = vpop.f32.mrf.mxu0 }
 0x5f0   :  { %7385 = vst [vmem:[#allocation8_spill] sm:$0xff] %v7005_v33  ;;  %v4216_v33 = vadd.f32 %v4215_v39, %v6957_v13  ;;  %v4228_v13 = vadd.f32 %v6969_v28, %v6963_v18 }
 0x5f2   :  { %v4319_v31 = vadd.f32 %v4318_v29, %v4216_v33  ;;  %v4333_v18 = vadd.f32 %v6977_v34, %v4228_v13  ;;  %v4621_v33 = vadd.f32 %v6987_v6, %v4524_v38  ;;  %v7394_v13 = vld [vmem:[#allocation66_spill] sm:$0xff] }
 0x5f4   :  { %v4422_v9 = vadd.f32 %v6973_v0, %v4319_v31 }
 0x5f6   :  { %v4531_v0 = vadd.f32 %v6989_v48, %v4422_v9  ;;  %v7397_v9 = vld [vmem:[#allocation6_spill] sm:$0xff] }
 0x5f8   :  { %v4628_v6 = vadd.f32 %v6995_v57, %v4531_v0  ;;  %v7395_v57 = vld [vmem:[#allocation8_spill] sm:$0xff] }
 0x65e   :  { %v4717_v53 = vpop.f32.mrf.mxu0 }
 0x65f   :  { %v4718_v51 = vadd.f32 %v4717_v53, %v4619_v62 }
 0x660   :  { %v4719_v59 = vpop.f32.mrf.mxu0 }
 0x662   :  { %v7009_v8 = vpop.f32.mrf.mxu0 }
 0x664   :  { %v7013_v58 = vpop.f32.mrf.mxu0 }
 0x666   :  { %v7015_v16 = vpop.f32.mrf.mxu0  ;;  %v4832_v5 = vpop.f32.mrf.mxu1 }
 0x667   :  { %7388 = vst [vmem:[#allocation5_spill] sm:$0xff] %v7015_v16 }
 0x668   :  { %v7017_v10 = vpop.f32.mrf.mxu0  ;;  %v7019_v49 = vpop.f32.mrf.mxu1 }
 0x669   :  { %7389 = vst [vmem:[#allocation64_spill] sm:$0xff] %v7017_v10 }
 0x66a   :  { %v7021_v37 = vpop.f32.mrf.mxu0  ;;  %v7023_v32 = vpop.f32.mrf.mxu1 }
 0x66b   :  { %7390 = vst [vmem:[#allocation7_spill] sm:$0xff] %v7021_v37  ;;  %7391 = vst [vmem:[#allocation65_spill] sm:$0xff] %v7023_v32  ;;  %v4221_v37 = vadd.f32 %v4220_v15, %v6959_v50 }
 0x66c   :  { %v7025_v40 = vpop.f32.mrf.mxu0  ;;  %v7027_v3 = vpop.f32.mrf.mxu1 }
 0x66d   :  { %7392 = vst [vmem:[#allocation67_spill] sm:$0xff] %v7025_v40  ;;  %v4317_v40 = vadd.f32 %v4316_v1, %v4214_v61  ;;  %v4325_v39 = vadd.f32 %v4324_v63, %v4221_v37  ;;  %v4327_v1 = vadd.f32 %v4326_v42, %v4223_v36 }
 0x66e   :  { %v7029_v7 = vpop.f32.mrf.mxu1  ;;  %v4930_v4 = vpop.f32.mrf.mxu0 }
 0x66f   :  { %v4420_v15 = vadd.f32 %v4419_v2, %v4317_v40  ;;  %v4429_v29 = vadd.f32 %v6975_v43, %v4325_v39  ;;  %v4431_v52 = vadd.f32 %v6979_v20, %v4327_v1  ;;  %v4438_v43 = vadd.f32 %v6983_v12, %v4333_v18 }
 0x670   :  { %v7031_v16 = vpop.f32.mrf.mxu1  ;;  %v4932_v10 = vpop.f32.mrf.mxu0  ;;  %v4833_v20 = vadd.f32 %v4832_v5, %v4718_v51  ;;  %v4731_v5 = vadd.f32 %v7013_v58, %v4628_v6  ;;  %v7398_v58 = vld [vmem:[#allocation64_spill] sm:$0xff] }
 0x671   :  { %v4529_v2 = vadd.f32 %v4528_v56, %v4420_v15  ;;  %v4536_v34 = vadd.f32 %v6993_v23, %v4429_v29  ;;  %v4720_v56 = vadd.f32 %v4719_v59, %v4621_v33  ;;  %v4538_v40 = vadd.f32 %v6997_v54, %v4431_v52  ;;  %v7399_v33 = vld [vmem:[#allocation63_spill] sm:$0xff] }
 0x672   :  { %v7035_v32 = vpop.f32.mrf.mxu1  ;;  %v4938_v30 = vpop.f32.mrf.mxu0  ;;  %v4931_v53 = vadd.f32 %v4930_v4, %v4833_v20  ;;  %v4543_v36 = vadd.f32 %v7001_v60, %v4438_v43  ;;  %v7393_v41 = vld [vmem:[#allocation65_spill] sm:$0xff]  ;;  %v4545_v15 = vadd.f32 %v7395_v57, %v4440_v55  ;;  %v7400_v51 = vld [vmem:[#allocation7_spill] sm:$0xff] }
 0x673   :  { %v4626_v21 = vadd.f32 %v6991_v44, %v4529_v2  ;;  %v4835_v12 = vadd.f32 %v7019_v49, %v4720_v56  ;;  %v4633_v23 = vadd.f32 %v6999_v47, %v4536_v34  ;;  %v4635_v39 = vadd.f32 %v7394_v13, %v4538_v40 }
 0x674   :  { %v7039_v46 = vpop.f32.mrf.mxu1  ;;  %v7041_v27 = vpop.f32.mrf.mxu0  ;;  %v4842_v47 = vadd.f32 %v7027_v3, %v4731_v5  ;;  %v4640_v38 = vadd.f32 %v7397_v9, %v4543_v36  ;;  %v4642_v0 = vadd.f32 %v7399_v33, %v4545_v15  ;;  %v7401_v56 = vld [vmem:[#allocation67_spill] sm:$0xff] }
 0x675   :  { %v4729_v48 = vadd.f32 %v7009_v8, %v4626_v21  ;;  %v4933_v54 = vadd.f32 %v4932_v10, %v4835_v12  ;;  %v7396_v8 = vld [vmem:[#allocation5_spill] sm:$0xff]  ;;  %v4742_v29 = vadd.f32 %v7398_v58, %v4635_v39 }
 0x676   :  { %v7045_v14 = vpop.f32.mrf.mxu0  ;;  %v5030_v50 = vpop.f32.mrf.mxu1  ;;  %v4740_v45 = vadd.f32 %v7396_v8, %v4633_v23  ;;  %v4941_v62 = vadd.f32 %v7041_v27, %v4842_v47  ;;  %v4751_v3 = vadd.f32 %v7400_v51, %v4640_v38  ;;  %v4753_v20 = vadd.f32 %v7401_v56, %v4642_v0 }
 0x677   :  { %v4840_v17 = vadd.f32 %v7393_v41, %v4729_v48  ;;  %v5031_v31 = vadd.f32 %v5030_v50, %v4931_v53 }
 0x678   :  { %v7049_v26 = vpop.f32.mrf.mxu0  ;;  %v5032_v35 = vpop.f32.mrf.mxu1  ;;  %v4847_v10 = vadd.f32 %v7029_v7, %v4740_v45  ;;  %v4854_v27 = vadd.f32 %v7035_v32, %v4751_v3 }
 0x679   :  { %v4939_v11 = vadd.f32 %v4938_v30, %v4840_v17  ;;  %v5033_v60 = vadd.f32 %v5032_v35, %v4933_v54  ;;  %v4849_v30 = vadd.f32 %v7031_v16, %v4742_v29  ;;  %v4856_v16 = vadd.f32 %v7039_v46, %v4753_v20 }
 0x67a   :  { %v7054_v28 = vpop.f32.mrf.mxu0  ;;  %v5039_v63 = vpop.f32.mrf.mxu1  ;;  %v4947_v34 = vadd.f32 %v7045_v14, %v4847_v10 }
 0x67b   :  { %v5040_v2 = vadd.f32 %v5039_v63, %v4939_v11  ;;  %v4949_v55 = vadd.f32 %v7049_v26, %v4849_v30  ;;  %v4955_v14 = vadd.f32 %v7054_v28, %v4854_v27 }
 0x67c   :  { %v7058_v24 = vpop.f32.mrf.mxu0  ;;  %v5041_v42 = vpop.f32.mrf.mxu1 }
 0x67d   :  { %v4957_v32 = vadd.f32 %v7058_v24, %v4856_v16 }
 0x67e   :  { %v5048_v61 = vpop.f32.mrf.mxu1  ;;  %v5135_v37 = vpop.f32.mrf.mxu0 }
 0x67f   :  { %v5136_v1 = vadd.f32 %v5135_v37, %v5031_v31  ;;  %v5042_v37 = vadd.f32 %v5041_v42, %v4941_v62  ;;  %v5049_v40 = vadd.f32 %v5048_v61, %v4947_v34 }
 0x680   :  { %v5050_v25 = vpop.f32.mrf.mxu1  ;;  %v5137_v19 = vpop.f32.mrf.mxu0 }
 0x681   :  { %v5138_v52 = vadd.f32 %v5137_v19, %v5033_v60  ;;  %v5051_v42 = vadd.f32 %v5050_v25, %v4949_v55 }
 0x682   :  { %v5057_v44 = vpop.f32.mrf.mxu1  ;;  %v5142_v59 = vpop.f32.mrf.mxu0 }
 0x683   :  { %v5143_v21 = vadd.f32 %v5142_v59, %v5040_v2  ;;  %v5058_v59 = vadd.f32 %v5057_v44, %v4955_v14 }
 0x684   :  { %v5059_v49 = vpop.f32.mrf.mxu1  ;;  %v5144_v4 = vpop.f32.mrf.mxu0 }
 0x685   :  { %v5145_v19 = vadd.f32 %v5144_v4, %v5042_v37  ;;  %v5060_v17 = vadd.f32 %v5059_v49, %v4957_v32 }
 0x686   :  { %v5149_v50 = vpop.f32.mrf.mxu0  ;;  %v5230_v18 = vpop.f32.mrf.mxu1 }
 0x687   :  { %v5231_v22 = vadd.f32 %v5230_v18, %v5136_v1  ;;  %v5150_v53 = vadd.f32 %v5149_v50, %v5049_v40 }
 0x688   :  { %v5151_v35 = vpop.f32.mrf.mxu0  ;;  %v5232_v43 = vpop.f32.mrf.mxu1 }
 0x689   :  { %5257 = vst [vmem:[#allocation2 + $0x40] sm:$0xff] %v5231_v22  ;;  %v5233_v7 = vadd.f32 %v5232_v43, %v5138_v52  ;;  %v5152_v5 = vadd.f32 %v5151_v35, %v5051_v42 }
 0x68a   :  { %v5237_v63 = vpop.f32.mrf.mxu1  ;;  %v5156_v48 = vpop.f32.mrf.mxu0 }
 0x68b   :  { %5258 = vst [vmem:[#allocation2 + $0x48] sm:$0xff] %v5233_v7  ;;  %v5238_v6 = vadd.f32 %v5237_v63, %v5143_v21  ;;  %v5157_v54 = vadd.f32 %v5156_v48, %v5058_v59 }
 0x68c   :  { %v5239_v12 = vpop.f32.mrf.mxu1  ;;  %v5158_v61 = vpop.f32.mrf.mxu0 }
 0x68d   :  { %5259 = vst [vmem:[#allocation2 + $0x50] sm:$0xff] %v5238_v6  ;;  %v5240_v23 = vadd.f32 %v5239_v12, %v5145_v19  ;;  %v5159_v28 = vadd.f32 %v5158_v61, %v5060_v17 }
 0x68e   :  { %v5244_v36 = vpop.f32.mrf.mxu1 }
 0x68f   :  { %5260 = vst [vmem:[#allocation2 + $0x58] sm:$0xff] %v5240_v23  ;;  %v5245_v26 = vadd.f32 %v5244_v36, %v5150_v53 }
 0x690   :  { %v5246_v41 = vpop.f32.mrf.mxu1 }
 0x691   :  { %5261 = vst [vmem:[#allocation2 + $0x60] sm:$0xff] %v5245_v26  ;;  %v5247_v46 = vadd.f32 %v5246_v41, %v5152_v5 }
 0x692   :  { %v5251_v31 = vpop.f32.mrf.mxu1 }
 0x693   :  { %5262 = vst [vmem:[#allocation2 + $0x68] sm:$0xff] %v5247_v46  ;;  %v5252_v25 = vadd.f32 %v5251_v31, %v5157_v54 }
 0x694   :  { %v5253_v13 = vpop.f32.mrf.mxu1 }
 0x695   :  { %5263 = vst [vmem:[#allocation2 + $0x70] sm:$0xff] %v5252_v25  ;;  %v5254_v39 = vadd.f32 %v5253_v13, %v5159_v28 }
 0x697   :  { %5264 = vst [vmem:[#allocation2 + $0x78] sm:$0xff] %v5254_v39 }
 0x698   :  { %5310 = shalt.err (!%p5307_p4)
}
 0x699   :  { %s5332_s17 = smov 256  }
 0x69a   :  { %5276 = dma.vmem_to_hbm [thread:$0]  %s5271_s0, 2048, %s7109_s13, [#allocation3], %s5332_s17, %s5332_s17, %s5329_s1  }
 0x69b   :  { %5319 = dma.done.wait [#allocation3], 2048  }
 0x69c   :  { %5320 = vsyncadd [#allocation3], 4294965248 }
 0x69d   :  { %5280 = vsyncpa [#allocation3], 1 }

</bundles_post_ra>
